<compile_context>
chip_gen: v5e
topology: v5e:2x2
jax: 0.10.0
libtpu: 0.0.40
codegen_flags: <defaults>
</compile_context>

<pallas_src>
import functools

import jax
import jax.numpy as jnp
from jax.experimental import pallas as pl
from jax.experimental.pallas import tpu as pltpu


def _fused_mlp_kernel(x_ref, w1_ref, b1_ref, wh_ref, bh_ref, wo_ref, bo_ref,
                      o_ref, act_ref):
    """Grid axis = hidden-layer index (10 steps). act_ref carries the f32 act."""
    layer = pl.program_id(0)
    n_steps = pl.num_programs(0)

    # Step-0 prologue: fc1  (M, 8) f32 @ (8, 1024) f32 -> f32 carry.
    @pl.when(layer == 0)
    def _():
        y = jnp.dot(x_ref[...], w1_ref[...], preferred_element_type=jnp.float32)
        y = y + b1_ref[...]
        act_ref[...] = jnp.maximum(y, 0.0)

    # Every step: hidden layer `layer`  (M, 1024) bf16 @ (1024, 1024) bf16,
    # f32 accumulate, resident f32 bias, ReLU back into the f32 carry.
    a = act_ref[...].astype(jnp.bfloat16)
    y = jnp.dot(a, wh_ref[...], preferred_element_type=jnp.float32)
    y = y + bh_ref[layer]
    act_ref[...] = jnp.maximum(y, 0.0)

    # Last-step epilogue: output layer  (M, 1024) bf16 @ (1024, 128) bf16,
    # no ReLU, single HBM writeback.
    @pl.when(layer == n_steps - 1)
    def _():
        a_o = act_ref[...].astype(jnp.bfloat16)
        yo = jnp.dot(a_o, wo_ref[...], preferred_element_type=jnp.float32)
        o_ref[...] = (yo + bo_ref[...]).astype(o_ref.dtype)


@functools.partial(jax.jit, static_argnames=("out_features", "buffer_count"))
def fused_mlp_forward(x, w1p, b1p, wh, bh, wop, bop, *, out_features,
                      buffer_count=3):
    batch, fin = x.shape
    in_pad, hid = w1p.shape
    out_pad = wop.shape[1]
    num_hidden = wh.shape[0]

    # Pad rows to a multiple of 16 so the bf16 matmul LHS fills whole vregs.
    m_pad = max(16, ((batch + 15) // 16) * 16)
    x_p = jnp.pad(x.astype(jnp.float32),
                  ((0, m_pad - batch), (0, in_pad - fin)))

    hidden_idx = lambda l: (l, 0, 0)

    # Streamed hidden-weight spec; request 3-deep pipelining when available.
    wh_spec = pl.BlockSpec((None, hid, hid), hidden_idx)
    if buffer_count and buffer_count > 2 and hasattr(pl, "Buffered"):
        try:
            wh_spec = pl.BlockSpec((None, hid, hid), hidden_idx,
                                   pipeline_mode=pl.Buffered(buffer_count))
        except TypeError:
            wh_spec = pl.BlockSpec((None, hid, hid), hidden_idx)

    y = pl.pallas_call(
        _fused_mlp_kernel,
        out_shape=jax.ShapeDtypeStruct((m_pad, out_pad), jnp.float32),
        grid=(num_hidden,),
        in_specs=[
            pl.BlockSpec((m_pad, in_pad), lambda l: (0, 0)),        # x (resident)
            pl.BlockSpec((in_pad, hid), lambda l: (0, 0)),          # fc1 W (resident)
            pl.BlockSpec((1, hid), lambda l: (0, 0)),               # fc1 b (resident)
            wh_spec,                                                # hidden W (streamed)
            pl.BlockSpec((num_hidden, 1, hid), lambda l: (0, 0, 0)),  # hidden b (resident)
            pl.BlockSpec((hid, out_pad), lambda l: (0, 0)),         # out W (resident)
            pl.BlockSpec((1, out_pad), lambda l: (0, 0)),           # out b (resident)
        ],
        out_specs=pl.BlockSpec((m_pad, out_pad), lambda l: (0, 0)),
        scratch_shapes=[pltpu.VMEM((m_pad, hid), jnp.float32)],      # activation carry
        compiler_params=pltpu.CompilerParams(
            dimension_semantics=("arbitrary",),   # layer axis carries state
            vmem_limit_bytes=32 * 1024 * 1024,    # ~7 MiB actually used
        ),
    )(x_p, w1p, b1p, wh, bh, wop, bop)
    return y[:batch, :out_features]


def init_params(key, layer_sizes):
    """Deterministic PyTorch-style init: U(-1/sqrt(fan_in), 1/sqrt(fan_in))."""
    params = []
    for fan_in, fan_out in zip(layer_sizes[:-1], layer_sizes[1:]):
        key, kw, kb = jax.random.split(key, 3)
        bound = 1.0 / jnp.sqrt(jnp.float32(fan_in))
        w = jax.random.uniform(kw, (fan_in, fan_out), jnp.float32, -bound, bound)
        b = jax.random.uniform(kb, (fan_out,), jnp.float32, -bound, bound)
        params.append((w, b))
    return params


def pack_params(params, *, hid_pad=1024, in_pad=8, out_pad=128):
    """Pad + stack the per-layer (W, b) params for the fused kernel."""
    w1, b1 = params[0]
    fin, h1 = w1.shape
    w1p = jnp.zeros((in_pad, hid_pad), jnp.float32).at[:fin, :h1].set(w1)
    b1p = jnp.zeros((1, hid_pad), jnp.float32).at[0, :h1].set(b1)

    wh_list, bh_list = [], []
    for w, b in params[1:-1]:
        k, n = w.shape
        wh_list.append(jnp.zeros((hid_pad, hid_pad), jnp.float32).at[:k, :n].set(w))
        bh_list.append(jnp.zeros((1, hid_pad), jnp.float32).at[0, :n].set(b))
    wh = jnp.stack(wh_list).astype(jnp.bfloat16)   # (10, 1024, 1024) bf16 (streamed)
    bh = jnp.stack(bh_list)                        # (10, 1, 1024) f32 (resident)

    wo, bo = params[-1]
    k, n = wo.shape
    wop = jnp.zeros((hid_pad, out_pad), jnp.float32).at[:k, :n].set(wo)
    wop = wop.astype(jnp.bfloat16)
    bop = jnp.zeros((1, out_pad), jnp.float32).at[0, :n].set(bo)
    return w1p, b1p, wh, bh, wop, bop


if __name__ == "__main__":
    in_features, hidden, out_features = 5, 1000, 3
    layer_sizes = [in_features] + [hidden] * 11 + [out_features]

    key = jax.random.PRNGKey(0)
    key, kx = jax.random.split(key)
    batch = 8
    x = jax.random.normal(kx, (batch, in_features), jnp.float32)

    params = init_params(key, layer_sizes)
    packed = pack_params(params)

    try:
        y = fused_mlp_forward(x, *packed, out_features=out_features,
                              buffer_count=3)
        y = jax.block_until_ready(y)
    except Exception:
        # Fallback: default double-buffering if Buffered(3) isn't supported.
        y = fused_mlp_forward(x, *packed, out_features=out_features,
                              buffer_count=0)
        y = jax.block_until_ready(y)
    assert y.shape == (batch, out_features)

    # Reference 1: exactly the kernel's recipe (f32 carry, bf16 weights/LHS at
    # each matmul, f32 accumulate) -> tight-ish tolerance.
    a = jnp.maximum(x @ params[0][0] + params[0][1], 0.0)
    for w, b in params[1:-1]:
        h = jnp.dot(a.astype(jnp.bfloat16), w.astype(jnp.bfloat16),
                    preferred_element_type=jnp.float32) + b
        a = jnp.maximum(h, 0.0)
    w_o, b_o = params[-1]
    ref_bf16 = jnp.dot(a.astype(jnp.bfloat16), w_o.astype(jnp.bfloat16),
                       preferred_element_type=jnp.float32) + b_o
    assert jnp.allclose(y, ref_bf16, atol=2e-2, rtol=2e-2)

    # Reference 2: full-f32 forward of the original module -> loose tolerance
    # (bf16 weight streaming is the accepted numerics change).
    ref_f32 = x
    for idx, (w, b) in enumerate(params):
        ref_f32 = ref_f32 @ w + b
        if idx < len(params) - 1:
            ref_f32 = jnp.maximum(ref_f32, 0.0)
    assert jnp.allclose(y, ref_f32, atol=1e-1, rtol=1e-1)

    print("KERNEL_OK")
</pallas_src>

<mosaic_0001>
module attributes {stable_mosaic.version = 11 : i64} {
  func.func @_fused_mlp_kernel(%arg0: i32, %arg1: memref<16x8xf32, #tpu.memory_space<vmem>>, %arg2: memref<8x1024xf32, #tpu.memory_space<vmem>>, %arg3: memref<1x1024xf32, #tpu.memory_space<vmem>>, %arg4: memref<1x1024x1024xbf16, #tpu.memory_space<vmem>>, %arg5: memref<10x1x1024xf32, #tpu.memory_space<vmem>>, %arg6: memref<1024x128xbf16, #tpu.memory_space<vmem>>, %arg7: memref<1x128xf32, #tpu.memory_space<vmem>>, %arg8: memref<16x128xf32, #tpu.memory_space<vmem>>, %arg9: memref<16x1024xf32, #tpu.memory_space<vmem>>) attributes {dimension_semantics = [#tpu.dimension_semantics<arbitrary>], iteration_bounds = array<i64: 10>, scalar_prefetch = 0 : i64, scratch_operands = 1 : i64, tpu.core_type = #tpu.core_type<tc>, window_params = [{pipeline_mode = #tpu.pipeline_mode<synchronous>, transform_indices = @transform_0, window_bounds = array<i64: 16, 8>}, {pipeline_mode = #tpu.pipeline_mode<synchronous>, transform_indices = @transform_1, window_bounds = array<i64: 8, 1024>}, {pipeline_mode = #tpu.pipeline_mode<synchronous>, transform_indices = @transform_2, window_bounds = array<i64: 1, 1024>}, {transform_indices = @transform_3, window_bounds = array<i64: 1, 1024, 1024>}, {pipeline_mode = #tpu.pipeline_mode<synchronous>, transform_indices = @transform_4, window_bounds = array<i64: 10, 1, 1024>}, {pipeline_mode = #tpu.pipeline_mode<synchronous>, transform_indices = @transform_5, window_bounds = array<i64: 1024, 128>}, {pipeline_mode = #tpu.pipeline_mode<synchronous>, transform_indices = @transform_6, window_bounds = array<i64: 1, 128>}, {pipeline_mode = #tpu.pipeline_mode<synchronous>, transform_indices = @transform_7, window_bounds = array<i64: 16, 128>}]} {
    %c0_i32 = arith.constant 0 : i32
    %0 = arith.cmpi eq, %arg0, %c0_i32 : i32
    %1 = arith.extui %0 : i1 to i32
    %c0_i32_0 = arith.constant 0 : i32
    %2 = arith.cmpi ne, %1, %c0_i32_0 : i32
    scf.if %2 {
      %c0_11 = arith.constant 0 : index
      %c0_12 = arith.constant 0 : index
      %19 = vector.load %arg1[%c0_11, %c0_12] : memref<16x8xf32, #tpu.memory_space<vmem>>, vector<16x8xf32>
      %c0_13 = arith.constant 0 : index
      %c0_14 = arith.constant 0 : index
      %20 = vector.load %arg2[%c0_13, %c0_14] : memref<8x1024xf32, #tpu.memory_space<vmem>>, vector<8x1024xf32>
      %cst_15 = arith.constant dense<0.000000e+00> : vector<16x1024xf32>
      %21 = tpu.matmul %19, %20, %cst_15 {dimension_numbers = #tpu.dot_dimension_numbers<[1], [0], [0], [1], [0, 0, 1, 1], [], []>} : vector<16x8xf32>, vector<8x1024xf32>, vector<16x1024xf32> -> vector<16x1024xf32>
      %c0_16 = arith.constant 0 : index
      %c0_17 = arith.constant 0 : index
      %22 = vector.load %arg3[%c0_16, %c0_17] : memref<1x1024xf32, #tpu.memory_space<vmem>>, vector<1x1024xf32>
      %23 = vector.broadcast %22 : vector<1x1024xf32> to vector<16x1024xf32>
      %24 = arith.addf %21, %23 : vector<16x1024xf32>
      %cst_18 = arith.constant 0.000000e+00 : f32
      %25 = vector.broadcast %cst_18 : f32 to vector<16x1024xf32>
      %26 = arith.maximumf %24, %25 : vector<16x1024xf32>
      %c0_19 = arith.constant 0 : index
      %c0_20 = arith.constant 0 : index
      %27 = vector.load %arg9[%c0_19, %c0_20] : memref<16x1024xf32, #tpu.memory_space<vmem>>, vector<16x1024xf32>
      tpu.vector_store %arg9[%c0_19, %c0_20], %26 {strides = array<i32>} : memref<16x1024xf32, #tpu.memory_space<vmem>>, vector<16x1024xf32>,
    } else {
    }
    %c0 = arith.constant 0 : index
    %c0_1 = arith.constant 0 : index
    %3 = vector.load %arg9[%c0, %c0_1] : memref<16x1024xf32, #tpu.memory_space<vmem>>, vector<16x1024xf32>
    %4 = arith.truncf %3 : vector<16x1024xf32> to vector<16x1024xbf16>
    %c0_2 = arith.constant 0 : index
    %c0_3 = arith.constant 0 : index
    %c0_4 = arith.constant 0 : index
    %5 = vector.load %arg4[%c0_2, %c0_3, %c0_4] : memref<1x1024x1024xbf16, #tpu.memory_space<vmem>>, vector<1x1024x1024xbf16>
    %6 = vector.shape_cast %5 : vector<1x1024x1024xbf16> to vector<1024x1024xbf16>
    %cst = arith.constant dense<0.000000e+00> : vector<16x1024xf32>
    %7 = tpu.matmul %4, %6, %cst {dimension_numbers = #tpu.dot_dimension_numbers<[1], [0], [0], [1], [0, 0, 1, 1], [], []>} : vector<16x1024xbf16>, vector<1024x1024xbf16>, vector<16x1024xf32> -> vector<16x1024xf32>
    %8 = arith.index_cast %arg0 : i32 to index
    %c0_5 = arith.constant 0 : index
    %c0_6 = arith.constant 0 : index
    %9 = vector.load %arg5[%8, %c0_5, %c0_6] : memref<10x1x1024xf32, #tpu.memory_space<vmem>>, vector<1x1x1024xf32>
    %10 = vector.shape_cast %9 : vector<1x1x1024xf32> to vector<1x1024xf32>
    %11 = vector.broadcast %10 : vector<1x1024xf32> to vector<16x1024xf32>
    %12 = arith.addf %7, %11 : vector<16x1024xf32>
    %cst_7 = arith.constant 0.000000e+00 : f32
    %13 = vector.broadcast %cst_7 : f32 to vector<16x1024xf32>
    %14 = arith.maximumf %12, %13 : vector<16x1024xf32>
    %c0_8 = arith.constant 0 : index
    %c0_9 = arith.constant 0 : index
    %15 = vector.load %arg9[%c0_8, %c0_9] : memref<16x1024xf32, #tpu.memory_space<vmem>>, vector<16x1024xf32>
    tpu.vector_store %arg9[%c0_8, %c0_9], %14 {strides = array<i32>} : memref<16x1024xf32, #tpu.memory_space<vmem>>, vector<16x1024xf32>,
    %c9_i32 = arith.constant 9 : i32
    %16 = arith.cmpi eq, %arg0, %c9_i32 : i32
    %17 = arith.extui %16 : i1 to i32
    %c0_i32_10 = arith.constant 0 : i32
    %18 = arith.cmpi ne, %17, %c0_i32_10 : i32
    scf.if %18 {
      %c0_11 = arith.constant 0 : index
      %c0_12 = arith.constant 0 : index
      %19 = vector.load %arg9[%c0_11, %c0_12] : memref<16x1024xf32, #tpu.memory_space<vmem>>, vector<16x1024xf32>
      %20 = arith.truncf %19 : vector<16x1024xf32> to vector<16x1024xbf16>
      %c0_13 = arith.constant 0 : index
      %c0_14 = arith.constant 0 : index
      %21 = vector.load %arg6[%c0_13, %c0_14] : memref<1024x128xbf16, #tpu.memory_space<vmem>>, vector<1024x128xbf16>
      %cst_15 = arith.constant dense<0.000000e+00> : vector<16x128xf32>
      %22 = tpu.matmul %20, %21, %cst_15 {dimension_numbers = #tpu.dot_dimension_numbers<[1], [0], [0], [1], [0, 0, 1, 1], [], []>} : vector<16x1024xbf16>, vector<1024x128xbf16>, vector<16x128xf32> -> vector<16x128xf32>
      %c0_16 = arith.constant 0 : index
      %c0_17 = arith.constant 0 : index
      %23 = vector.load %arg7[%c0_16, %c0_17] : memref<1x128xf32, #tpu.memory_space<vmem>>, vector<1x128xf32>
      %24 = vector.broadcast %23 : vector<1x128xf32> to vector<16x128xf32>
      %25 = arith.addf %22, %24 : vector<16x128xf32>
      %c0_18 = arith.constant 0 : index
      %c0_19 = arith.constant 0 : index
      %26 = vector.load %arg8[%c0_18, %c0_19] : memref<16x128xf32, #tpu.memory_space<vmem>>, vector<16x128xf32>
      tpu.vector_store %arg8[%c0_18, %c0_19], %25 {strides = array<i32>} : memref<16x128xf32, #tpu.memory_space<vmem>>, vector<16x128xf32>,
    } else {
    }
    return
  }
  func.func @transform_0(%arg0: i32) -> (i32, i32) {
    %c0_i32 = arith.constant 0 : i32
    %c0_i32_0 = arith.constant 0 : i32
    %c0_i32_1 = arith.constant 0 : i32
    return %c0_i32, %c0_i32_0 : i32, i32
  }
  func.func @transform_1(%arg0: i32) -> (i32, i32) {
    %c0_i32 = arith.constant 0 : i32
    %c0_i32_0 = arith.constant 0 : i32
    %c0_i32_1 = arith.constant 0 : i32
    return %c0_i32, %c0_i32_0 : i32, i32
  }
  func.func @transform_2(%arg0: i32) -> (i32, i32) {
    %c0_i32 = arith.constant 0 : i32
    %c0_i32_0 = arith.constant 0 : i32
    %c0_i32_1 = arith.constant 0 : i32
    return %c0_i32, %c0_i32_0 : i32, i32
  }
  func.func @transform_3(%arg0: i32) -> (i32, i32, i32) {
    %c0_i32 = arith.constant 0 : i32
    %c0_i32_0 = arith.constant 0 : i32
    %c0_i32_1 = arith.constant 0 : i32
    return %arg0, %c0_i32, %c0_i32_0 : i32, i32, i32
  }
  func.func @transform_4(%arg0: i32) -> (i32, i32, i32) {
    %c0_i32 = arith.constant 0 : i32
    %c0_i32_0 = arith.constant 0 : i32
    %c0_i32_1 = arith.constant 0 : i32
    %c0_i32_2 = arith.constant 0 : i32
    return %c0_i32, %c0_i32_0, %c0_i32_1 : i32, i32, i32
  }
  func.func @transform_5(%arg0: i32) -> (i32, i32) {
    %c0_i32 = arith.constant 0 : i32
    %c0_i32_0 = arith.constant 0 : i32
    %c0_i32_1 = arith.constant 0 : i32
    return %c0_i32, %c0_i32_0 : i32, i32
  }
  func.func @transform_6(%arg0: i32) -> (i32, i32) {
    %c0_i32 = arith.constant 0 : i32
    %c0_i32_0 = arith.constant 0 : i32
    %c0_i32_1 = arith.constant 0 : i32
    return %c0_i32, %c0_i32_0 : i32, i32
  }
  func.func @transform_7(%arg0: i32) -> (i32, i32) {
    %c0_i32 = arith.constant 0 : i32
    %c0_i32_0 = arith.constant 0 : i32
    %c0_i32_1 = arith.constant 0 : i32
    return %c0_i32, %c0_i32_0 : i32, i32
  }
}

</mosaic_0001>

<bundles_post_ra>
// kernel: fused_mlp_forward.1
= control target key start
LH: loop header
LB: loop body
LE: loop exit
PB: predicated region body
PF: predicated region fallthrough
CT: control target
= control target key end

     0   :  { %12 = vsyncpa [#allocation4], 0  ;;  %s10035_s0 = inlined_call_operand.vmem [shape: f32[16,8], index: 0, kind: input, shape index: {}]   ;;  %s10036_s1 = inlined_call_operand.hbm [shape: f32[8,1024], index: 1, kind: input, shape index: {}]   ;;  %s10037_s2 = inlined_call_operand.hbm [shape: f32[1,1024], index: 2, kind: input, shape index: {}]   ;;  %s10038_s3 = inlined_call_operand.hbm [shape: bf16[10,1024,1024], index: 3, kind: input, shape index: {}]   ;;  %s10039_s4 = inlined_call_operand.hbm [shape: f32[10,1,1024], index: 4, kind: input, shape index: {}]   ;;  %s10040_s5 = inlined_call_operand.hbm [shape: bf16[1024,128], index: 5, kind: input, shape index: {}]   ;;  %s10041_s6 = inlined_call_operand.hbm [shape: f32[1,128], index: 6, kind: input, shape index: {}]   ;;  %s10042_s7 = inlined_call_operand.vmem [shape: f32[16,128], index: 7, kind: output, shape index: {}]  }
   0x1   :  { %13 = vsyncpa [#allocation6], 0 }
   0x2   :  { %14 = vsyncpa [#allocation10], 0  ;;  %s8707_s24 = smov 0   ;;  %s8709_s25 = smov 0  }
   0x3   :  { %s8711_s26 = smov 0   ;;  %s8713_s27 = smov 0  }
   0x4 LB: > { %s8726_s28 = sadd.s32 4294967295, %s8654_s27   ;;  %p103_p0 = scmp.ne.s32.totalorder %s8646_s25, %s8642_s24  ;;  %s8654_s27 = sphi %s8713_s27, %s10050_s27   ;;  %s8650_s26 = sphi %s8711_s26, %s10049_s26   ;;  %s8646_s25 = sphi %s8709_s25, %s10048_s25   ;;  %s8642_s24 = sphi %s8707_s24, %s10047_s24  }
   0x5   : > { %p104_p1 = scmp.eq.s32.totalorder %s8726_s28, 0  ;;  %p5406_p2 = scmp.ge.s32.totalorder %s8654_s27, 1 }
   0x6   : > { %p198_p3 = scmp.lt.s32.totalorder %s8654_s27, 11  ;;  %p5407_p4 = scmp.ne.s32.totalorder %s8726_s28, 0 }
   0x7   : > { %p8735_p5 = por %p104_p1, %p103_p0  ;;  %s213_s9 = sshll.u32 %s10036_s1, 4  ;;  %s214_s9 = int_to_ptr.hbm [resolvable:$true] %s213_s9 }
   0x8   : > { %p8742_p6 = pnand %p5406_p2, %p198_p3  ;;  %s8656_s11 = smov [#allocation3]  }
   0x9   : > { %s215_s12 = sshll.u32 %s8656_s11, 4  ;;  %s225_s15 = sshll.u32 %s10037_s2, 4  ;;  %s216_s12 = int_to_ptr.vmem [resolvable:$true] %s215_s12  ;;  %s226_s15 = int_to_ptr.hbm [resolvable:$true] %s225_s15 }
   0xa   : > { %p8347_p7 = pneg %p8742_p6  ;;  %s250_s19 = sshll.u32 %s10040_s5, 4  ;;  %s251_s19 = int_to_ptr.hbm [resolvable:$true] %s250_s19 }
   0xb   : > { %s8657_s20 = smov [#allocation5]   ;;  %s8658_s22 = smov [#allocation9]  }
   0xc   : > { %p8753_p8 = pnand %p8347_p7, %p104_p1  ;;  %s227_s21 = sshll.u32 %s8657_s20, 4  ;;  %s228_s21 = int_to_ptr.vmem [resolvable:$true] %s227_s21 }
   0xd   : > { %s252_s23 = sshll.u32 %s8658_s22, 4  ;;  %s236_s8 = sshll.u32 %s10039_s4, 4  ;;  %s253_s23 = int_to_ptr.vmem [resolvable:$true] %s252_s23  ;;  %s237_s8 = int_to_ptr.hbm [resolvable:$true] %s236_s8 }
   0xe   : > { %8350 = dma.hbm_to_vmem [thread:$0]  (!%p8753_p8), %s214_s9, 1024, %s216_s12, [#allocation4]  }
   0xf   : > { %8353 = dma.hbm_to_vmem [thread:$0]  (!%p8753_p8), %s226_s15, 128, %s228_s21, [#allocation6]  }
  0x10   : > { %s8659_s11 = smov 64   ;;  %s8660_s13 = smov 4  }
  0x11   : > { %8359 = dma.hbm_to_vmem [thread:$0]  (!%p8753_p8), %s251_s19, 8192, %s253_s23, [#allocation10], %s8659_s11, %s8659_s11, %s8660_s13  }
  0x12   : > { %s8661_s9 = smov [#allocation8]   ;;  %s8662_s14 = smov 128  }
  0x13   : > { %s238_s12 = sshll.u32 %s8661_s9, 4  ;;  %s8663_s15 = smov 8   ;;  %s239_s12 = int_to_ptr.vmem [resolvable:$true] %s238_s12 }
  0x14   : > { %8356 = dma.hbm_to_vmem [thread:$0]  (!%p8753_p8), %s237_s8, 1280, %s239_s12, [#allocation6], %s8662_s14, %s8662_s14, %s8663_s15  }
  0x15   : > { %s265_s20 = sshll.u32 %s10041_s6, 4  ;;  %s8664_s19 = smov [#allocation11]   ;;  %s266_s20 = int_to_ptr.hbm [resolvable:$true] %s265_s20 }
  0x16   : > { %s267_s21 = sshll.u32 %s8664_s19, 4  ;;  %s8777_s22 = sadd.s32 1, %s8654_s27   ;;  %s268_s21 = int_to_ptr.vmem [resolvable:$true] %s267_s21 }
  0x17   : > { %8362 = dma.hbm_to_vmem [thread:$0]  (!%p8753_p8), %s266_s20, 16, %s268_s21, [#allocation10]  }
  0x18   : > { %s87_s23 = ssub.s32 %s8654_s27, %s8777_s22  ;;  %s90_s24 = sadd.s32 1, %s8650_s26 }
  0x19   : > { %p88_p9 = scmp.eq.s32.totalorder %s87_s23, 0  ;;  %p97_p10 = scmp.ne.s32.totalorder %s8650_s26, %s8646_s25 }
  0x1a   : > { %p98_p11 = scmp.eq.s32.totalorder %s8654_s27, 0  ;;  %p8372_p12 = scmp.lt.s32.totalorder %s8654_s27, 10 }
  0x1b   : > { %s8787_s30 = scalar_select %p88_p9, %s8650_s26, %s90_s24  }
  0x1c   : > { %p99_p13 = por %p98_p11, %p97_p10  ;;  %s278_s8 = sand.u32 1, %s8654_s27  }
  0x1d   : > { %s280_s11 = sand.u32 1, %s8650_s26   ;;  %s7748_s9 = sshll.u32 %s8654_s27, 12 }
  0x1e   : > { %s5413_s13 = sshll.u32 %s280_s11, 12  ;;  %s287_s14 = scalar_lea.hbm %s10038_s3, %s7748_s9 }
  0x1f   : > { %s288_s15 = sshll.u32 %s287_s14, 4  ;;  %s282_s17 = scalar_lea.vmem [#allocation7], %s5413_s13  ;;  %s289_s15 = int_to_ptr.hbm [resolvable:$true] %s288_s15 }
  0x20   : > { %s290_s18 = sshll.u32 %s282_s17, 4  ;;  %p8797_p0 = pnand %p8372_p12, %p99_p13  ;;  %s291_s18 = int_to_ptr.vmem [resolvable:$true] %s290_s18 }
  0x21   : > { %s279_s19 = scalar_lea.sflag [#allocation4], %s278_s8  ;;  %s8574_s21 = sshra.s32 %s289_s15, 4  ;;  %s8575_s21 = int_to_ptr.hbm [resolvable:$true] %s8574_s21 }
  0x22   : > { %s8576_s23 = scalar_lea.hbm %s8575_s21, 4096  ;;  %p8578_p3 = pneg %p8797_p0 }
  0x23   : > { %p8577_p2 = scmp.ne.s32.totalorder %s8575_s21, %s8576_s23  ;;  %s8581_s13 = scalar_lea.hbm %s10038_s3, 40960 }
  0x24   : > { %p8582_p9 = scmp.lt.s32.totalorder %s8575_s21, %s10038_s3  ;;  %p8583_p10 = scmp.lt.s32.totalorder %s8581_s13, %s8576_s23 }
  0x25   : > { %p8579_p7 = pnand %p8578_p3, %p8577_p2 }
  0x26   : > { %p8584_p11 = por %p8583_p10, %p8582_p9 }
  0x27   : > { %p8580_p8 = pneg %p8579_p7 }
  0x29   : > { %p8585_p12 = pnand %p8584_p11, %p8580_p8 }
  0x2b   : > { %8588 = shalt.err (!%p8585_p12)
}
  0x2c   : > { %s8665_s8 = smov 512   ;;  %s8666_s12 = smov 32  }
  0x2d   : > { %8366 = dma.hbm_to_vmem [thread:$0]  (!%p8797_p0), %s289_s15, 65536, %s291_s18, %s279_s19, %s8665_s8, %s8665_s8, %s8666_s12  }
  0x2e   : > { %302 = sbr.rel (%p8742_p6) target bundleno = 1377 (0x561), region = 48 }
  0x33   : > { %8621 = dma.done.wait (%p104_p1), [#allocation4], 1024  }
  0x34   : > { %8623 = vsyncadd (%p104_p1), [#allocation4], 4294966272 }
  0x35   : > { %8625 = dma.done.wait (%p104_p1), [#allocation6], 128  }
  0x36   : > { %8627 = vsyncadd (%p104_p1), [#allocation6], 4294967168  ;;  %s314_s16 = sand.u32 1, %s8726_s28   ;;  %s316_s14 = sand.u32 1, %s8646_s25  }
  0x37   : > { %s5419_s15 = sshll.u32 %s316_s14, 12  ;;  %s315_s10 = scalar_lea.sflag [#allocation4], %s314_s16 }
  0x38   : > { %s8823_s17 = scalar_lea.vmem [#allocation7], %s5419_s15 }
  0x39   : > { %8629 = dma.done.wait (%p8735_p5), %s315_s10, 65536  }
  0x3a   : > { %8631 = vsyncadd (%p8735_p5), %s315_s10, 4294901760 }
  0x3b   : > { %8633 = dma.done.wait (%p104_p1), [#allocation6], 1280  }
  0x3c   : > { %8635 = vsyncadd (%p104_p1), [#allocation6], 4294966016 }
  0x3d   : > { %8637 = dma.done.wait (%p104_p1), [#allocation10], 8208  }
  0x3e   : > { %8639 = vsyncadd (%p104_p1), [#allocation10], 4294959088  ;;  %363 = sbr.rel (%p5407_p4) target bundleno = 231 (0xe7), region = 76 }
  0x43   : > { %v368_v0 = vld [vmem:[#allocation3 + $0x10] sm:$0xff]  ;;  %v369_v1 = vld [vmem:[#allocation3 + $0x18] sm:$0xff]  ;;  %v364_v2 = vld [vmem:[%s10035_s0] sm:$0xff]  ;;  %vm392_vm0 = vcmask 64512  }
  0x44   : > { %460 = vmatpush.msra.mxu2 %v368_v0  ;;  %483 = vmatpush.msra.mxu3 %v369_v1  ;;  %v372_v3 = vld [vmem:[#allocation3 + $0x30] sm:$0xff]  ;;  %v373_v4 = vld [vmem:[#allocation3 + $0x38] sm:$0xff]  ;;  %v366_v5 = vld [vmem:[#allocation3] sm:$0xff] }
  0x45   : > { %5428 = vmatmul.msk.f32.vlgmr.msra.gmra.mxu2 %vm392_vm0, %v364_v2  ;;  %5430 = vmatmul.msk.f32.vlgmr.msra.gmra.mxu3 %vm392_vm0, %v364_v2  ;;  %v367_v6 = vld [vmem:[#allocation3 + $0x8] sm:$0xff]  ;;  %v370_v7 = vld [vmem:[#allocation3 + $0x20] sm:$0xff] }
  0x46   : > { %552 = vmatpush.msrb.mxu2 %v372_v3  ;;  %575 = vmatpush.msrb.mxu3 %v373_v4  ;;  %v371_v8 = vld [vmem:[#allocation3 + $0x28] sm:$0xff]  ;;  %v8861_v10 = vld [vmem:[#allocation5] sm:$0xff] }
  0x47   : > { %414 = vmatpush.msra.mxu0 %v366_v5  ;;  %437 = vmatpush.msra.mxu1 %v367_v6  ;;  %v365_v9 = vld [vmem:[%s10035_s0 + $0x8] sm:$0xff]  ;;  %v376_v11 = vperm.slane %v8861_v10, 0  ;;  %v377_v12 = vperm.slane %v8861_v10, 1  ;;  %v378_v15 = vperm.slane %v8861_v10, 2  ;;  %v379_v16 = vperm.slane %v8861_v10, 3 }
  0x48   : > { %5424 = vmatmul.msk.f32.vlgmr.msra.gmra.mxu0 %vm392_vm0, %v364_v2  ;;  %5426 = vmatmul.msk.f32.vlgmr.msra.gmra.mxu1 %vm392_vm0, %v364_v2  ;;  %v380_v37 = vperm.slane %v8861_v10, 4  ;;  %v381_v38 = vperm.slane %v8861_v10, 5  ;;  %v382_v43 = vperm.slane %v8861_v10, 6  ;;  %v383_v44 = vperm.slane %v8861_v10, 7 }
  0x49   : > { %506 = vmatpush.msrb.mxu0 %v370_v7  ;;  %529 = vmatpush.msrb.mxu1 %v371_v8 }
  0x4d   : > { %5429 = vmatmul.msk.f32.gmra.mxu2 %vm392_vm0, %v365_v9  ;;  %5431 = vmatmul.msk.f32.gmra.mxu3 %vm392_vm0, %v365_v9 }
  0x50   : > { %5425 = vmatmul.msk.f32.gmra.mxu0 %vm392_vm0, %v365_v9  ;;  %5427 = vmatmul.msk.f32.gmra.mxu1 %vm392_vm0, %v365_v9 }
  0x55   : > { %5436 = vmatmul.msk.f32.vlgmr.msrb.gmra.mxu2 %vm392_vm0, %v364_v2  ;;  %5438 = vmatmul.msk.f32.vlgmr.msrb.gmra.mxu3 %vm392_vm0, %v364_v2 }
  0x58   : > { %5432 = vmatmul.msk.f32.vlgmr.msrb.gmra.mxu0 %vm392_vm0, %v364_v2  ;;  %5434 = vmatmul.msk.f32.vlgmr.msrb.gmra.mxu1 %vm392_vm0, %v364_v2 }
  0x5d   : > { %5437 = vmatmul.msk.f32.gmra.mxu2 %vm392_vm0, %v365_v9  ;;  %5439 = vmatmul.msk.f32.gmra.mxu3 %vm392_vm0, %v365_v9 }
  0x60   : > { %5433 = vmatmul.msk.f32.gmra.mxu0 %vm392_vm0, %v365_v9  ;;  %5435 = vmatmul.msk.f32.gmra.mxu1 %vm392_vm0, %v365_v9 }
  0xc5   : > { %v416_v13 = vpop.f32.mrf.mxu0  ;;  %v439_v14 = vpop.f32.mrf.mxu1 }
  0xc6   : > { %v417_v17 = vadd.f32 %v416_v13, %v376_v11  ;;  %v440_v18 = vadd.f32 %v439_v14, %v377_v12 }
  0xc8   : > { %v583_v19 = vmax.f32 %v417_v17, 0.0  ;;  %v584_v20 = vmax.f32 %v440_v18, 0.0  ;;  %v462_v21 = vpop.f32.mrf.mxu2  ;;  %v485_v22 = vpop.f32.mrf.mxu3 }
  0xc9   : > { %v463_v23 = vadd.f32 %v462_v21, %v378_v15  ;;  %v486_v24 = vadd.f32 %v485_v22, %v379_v16 }
  0xca   : > { %599 = vst [vmem:[#allocation2 + $0x30] sm:$0xff] %v583_v19 }
  0xcb   : > { %600 = vst [vmem:[#allocation2] sm:$0xff] %v584_v20  ;;  %v585_v25 = vmax.f32 %v463_v23, 0.0  ;;  %v586_v26 = vmax.f32 %v486_v24, 0.0 }
  0xcd   : > { %601 = vst [vmem:[#allocation2 + $0x58] sm:$0xff] %v585_v25  ;;  %v419_v27 = vpop.f32.mrf.mxu0  ;;  %v442_v28 = vpop.f32.mrf.mxu1 }
  0xce   : > { %602 = vst [vmem:[#allocation2 + $0x18] sm:$0xff] %v586_v26  ;;  %v420_v29 = vadd.f32 %v419_v27, %v376_v11  ;;  %v443_v30 = vadd.f32 %v442_v28, %v377_v12 }
  0xd0   : > { %v591_v31 = vmax.f32 %v420_v29, 0.0  ;;  %v592_v32 = vmax.f32 %v443_v30, 0.0  ;;  %v465_v33 = vpop.f32.mrf.mxu2  ;;  %v488_v34 = vpop.f32.mrf.mxu3 }
  0xd1   : > { %v466_v35 = vadd.f32 %v465_v33, %v378_v15  ;;  %v489_v36 = vadd.f32 %v488_v34, %v379_v16 }
  0xd2   : > { %607 = vst [vmem:[#allocation2 + $0x40] sm:$0xff] %v591_v31 }
  0xd3   : > { %608 = vst [vmem:[#allocation2 + $0x20] sm:$0xff] %v592_v32  ;;  %v593_v39 = vmax.f32 %v466_v35, 0.0  ;;  %v594_v40 = vmax.f32 %v489_v36, 0.0 }
  0xd5   : > { %609 = vst [vmem:[#allocation2 + $0x10] sm:$0xff] %v593_v39  ;;  %v508_v41 = vpop.f32.mrf.mxu0  ;;  %v531_v42 = vpop.f32.mrf.mxu1 }
  0xd6   : > { %610 = vst [vmem:[#allocation2 + $0x38] sm:$0xff] %v594_v40  ;;  %v509_v45 = vadd.f32 %v508_v41, %v380_v37  ;;  %v532_v46 = vadd.f32 %v531_v42, %v381_v38 }
  0xd8   : > { %v587_v47 = vmax.f32 %v509_v45, 0.0  ;;  %v588_v48 = vmax.f32 %v532_v46, 0.0  ;;  %v554_v49 = vpop.f32.mrf.mxu2  ;;  %v577_v50 = vpop.f32.mrf.mxu3 }
  0xd9   : > { %v555_v51 = vadd.f32 %v554_v49, %v382_v43  ;;  %v578_v52 = vadd.f32 %v577_v50, %v383_v44 }
  0xda   : > { %603 = vst [vmem:[#allocation2 + $0x50] sm:$0xff] %v587_v47 }
  0xdb   : > { %604 = vst [vmem:[#allocation2 + $0x68] sm:$0xff] %v588_v48  ;;  %v589_v53 = vmax.f32 %v555_v51, 0.0  ;;  %v590_v54 = vmax.f32 %v578_v52, 0.0 }
  0xdd   : > { %605 = vst [vmem:[#allocation2 + $0x8] sm:$0xff] %v589_v53  ;;  %v511_v55 = vpop.f32.mrf.mxu0  ;;  %v534_v56 = vpop.f32.mrf.mxu1 }
  0xde   : > { %606 = vst [vmem:[#allocation2 + $0x48] sm:$0xff] %v590_v54  ;;  %v512_v57 = vadd.f32 %v511_v55, %v380_v37  ;;  %v535_v58 = vadd.f32 %v534_v56, %v381_v38 }
  0xe0   : > { %v595_v59 = vmax.f32 %v512_v57, 0.0  ;;  %v596_v60 = vmax.f32 %v535_v58, 0.0  ;;  %v557_v61 = vpop.f32.mrf.mxu2  ;;  %v580_v62 = vpop.f32.mrf.mxu3 }
  0xe1   : > { %v558_v63 = vadd.f32 %v557_v61, %v382_v43  ;;  %v581_v0 = vadd.f32 %v580_v62, %v383_v44 }
  0xe2   : > { %611 = vst [vmem:[#allocation2 + $0x60] sm:$0xff] %v595_v59 }
  0xe3   : > { %612 = vst [vmem:[#allocation2 + $0x70] sm:$0xff] %v596_v60  ;;  %v597_v1 = vmax.f32 %v558_v63, 0.0  ;;  %v598_v2 = vmax.f32 %v581_v0, 0.0 }
  0xe5   : > { %613 = vst [vmem:[#allocation2 + $0x78] sm:$0xff] %v597_v1 }
  0xe6   : > { %614 = vst [vmem:[#allocation2 + $0x28] sm:$0xff] %v598_v2 }
  0xe7 PF: > { %v5667_v3 = vld [vmem:[%s8823_s17 + $0x1c0] sm:$0xf]  ;;  %s5440_s21 = sshll.u32 %s8726_s28, 3  ;;  %p7489_p1 = scmp.ne.s32.totalorder %s8726_s28, 9 }
  0xe8   : > { %v7809_v4 = vld [vmem:[%s8823_s17 + $0x1dc] sm:$0xf0]  ;;  %s9274_s23 = scalar_lea.vmem [#allocation8], %s5440_s21 }
  0xe9   : > { %v5923_v5 = vld [vmem:[%s8823_s17 + $0x3c0] sm:$0xf]  ;;  %v5668_v6 = vor.u32 %v7809_v4, %v5667_v3 }
  0xea   : > { %v7873_v7 = vld [vmem:[%s8823_s17 + $0x3dc] sm:$0xf0] }
  0xeb   : > { %v6179_v8 = vld [vmem:[%s8823_s17 + $0x5c0] sm:$0xf]  ;;  %v5924_v10 = vor.u32 %v7873_v7, %v5923_v5  ;;  %3731 = vmatpush.bf16.msra.mxu0 %v5668_v6 }
  0xec   : > { %v7937_v9 = vld [vmem:[%s8823_s17 + $0x5dc] sm:$0xf0] }
  0xed   : > { %v6180_v11 = vor.u32 %v7937_v9, %v6179_v8  ;;  %v6435_v12 = vld [vmem:[%s8823_s17 + $0x7c0] sm:$0xf]  ;;  %3745 = vmatpush.bf16.msra.mxu1 %v5924_v10 }
  0xee   : > { %v8001_v13 = vld [vmem:[%s8823_s17 + $0x7dc] sm:$0xf0] }
  0xef   : > { %v5635_v14 = vld [vmem:[%s8823_s17 + $0x180] sm:$0xf]  ;;  %v6436_v15 = vor.u32 %v8001_v13, %v6435_v12  ;;  %3759 = vmatpush.bf16.msra.mxu2 %v6180_v11 }
  0xf0   : > { %v7801_v16 = vld [vmem:[%s8823_s17 + $0x19c] sm:$0xf0] }
  0xf1   : > { %v5891_v17 = vld [vmem:[%s8823_s17 + $0x380] sm:$0xf]  ;;  %v5636_v19 = vor.u32 %v7801_v16, %v5635_v14  ;;  %3773 = vmatpush.bf16.msra.mxu3 %v6436_v15 }
  0xf2   : > { %v7865_v18 = vld [vmem:[%s8823_s17 + $0x39c] sm:$0xf0] }
  0xf3   : > { %v5892_v20 = vor.u32 %v7865_v18, %v5891_v17  ;;  %v6147_v21 = vld [vmem:[%s8823_s17 + $0x580] sm:$0xf]  ;;  %3732 = vmatpush.bf16.msra.mxu0 %v5636_v19 }
  0xf4   : > { %v7929_v22 = vld [vmem:[%s8823_s17 + $0x59c] sm:$0xf0] }
  0xf5   : > { %v6403_v23 = vld [vmem:[%s8823_s17 + $0x780] sm:$0xf]  ;;  %v6148_v24 = vor.u32 %v7929_v22, %v6147_v21  ;;  %3746 = vmatpush.bf16.msra.mxu1 %v5892_v20 }
  0xf6   : > { %v7993_v25 = vld [vmem:[%s8823_s17 + $0x79c] sm:$0xf0] }
  0xf7   : > { %v5603_v26 = vld [vmem:[%s8823_s17 + $0x140] sm:$0xf]  ;;  %v6404_v28 = vor.u32 %v7993_v25, %v6403_v23  ;;  %3760 = vmatpush.bf16.msra.mxu2 %v6148_v24 }
  0xf8   : > { %v7793_v27 = vld [vmem:[%s8823_s17 + $0x15c] sm:$0xf0] }
  0xf9   : > { %v5859_v29 = vld [vmem:[%s8823_s17 + $0x340] sm:$0xf]  ;;  %v5604_v32 = vor.u32 %v7793_v27, %v5603_v26  ;;  %3774 = vmatpush.bf16.msra.mxu3 %v6404_v28 }
  0xfa   : > { %v7857_v30 = vld [vmem:[%s8823_s17 + $0x35c] sm:$0xf0] }
  0xfb   : > { %v6115_v31 = vld [vmem:[%s8823_s17 + $0x540] sm:$0xf]  ;;  %v5860_v36 = vor.u32 %v7857_v30, %v5859_v29  ;;  %3733 = vmatpush.bf16.msra.mxu0 %v5604_v32 }
  0xfc   : > { %v7921_v33 = vld [vmem:[%s8823_s17 + $0x55c] sm:$0xf0] }
  0xfd   : > { %v6371_v34 = vld [vmem:[%s8823_s17 + $0x740] sm:$0xf]  ;;  %v6116_v37 = vor.u32 %v7921_v33, %v6115_v31  ;;  %3747 = vmatpush.bf16.msra.mxu1 %v5860_v36 }
  0xfe   : > { %v7985_v35 = vld [vmem:[%s8823_s17 + $0x75c] sm:$0xf0] }
  0xff   : > { %v5571_v38 = vld [vmem:[%s8823_s17 + $0x100] sm:$0xf]  ;;  %v6372_v41 = vor.u32 %v7985_v35, %v6371_v34  ;;  %3761 = vmatpush.bf16.msra.mxu2 %v6116_v37 }
 0x100   : > { %v7785_v39 = vld [vmem:[%s8823_s17 + $0x11c] sm:$0xf0] }
 0x101   : > { %v5827_v40 = vld [vmem:[%s8823_s17 + $0x300] sm:$0xf]  ;;  %v5572_v47 = vor.u32 %v7785_v39, %v5571_v38  ;;  %3775 = vmatpush.bf16.msra.mxu3 %v6372_v41 }
 0x102   : > { %v7849_v42 = vld [vmem:[%s8823_s17 + $0x31c] sm:$0xf0] }
 0x103   : > { %v6083_v43 = vld [vmem:[%s8823_s17 + $0x500] sm:$0xf]  ;;  %v5828_v48 = vor.u32 %v7849_v42, %v5827_v40  ;;  %3734 = vmatpush.bf16.msra.mxu0 %v5572_v47 }
 0x104   : > { %v7913_v44 = vld [vmem:[%s8823_s17 + $0x51c] sm:$0xf0] }
 0x105   : > { %v6339_v45 = vld [vmem:[%s8823_s17 + $0x700] sm:$0xf]  ;;  %v6084_v49 = vor.u32 %v7913_v44, %v6083_v43  ;;  %3748 = vmatpush.bf16.msra.mxu1 %v5828_v48 }
 0x106   : > { %v7977_v46 = vld [vmem:[%s8823_s17 + $0x71c] sm:$0xf0] }
 0x107   : > { %v5539_v50 = vld [vmem:[%s8823_s17 + $0xc0] sm:$0xf]  ;;  %v6340_v53 = vor.u32 %v7977_v46, %v6339_v45  ;;  %3762 = vmatpush.bf16.msra.mxu2 %v6084_v49 }
 0x108   : > { %v7777_v51 = vld [vmem:[%s8823_s17 + $0xdc] sm:$0xf0] }
 0x109   : > { %v5795_v52 = vld [vmem:[%s8823_s17 + $0x2c0] sm:$0xf]  ;;  %v5540_v59 = vor.u32 %v7777_v51, %v5539_v50  ;;  %3776 = vmatpush.bf16.msra.mxu3 %v6340_v53 }
 0x10a   : > { %v7841_v54 = vld [vmem:[%s8823_s17 + $0x2dc] sm:$0xf0] }
 0x10b   : > { %v6051_v55 = vld [vmem:[%s8823_s17 + $0x4c0] sm:$0xf]  ;;  %v5796_v60 = vor.u32 %v7841_v54, %v5795_v52  ;;  %3735 = vmatpush.bf16.msra.mxu0 %v5540_v59 }
 0x10c   : > { %v7905_v56 = vld [vmem:[%s8823_s17 + $0x4dc] sm:$0xf0] }
 0x10d   : > { %v6307_v57 = vld [vmem:[%s8823_s17 + $0x6c0] sm:$0xf]  ;;  %v6052_v61 = vor.u32 %v7905_v56, %v6051_v55  ;;  %3749 = vmatpush.bf16.msra.mxu1 %v5796_v60  ;;  %v615_v55 = vld [vmem:[#allocation2 + $0x30] sm:$0xff]  ;;  %v623_v56 = vld [vmem:[#allocation2 + $0x40] sm:$0xff] }
 0x10e   : > { %v7969_v58 = vld [vmem:[%s8823_s17 + $0x6dc] sm:$0xf0] }
 0x10f   : > { %v5507_v62 = vld [vmem:[%s8823_s17 + $0x80] sm:$0xf]  ;;  %v6308_v1 = vor.u32 %v7969_v58, %v6307_v57  ;;  %3763 = vmatpush.bf16.msra.mxu2 %v6052_v61  ;;  %v617_v57 = vld [vmem:[#allocation2 + $0x58] sm:$0xff]  ;;  %v8953_v61 = vpack.c.bf16 %v623_v56, %v615_v55 }
 0x110   : > { %v7769_v63 = vld [vmem:[%s8823_s17 + $0x9c] sm:$0xf0] }
 0x111   : > { %v5763_v0 = vld [vmem:[%s8823_s17 + $0x280] sm:$0xf]  ;;  %v5508_v7 = vor.u32 %v7769_v63, %v5507_v62  ;;  %3777 = vmatpush.bf16.msra.mxu3 %v6308_v1  ;;  %v625_v62 = vld [vmem:[#allocation2 + $0x10] sm:$0xff] }
 0x112   : > { %v7833_v2 = vld [vmem:[%s8823_s17 + $0x29c] sm:$0xf0] }
 0x113   : > { %v6019_v3 = vld [vmem:[%s8823_s17 + $0x480] sm:$0xf]  ;;  %v5764_v8 = vor.u32 %v7833_v2, %v5763_v0  ;;  %3736 = vmatpush.bf16.msra.mxu0 %v5508_v7 }
 0x114   : > { %v7897_v4 = vld [vmem:[%s8823_s17 + $0x49c] sm:$0xf0] }
 0x115   : > { %v6275_v5 = vld [vmem:[%s8823_s17 + $0x680] sm:$0xf]  ;;  %v6020_v9 = vor.u32 %v7897_v4, %v6019_v3  ;;  %3750 = vmatpush.bf16.msra.mxu1 %v5764_v8  ;;  %v8958_v4 = vpack.c.bf16 %v625_v62, %v617_v57 }
 0x116   : > { %v7961_v6 = vld [vmem:[%s8823_s17 + $0x69c] sm:$0xf0] }
 0x117   : > { %v5475_v10 = vld [vmem:[%s8823_s17 + $0x40] sm:$0xf]  ;;  %v6276_v13 = vor.u32 %v7961_v6, %v6275_v5  ;;  %3764 = vmatpush.bf16.msra.mxu2 %v6020_v9  ;;  %v616_v9 = vld [vmem:[#allocation2] sm:$0xff] }
 0x118   : > { %v7761_v11 = vld [vmem:[%s8823_s17 + $0x5c] sm:$0xf0] }
 0x119   : > { %v5731_v12 = vld [vmem:[%s8823_s17 + $0x240] sm:$0xf]  ;;  %v5476_v19 = vor.u32 %v7761_v11, %v5475_v10  ;;  %3778 = vmatpush.bf16.msra.mxu3 %v6276_v13  ;;  %v624_v10 = vld [vmem:[#allocation2 + $0x20] sm:$0xff]  ;;  %v618_v11 = vld [vmem:[#allocation2 + $0x18] sm:$0xff] }
 0x11a   : > { %v7825_v14 = vld [vmem:[%s8823_s17 + $0x25c] sm:$0xf0]  ;;  %v8965_v13 = vpack.c.bf16 %v624_v10, %v616_v9 }
 0x11b   : > { %v5987_v15 = vld [vmem:[%s8823_s17 + $0x440] sm:$0xf]  ;;  %v5732_v22 = vor.u32 %v7825_v14, %v5731_v12  ;;  %3737 = vmatpush.bf16.msra.mxu0 %v5476_v19  ;;  %v626_v14 = vld [vmem:[#allocation2 + $0x38] sm:$0xff] }
 0x11c   : > { %v7889_v16 = vld [vmem:[%s8823_s17 + $0x45c] sm:$0xf0] }
 0x11d   : > { %v6243_v17 = vld [vmem:[%s8823_s17 + $0x640] sm:$0xf]  ;;  %v5988_v23 = vor.u32 %v7889_v16, %v5987_v15  ;;  %3751 = vmatpush.bf16.msra.mxu1 %v5732_v22 }
 0x11e   : > { %v7953_v18 = vld [vmem:[%s8823_s17 + $0x65c] sm:$0xf0] }
 0x11f   : > { %v5443_v20 = vld [vmem:[%s8823_s17] sm:$0xf]  ;;  %v6244_v27 = vor.u32 %v7953_v18, %v6243_v17  ;;  %3765 = vmatpush.bf16.msra.mxu2 %v5988_v23 }
 0x120   : > { %v7753_v21 = vld [vmem:[%s8823_s17 + $0x1c] sm:$0xf0] }
 0x121   : > { %v5699_v24 = vld [vmem:[%s8823_s17 + $0x200] sm:$0xf]  ;;  %v5444_v34 = vor.u32 %v7753_v21, %v5443_v20  ;;  %3779 = vmatpush.bf16.msra.mxu3 %v6244_v27  ;;  %v8970_v20 = vpack.c.bf16 %v626_v14, %v618_v11 }
 0x122   : > { %v7817_v25 = vld [vmem:[%s8823_s17 + $0x21c] sm:$0xf0] }
 0x123   : > { %v5955_v26 = vld [vmem:[%s8823_s17 + $0x400] sm:$0xf]  ;;  %v5700_v38 = vor.u32 %v7817_v25, %v5699_v24  ;;  %3738 = vmatpush.bf16.msra.mxu0 %v5444_v34 }
 0x124   : > { %v7881_v28 = vld [vmem:[%s8823_s17 + $0x41c] sm:$0xf0] }
 0x125   : > { %v6211_v29 = vld [vmem:[%s8823_s17 + $0x600] sm:$0xf]  ;;  %v5956_v39 = vor.u32 %v7881_v28, %v5955_v26  ;;  %3752 = vmatpush.bf16.msra.mxu1 %v5700_v38 }
 0x126   : > { %v7945_v30 = vld [vmem:[%s8823_s17 + $0x61c] sm:$0xf0]  ;;  %3739 = vmatmul.bf16.vlgmr.msra.gmra.mxu0 %v8953_v61 }
 0x127   : > { %v6691_v31 = vld [vmem:[%s8823_s17 + $0x9c0] sm:$0xf]  ;;  %v6212_v42 = vor.u32 %v7945_v30, %v6211_v29  ;;  %3766 = vmatpush.bf16.msra.mxu2 %v5956_v39 }
 0x128   : > { %v8065_v32 = vld [vmem:[%s8823_s17 + $0x9dc] sm:$0xf0]  ;;  %3753 = vmatmul.bf16.vlgmr.msra.gmra.mxu1 %v8965_v13 }
 0x129   : > { %v6947_v33 = vld [vmem:[%s8823_s17 + $0xbc0] sm:$0xf]  ;;  %v6692_v43 = vor.u32 %v8065_v32, %v6691_v31  ;;  %3780 = vmatpush.bf16.msra.mxu3 %v6212_v42 }
 0x12a   : > { %v8129_v35 = vld [vmem:[%s8823_s17 + $0xbdc] sm:$0xf0]  ;;  %3767 = vmatmul.bf16.vlgmr.msra.gmra.mxu2 %v8958_v4 }
 0x12b   : > { %v7203_v36 = vld [vmem:[%s8823_s17 + $0xdc0] sm:$0xf]  ;;  %v6948_v46 = vor.u32 %v8129_v35, %v6947_v33  ;;  %3787 = vmatpush.bf16.msrb.mxu0 %v6692_v43 }
 0x12c   : > { %v8193_v37 = vld [vmem:[%s8823_s17 + $0xddc] sm:$0xf0]  ;;  %3781 = vmatmul.bf16.vlgmr.msra.gmra.mxu3 %v8970_v20 }
 0x12d   : > { %v7459_v40 = vld [vmem:[%s8823_s17 + $0xfc0] sm:$0xf]  ;;  %v7204_v47 = vor.u32 %v8193_v37, %v7203_v36  ;;  %3801 = vmatpush.bf16.msrb.mxu1 %v6948_v46 }
 0x12e   : > { %v8257_v41 = vld [vmem:[%s8823_s17 + $0xfdc] sm:$0xf0] }
 0x12f   : > { %v6659_v44 = vld [vmem:[%s8823_s17 + $0x980] sm:$0xf]  ;;  %v7460_v51 = vor.u32 %v8257_v41, %v7459_v40  ;;  %3815 = vmatpush.bf16.msrb.mxu2 %v7204_v47 }
 0x130   : > { %v8057_v45 = vld [vmem:[%s8823_s17 + $0x99c] sm:$0xf0] }
 0x131   : > { %v6915_v48 = vld [vmem:[%s8823_s17 + $0xb80] sm:$0xf]  ;;  %v6660_v58 = vor.u32 %v8057_v45, %v6659_v44  ;;  %3829 = vmatpush.bf16.msrb.mxu3 %v7460_v51 }
 0x132   : > { %v8121_v49 = vld [vmem:[%s8823_s17 + $0xb9c] sm:$0xf0] }
 0x133   : > { %v7171_v50 = vld [vmem:[%s8823_s17 + $0xd80] sm:$0xf]  ;;  %v6916_v63 = vor.u32 %v8121_v49, %v6915_v48  ;;  %3788 = vmatpush.bf16.msrb.mxu0 %v6660_v58 }
 0x134   : > { %v8185_v52 = vld [vmem:[%s8823_s17 + $0xd9c] sm:$0xf0] }
 0x135   : > { %v7427_v53 = vld [vmem:[%s8823_s17 + $0xf80] sm:$0xf]  ;;  %v7172_v0 = vor.u32 %v8185_v52, %v7171_v50  ;;  %3802 = vmatpush.bf16.msrb.mxu1 %v6916_v63 }
 0x136   : > { %v8249_v54 = vld [vmem:[%s8823_s17 + $0xf9c] sm:$0xf0] }
 0x137   : > { %v6627_v59 = vld [vmem:[%s8823_s17 + $0x940] sm:$0xf]  ;;  %v7428_v5 = vor.u32 %v8249_v54, %v7427_v53  ;;  %3816 = vmatpush.bf16.msrb.mxu2 %v7172_v0 }
 0x138   : > { %v8049_v60 = vld [vmem:[%s8823_s17 + $0x95c] sm:$0xf0] }
 0x139   : > { %v6883_v1 = vld [vmem:[%s8823_s17 + $0xb40] sm:$0xf]  ;;  %v6628_v12 = vor.u32 %v8049_v60, %v6627_v59  ;;  %3830 = vmatpush.bf16.msrb.mxu3 %v7428_v5 }
 0x13a   : > { %v8113_v2 = vld [vmem:[%s8823_s17 + $0xb5c] sm:$0xf0] }
 0x13b   : > { %v7139_v3 = vld [vmem:[%s8823_s17 + $0xd40] sm:$0xf]  ;;  %v6884_v15 = vor.u32 %v8113_v2, %v6883_v1  ;;  %3789 = vmatpush.bf16.msrb.mxu0 %v6628_v12  ;;  %v7805_v12 = vld [vmem:[%s8823_s17 + $0x1c4] sm:$0xf] }
 0x13c   : > { %v8177_v6 = vld [vmem:[%s8823_s17 + $0xd5c] sm:$0xf0] }
 0x13d   : > { %v7395_v7 = vld [vmem:[%s8823_s17 + $0xf40] sm:$0xf]  ;;  %v7140_v16 = vor.u32 %v8177_v6, %v7139_v3  ;;  %3803 = vmatpush.bf16.msrb.mxu1 %v6884_v15  ;;  %v5669_v15 = vld [vmem:[%s8823_s17 + $0x1e0] sm:$0xf0] }
 0x13e   : > { %v8241_v8 = vld [vmem:[%s8823_s17 + $0xf5c] sm:$0xf0] }
 0x13f   : > { %v6595_v17 = vld [vmem:[%s8823_s17 + $0x900] sm:$0xf]  ;;  %v7396_v21 = vor.u32 %v8241_v8, %v7395_v7  ;;  %3817 = vmatpush.bf16.msrb.mxu2 %v7140_v16  ;;  %v7869_v16 = vld [vmem:[%s8823_s17 + $0x3c4] sm:$0xf] }
 0x140   : > { %v8041_v18 = vld [vmem:[%s8823_s17 + $0x91c] sm:$0xf0] }
 0x141   : > { %v6851_v19 = vld [vmem:[%s8823_s17 + $0xb00] sm:$0xf]  ;;  %v6596_v27 = vor.u32 %v8041_v18, %v6595_v17  ;;  %3831 = vmatpush.bf16.msrb.mxu3 %v7396_v21  ;;  %v5925_v17 = vld [vmem:[%s8823_s17 + $0x3e0] sm:$0xf0] }
 0x142   : > { %v8105_v22 = vld [vmem:[%s8823_s17 + $0xb1c] sm:$0xf0]  ;;  %v7933_v18 = vld [vmem:[%s8823_s17 + $0x5c4] sm:$0xf] }
 0x143   : > { %v7107_v23 = vld [vmem:[%s8823_s17 + $0xd00] sm:$0xf]  ;;  %v6852_v28 = vor.u32 %v8105_v22, %v6851_v19  ;;  %3790 = vmatpush.bf16.msrb.mxu0 %v6596_v27  ;;  %v6181_v19 = vld [vmem:[%s8823_s17 + $0x5e0] sm:$0xf0] }
 0x144   : > { %v8169_v24 = vld [vmem:[%s8823_s17 + $0xd1c] sm:$0xf0]  ;;  %v7997_v21 = vld [vmem:[%s8823_s17 + $0x7c4] sm:$0xf] }
 0x145   : > { %v7363_v25 = vld [vmem:[%s8823_s17 + $0xf00] sm:$0xf]  ;;  %v7108_v29 = vor.u32 %v8169_v24, %v7107_v23  ;;  %3804 = vmatpush.bf16.msrb.mxu1 %v6852_v28  ;;  %v6437_v23 = vld [vmem:[%s8823_s17 + $0x7e0] sm:$0xf0]  ;;  %v619_v24 = vld [vmem:[#allocation2 + $0x50] sm:$0xff] }
 0x146   : > { %v8233_v26 = vld [vmem:[%s8823_s17 + $0xf1c] sm:$0xf0] }
 0x147   : > { %v6563_v30 = vld [vmem:[%s8823_s17 + $0x8c0] sm:$0xf]  ;;  %v7364_v33 = vor.u32 %v8233_v26, %v7363_v25  ;;  %3818 = vmatpush.bf16.msrb.mxu2 %v7108_v29  ;;  %v627_v25 = vld [vmem:[#allocation2 + $0x60] sm:$0xff]  ;;  %v629_v29 = vld [vmem:[#allocation2 + $0x78] sm:$0xff] }
 0x148   : > { %v8033_v31 = vld [vmem:[%s8823_s17 + $0x8dc] sm:$0xf0] }
 0x149   : > { %v6819_v32 = vld [vmem:[%s8823_s17 + $0xac0] sm:$0xf]  ;;  %v6564_v39 = vor.u32 %v8033_v31, %v6563_v30  ;;  %3832 = vmatpush.bf16.msrb.mxu3 %v7364_v33  ;;  %v628_v33 = vld [vmem:[#allocation2 + $0x70] sm:$0xff] }
 0x14a   : > { %v8097_v34 = vld [vmem:[%s8823_s17 + $0xadc] sm:$0xf0] }
 0x14b   : > { %v7075_v35 = vld [vmem:[%s8823_s17 + $0xcc0] sm:$0xf]  ;;  %v6820_v40 = vor.u32 %v8097_v34, %v6819_v32  ;;  %3791 = vmatpush.bf16.msrb.mxu0 %v6564_v39  ;;  %v5672_v32 = vor.u32 %v7805_v12, %v5669_v15  ;;  %v5637_v39 = vld [vmem:[%s8823_s17 + $0x1a0] sm:$0xf0] }
 0x14c   : > { %v8161_v36 = vld [vmem:[%s8823_s17 + $0xcdc] sm:$0xf0]  ;;  %v6341_v12 = vld [vmem:[%s8823_s17 + $0x720] sm:$0xf0] }
 0x14d   : > { %v7331_v37 = vld [vmem:[%s8823_s17 + $0xec0] sm:$0xf]  ;;  %v7076_v41 = vor.u32 %v8161_v36, %v7075_v35  ;;  %3805 = vmatpush.bf16.msrb.mxu1 %v6820_v40  ;;  %v5928_v36 = vor.u32 %v7869_v16, %v5925_v17  ;;  %v7861_v40 = vld [vmem:[%s8823_s17 + $0x384] sm:$0xf] }
 0x14e   : > { %v8225_v38 = vld [vmem:[%s8823_s17 + $0xedc] sm:$0xf0]  ;;  %v7773_v17 = vld [vmem:[%s8823_s17 + $0xc4] sm:$0xf] }
 0x14f   : > { %v6531_v42 = vld [vmem:[%s8823_s17 + $0x880] sm:$0xf]  ;;  %v7332_v45 = vor.u32 %v8225_v38, %v7331_v37  ;;  %3819 = vmatpush.bf16.msrb.mxu2 %v7076_v41  ;;  %v6184_v37 = vor.u32 %v7933_v18, %v6181_v19  ;;  %v7797_v38 = vld [vmem:[%s8823_s17 + $0x184] sm:$0xf]  ;;  %v6440_v41 = vor.u32 %v7997_v21, %v6437_v23 }
 0x150   : > { %v8025_v43 = vld [vmem:[%s8823_s17 + $0x89c] sm:$0xf0]  ;;  %v5541_v18 = vld [vmem:[%s8823_s17 + $0xe0] sm:$0xf0] }
 0x151   : > { %v6787_v44 = vld [vmem:[%s8823_s17 + $0xa80] sm:$0xf]  ;;  %v6532_v51 = vor.u32 %v8025_v43, %v6531_v42  ;;  %3833 = vmatpush.bf16.msrb.mxu3 %v7332_v45  ;;  %v9022_v42 = vpack.c.bf16 %v627_v25, %v619_v24  ;;  %v5893_v43 = vld [vmem:[%s8823_s17 + $0x3a0] sm:$0xf0] }
 0x152   : > { %v8089_v46 = vld [vmem:[%s8823_s17 + $0xa9c] sm:$0xf0]  ;;  %v6149_v45 = vld [vmem:[%s8823_s17 + $0x5a0] sm:$0xf0] }
 0x153   : > { %v7043_v47 = vld [vmem:[%s8823_s17 + $0xc80] sm:$0xf]  ;;  %v6788_v53 = vor.u32 %v8089_v46, %v6787_v44  ;;  %3792 = vmatpush.bf16.msrb.mxu0 %v6532_v51  ;;  %v7925_v44 = vld [vmem:[%s8823_s17 + $0x584] sm:$0xf]  ;;  %v5640_v51 = vor.u32 %v7797_v38, %v5637_v39 }
 0x154   : > { %v8153_v48 = vld [vmem:[%s8823_s17 + $0xc9c] sm:$0xf0]  ;;  %v7837_v19 = vld [vmem:[%s8823_s17 + $0x2c4] sm:$0xf] }
 0x155   : > { %v7299_v49 = vld [vmem:[%s8823_s17 + $0xe80] sm:$0xf]  ;;  %v7044_v54 = vor.u32 %v8153_v48, %v7043_v47  ;;  %3806 = vmatpush.bf16.msrb.mxu1 %v6788_v53  ;;  %v7989_v48 = vld [vmem:[%s8823_s17 + $0x784] sm:$0xf]  ;;  %v6152_v53 = vor.u32 %v7925_v44, %v6149_v45 }
 0x156   : > { %v8217_v50 = vld [vmem:[%s8823_s17 + $0xe9c] sm:$0xf0]  ;;  %v7901_v23 = vld [vmem:[%s8823_s17 + $0x4c4] sm:$0xf] }
 0x157   : > { %v6499_v52 = vld [vmem:[%s8823_s17 + $0x840] sm:$0xf]  ;;  %v7300_v58 = vor.u32 %v8217_v50, %v7299_v49  ;;  %3820 = vmatpush.bf16.msrb.mxu2 %v7044_v54  ;;  %v6405_v49 = vld [vmem:[%s8823_s17 + $0x7a0] sm:$0xf0] }
 0x158   : > { %v8017_v55 = vld [vmem:[%s8823_s17 + $0x85c] sm:$0xf0]  ;;  %v7789_v54 = vld [vmem:[%s8823_s17 + $0x144] sm:$0xf] }
 0x159   : > { %v6755_v56 = vld [vmem:[%s8823_s17 + $0xa40] sm:$0xf]  ;;  %v6500_v2 = vor.u32 %v8017_v55, %v6499_v52  ;;  %3834 = vmatpush.bf16.msrb.mxu3 %v7300_v58  ;;  %v5896_v52 = vor.u32 %v7861_v40, %v5893_v43  ;;  %v5605_v55 = vld [vmem:[%s8823_s17 + $0x160] sm:$0xf0] }
 0x15a   : > { %v8081_v57 = vld [vmem:[%s8823_s17 + $0xa5c] sm:$0xf0]  ;;  %v5861_v58 = vld [vmem:[%s8823_s17 + $0x360] sm:$0xf0] }
 0x15b   : > { %v7011_v59 = vld [vmem:[%s8823_s17 + $0xc40] sm:$0xf]  ;;  %v6756_v8 = vor.u32 %v8081_v57, %v6755_v56  ;;  %3793 = vmatpush.bf16.msrb.mxu0 %v6500_v2  ;;  %v7853_v56 = vld [vmem:[%s8823_s17 + $0x344] sm:$0xf]  ;;  %v6408_v57 = vor.u32 %v7989_v48, %v6405_v49 }
 0x15c   : > { %v8145_v60 = vld [vmem:[%s8823_s17 + $0xc5c] sm:$0xf0]  ;;  %v6053_v24 = vld [vmem:[%s8823_s17 + $0x4e0] sm:$0xf0] }
 0x15d   : > { %v7267_v62 = vld [vmem:[%s8823_s17 + $0xe40] sm:$0xf]  ;;  %v7012_v9 = vor.u32 %v8145_v60, %v7011_v59  ;;  %3807 = vmatpush.bf16.msrb.mxu1 %v6756_v8  ;;  %v7917_v59 = vld [vmem:[%s8823_s17 + $0x544] sm:$0xf] }
 0x15e   : > { %v8209_v63 = vld [vmem:[%s8823_s17 + $0xe5c] sm:$0xf0]  ;;  %v6117_v60 = vld [vmem:[%s8823_s17 + $0x560] sm:$0xf0] }
 0x15f   : > { %v6467_v0 = vld [vmem:[%s8823_s17 + $0x800] sm:$0xf]  ;;  %v7268_v14 = vor.u32 %v8209_v63, %v7267_v62  ;;  %3821 = vmatpush.bf16.msrb.mxu2 %v7012_v9  ;;  %v7981_v62 = vld [vmem:[%s8823_s17 + $0x744] sm:$0xf]  ;;  %v6120_v2 = vor.u32 %v7917_v59, %v6117_v60 }
 0x160   : > { %v8009_v1 = vld [vmem:[%s8823_s17 + $0x81c] sm:$0xf0]  ;;  %v6373_v63 = vld [vmem:[%s8823_s17 + $0x760] sm:$0xf0] }
 0x161   : > { %v6723_v3 = vld [vmem:[%s8823_s17 + $0xa00] sm:$0xf]  ;;  %v6468_v22 = vor.u32 %v8009_v1, %v6467_v0  ;;  %3835 = vmatpush.bf16.msrb.mxu3 %v7268_v14  ;;  %v5608_v0 = vor.u32 %v7789_v54, %v5605_v55  ;;  %v5864_v1 = vor.u32 %v7853_v56, %v5861_v58  ;;  %v5829_v8 = vld [vmem:[%s8823_s17 + $0x320] sm:$0xf0] }
 0x162   : > { %v8073_v5 = vld [vmem:[%s8823_s17 + $0xa1c] sm:$0xf0]  ;;  %v7909_v9 = vld [vmem:[%s8823_s17 + $0x504] sm:$0xf] }
 0x163   : > { %v6979_v6 = vld [vmem:[%s8823_s17 + $0xc00] sm:$0xf]  ;;  %v6724_v26 = vor.u32 %v8073_v5, %v6723_v3  ;;  %3794 = vmatpush.bf16.msrb.mxu0 %v6468_v22  ;;  %v7781_v3 = vld [vmem:[%s8823_s17 + $0x104] sm:$0xf] }
 0x164   : > { %v8137_v7 = vld [vmem:[%s8823_s17 + $0xc1c] sm:$0xf0]  ;;  %v5573_v5 = vld [vmem:[%s8823_s17 + $0x120] sm:$0xf0] }
 0x165   : > { %v7235_v10 = vld [vmem:[%s8823_s17 + $0xe00] sm:$0xf]  ;;  %v6980_v27 = vor.u32 %v8137_v7, %v6979_v6  ;;  %3808 = vmatpush.bf16.msrb.mxu1 %v6724_v26  ;;  %v7845_v6 = vld [vmem:[%s8823_s17 + $0x304] sm:$0xf]  ;;  %v6376_v7 = vor.u32 %v7981_v62, %v6373_v63  ;;  %v5576_v14 = vor.u32 %v7781_v3, %v5573_v5 }
 0x166   : > { %v8201_v11 = vld [vmem:[%s8823_s17 + $0xe1c] sm:$0xf0]  ;;  %3795 = vmatmul.bf16.vlgmr.msrb.gmra.mxu0 %v9022_v42  ;;  %v5832_v15 = vor.u32 %v7845_v6, %v5829_v8  ;;  %v5797_v22 = vld [vmem:[%s8823_s17 + $0x2e0] sm:$0xf0] }
 0x167   : > { %v621_v28 = vld [vmem:[#allocation2 + $0x8] sm:$0xff]  ;;  %v7236_v31 = vor.u32 %v8201_v11, %v7235_v10  ;;  %3822 = vmatpush.bf16.msrb.mxu2 %v6980_v27  ;;  %3843 = vmatpush.bf16.msra.mxu0 %v5672_v32  ;;  %v5544_v27 = vor.u32 %v7773_v17, %v5541_v18 }
 0x168   : > { %v620_v30 = vld [vmem:[#allocation2 + $0x68] sm:$0xff]  ;;  %v9027_v46 = vpack.c.bf16 %v629_v29, %v621_v28  ;;  %v5800_v28 = vor.u32 %v7837_v19, %v5797_v22  ;;  %v6056_v29 = vor.u32 %v7901_v23, %v6053_v24 }
 0x169   : > { %v622_v34 = vld [vmem:[#allocation2 + $0x48] sm:$0xff]  ;;  %v9029_v47 = vpack.c.bf16 %v628_v33, %v620_v30  ;;  %3836 = vmatpush.bf16.msrb.mxu3 %v7236_v31  ;;  %3857 = vmatpush.bf16.msra.mxu1 %v5928_v36 }
 0x16a   : > { %v630_v35 = vld [vmem:[#allocation2 + $0x28] sm:$0xff]  ;;  %3823 = vmatmul.bf16.vlgmr.msrb.gmra.mxu2 %v9027_v46 }
 0x16b   : > { %v9033_v50 = vpack.c.bf16 %v630_v35, %v622_v34  ;;  %3871 = vmatpush.bf16.msra.mxu2 %v6184_v37  ;;  %3809 = vmatmul.bf16.vlgmr.msrb.gmra.mxu1 %v9029_v47  ;;  %v6085_v10 = vld [vmem:[%s8823_s17 + $0x520] sm:$0xf0] }
 0x16c   : > { %3844 = vmatpush.bf16.msra.mxu0 %v5640_v51  ;;  %v7973_v11 = vld [vmem:[%s8823_s17 + $0x704] sm:$0xf]  ;;  %v6088_v16 = vor.u32 %v7909_v9, %v6085_v10 }
 0x16d   : > { %3885 = vmatpush.bf16.msra.mxu3 %v6440_v41  ;;  %3858 = vmatpush.bf16.msra.mxu1 %v5896_v52  ;;  %v6344_v21 = vor.u32 %v7973_v11, %v6341_v12  ;;  %v7965_v25 = vld [vmem:[%s8823_s17 + $0x6c4] sm:$0xf] }
 0x16e   : > { %3837 = vmatmul.bf16.vlgmr.msrb.gmra.mxu3 %v9033_v50  ;;  %v6309_v26 = vld [vmem:[%s8823_s17 + $0x6e0] sm:$0xf0] }
 0x16f   : > { %3872 = vmatpush.bf16.msra.mxu2 %v6152_v53  ;;  %v7765_v30 = vld [vmem:[%s8823_s17 + $0x84] sm:$0xf]  ;;  %v6312_v33 = vor.u32 %v7965_v25, %v6309_v26 }
 0x170   : > { %3845 = vmatpush.bf16.msra.mxu0 %v5608_v0  ;;  %v5509_v31 = vld [vmem:[%s8823_s17 + $0xa0] sm:$0xf0] }
 0x171   : > { %3886 = vmatpush.bf16.msra.mxu3 %v6408_v57  ;;  %3859 = vmatpush.bf16.msra.mxu1 %v5864_v1  ;;  %v7829_v32 = vld [vmem:[%s8823_s17 + $0x284] sm:$0xf]  ;;  %v5512_v39 = vor.u32 %v7765_v30, %v5509_v31 }
 0x172   : > { %v5765_v34 = vld [vmem:[%s8823_s17 + $0x2a0] sm:$0xf0] }
 0x173   : > { %3873 = vmatpush.bf16.msra.mxu2 %v6120_v2  ;;  %v7893_v35 = vld [vmem:[%s8823_s17 + $0x484] sm:$0xf]  ;;  %v5768_v40 = vor.u32 %v7829_v32, %v5765_v34 }
 0x174   : > { %3846 = vmatpush.bf16.msra.mxu0 %v5576_v14  ;;  %v6021_v36 = vld [vmem:[%s8823_s17 + $0x4a0] sm:$0xf0] }
 0x175   : > { %3887 = vmatpush.bf16.msra.mxu3 %v6376_v7  ;;  %3860 = vmatpush.bf16.msra.mxu1 %v5832_v15  ;;  %v7957_v37 = vld [vmem:[%s8823_s17 + $0x684] sm:$0xf]  ;;  %v6024_v41 = vor.u32 %v7893_v35, %v6021_v36 }
 0x176   : > { %v6277_v38 = vld [vmem:[%s8823_s17 + $0x6a0] sm:$0xf0] }
 0x177   : > { %3874 = vmatpush.bf16.msra.mxu2 %v6088_v16  ;;  %v7757_v43 = vld [vmem:[%s8823_s17 + $0x44] sm:$0xf]  ;;  %v6280_v48 = vor.u32 %v7957_v37, %v6277_v38 }
 0x178   : > { %3847 = vmatpush.bf16.msra.mxu0 %v5544_v27  ;;  %v5477_v44 = vld [vmem:[%s8823_s17 + $0x60] sm:$0xf0] }
 0x179   : > { %3888 = vmatpush.bf16.msra.mxu3 %v6344_v21  ;;  %3861 = vmatpush.bf16.msra.mxu1 %v5800_v28  ;;  %v7821_v45 = vld [vmem:[%s8823_s17 + $0x244] sm:$0xf]  ;;  %v5480_v55 = vor.u32 %v7757_v43, %v5477_v44 }
 0x17a   : > { %v5733_v49 = vld [vmem:[%s8823_s17 + $0x260] sm:$0xf0] }
 0x17b   : > { %3875 = vmatpush.bf16.msra.mxu2 %v6056_v29  ;;  %v7885_v51 = vld [vmem:[%s8823_s17 + $0x444] sm:$0xf]  ;;  %v5736_v58 = vor.u32 %v7821_v45, %v5733_v49 }
 0x17c   : > { %v5989_v52 = vld [vmem:[%s8823_s17 + $0x460] sm:$0xf0]  ;;  %3848 = vmatpush.bf16.msra.mxu0 %v5512_v39 }
 0x17d   : > { %3889 = vmatpush.bf16.msra.mxu3 %v6312_v33  ;;  %v7949_v53 = vld [vmem:[%s8823_s17 + $0x644] sm:$0xf]  ;;  %3862 = vmatpush.bf16.msra.mxu1 %v5768_v40  ;;  %v5992_v59 = vor.u32 %v7885_v51, %v5989_v52 }
 0x17e   : > { %v6245_v54 = vld [vmem:[%s8823_s17 + $0x660] sm:$0xf0] }
 0x17f   : > { %v7749_v56 = vld [vmem:[%s8823_s17 + $0x4] sm:$0xf]  ;;  %3876 = vmatpush.bf16.msra.mxu2 %v6024_v41  ;;  %v6248_v0 = vor.u32 %v7949_v53, %v6245_v54 }
 0x180   : > { %v5445_v57 = vld [vmem:[%s8823_s17 + $0x20] sm:$0xf0]  ;;  %3849 = vmatpush.bf16.msra.mxu0 %v5480_v55 }
 0x181   : > { %v7813_v60 = vld [vmem:[%s8823_s17 + $0x204] sm:$0xf]  ;;  %3890 = vmatpush.bf16.msra.mxu3 %v6280_v48  ;;  %v5448_v8 = vor.u32 %v7749_v56, %v5445_v57  ;;  %3863 = vmatpush.bf16.msra.mxu1 %v5736_v58 }
 0x182   : > { %v5701_v62 = vld [vmem:[%s8823_s17 + $0x220] sm:$0xf0] }
 0x183   : > { %v7877_v63 = vld [vmem:[%s8823_s17 + $0x404] sm:$0xf]  ;;  %3877 = vmatpush.bf16.msra.mxu2 %v5992_v59  ;;  %v5704_v12 = vor.u32 %v7813_v60, %v5701_v62 }
 0x184   : > { %v5957_v1 = vld [vmem:[%s8823_s17 + $0x420] sm:$0xf0]  ;;  %3850 = vmatpush.bf16.msra.mxu0 %v5448_v8 }
 0x185   : > { %v7941_v2 = vld [vmem:[%s8823_s17 + $0x604] sm:$0xf]  ;;  %v5960_v14 = vor.u32 %v7877_v63, %v5957_v1  ;;  %3891 = vmatpush.bf16.msra.mxu3 %v6248_v0  ;;  %3864 = vmatpush.bf16.msra.mxu1 %v5704_v12 }
 0x186   : > { %v6213_v3 = vld [vmem:[%s8823_s17 + $0x620] sm:$0xf0] }
 0x187   : > { %v8061_v5 = vld [vmem:[%s8823_s17 + $0x9c4] sm:$0xf]  ;;  %v6216_v17 = vor.u32 %v7941_v2, %v6213_v3  ;;  %3878 = vmatpush.bf16.msra.mxu2 %v5960_v14  ;;  %3851 = vmatmul.bf16.vlgmr.msra.gmra.mxu0 %v8953_v61 }
 0x188   : > { %v6693_v6 = vld [vmem:[%s8823_s17 + $0x9e0] sm:$0xf0]  ;;  %3865 = vmatmul.bf16.vlgmr.msra.gmra.mxu1 %v8965_v13 }
 0x189   : > { %v8125_v7 = vld [vmem:[%s8823_s17 + $0xbc4] sm:$0xf]  ;;  %v6696_v18 = vor.u32 %v8061_v5, %v6693_v6  ;;  %3892 = vmatpush.bf16.msra.mxu3 %v6216_v17 }
 0x18a   : > { %v6949_v9 = vld [vmem:[%s8823_s17 + $0xbe0] sm:$0xf0]  ;;  %3879 = vmatmul.bf16.vlgmr.msra.gmra.mxu2 %v8958_v4 }
 0x18b   : > { %v8189_v10 = vld [vmem:[%s8823_s17 + $0xdc4] sm:$0xf]  ;;  %v6952_v19 = vor.u32 %v8125_v7, %v6949_v9  ;;  %3899 = vmatpush.bf16.msrb.mxu0 %v6696_v18 }
 0x18c   : > { %v7205_v11 = vld [vmem:[%s8823_s17 + $0xde0] sm:$0xf0]  ;;  %3893 = vmatmul.bf16.vlgmr.msra.gmra.mxu3 %v8970_v20 }
 0x18d   : > { %v8253_v15 = vld [vmem:[%s8823_s17 + $0xfc4] sm:$0xf]  ;;  %v7208_v21 = vor.u32 %v8189_v10, %v7205_v11  ;;  %3913 = vmatpush.bf16.msrb.mxu1 %v6952_v19 }
 0x18e   : > { %v7461_v16 = vld [vmem:[%s8823_s17 + $0xfe0] sm:$0xf0] }
 0x18f   : > { %v8053_v22 = vld [vmem:[%s8823_s17 + $0x984] sm:$0xf]  ;;  %v7464_v25 = vor.u32 %v8253_v15, %v7461_v16  ;;  %3927 = vmatpush.bf16.msrb.mxu2 %v7208_v21 }
 0x190   : > { %v6661_v23 = vld [vmem:[%s8823_s17 + $0x9a0] sm:$0xf0] }
 0x191   : > { %v8117_v24 = vld [vmem:[%s8823_s17 + $0xb84] sm:$0xf]  ;;  %v6664_v31 = vor.u32 %v8053_v22, %v6661_v23  ;;  %3941 = vmatpush.bf16.msrb.mxu3 %v7464_v25 }
 0x192   : > { %v6917_v26 = vld [vmem:[%s8823_s17 + $0xba0] sm:$0xf0] }
 0x193   : > { %v8181_v27 = vld [vmem:[%s8823_s17 + $0xd84] sm:$0xf]  ;;  %v6920_v32 = vor.u32 %v8117_v24, %v6917_v26  ;;  %3900 = vmatpush.bf16.msrb.mxu0 %v6664_v31 }
 0x194   : > { %v7173_v28 = vld [vmem:[%s8823_s17 + $0xda0] sm:$0xf0] }
 0x195   : > { %v8245_v29 = vld [vmem:[%s8823_s17 + $0xf84] sm:$0xf]  ;;  %v7176_v33 = vor.u32 %v8181_v27, %v7173_v28  ;;  %3914 = vmatpush.bf16.msrb.mxu1 %v6920_v32 }
 0x196   : > { %v7429_v30 = vld [vmem:[%s8823_s17 + $0xfa0] sm:$0xf0] }
 0x197   : > { %v8045_v34 = vld [vmem:[%s8823_s17 + $0x944] sm:$0xf]  ;;  %v7432_v37 = vor.u32 %v8245_v29, %v7429_v30  ;;  %3928 = vmatpush.bf16.msrb.mxu2 %v7176_v33 }
 0x198   : > { %v6629_v35 = vld [vmem:[%s8823_s17 + $0x960] sm:$0xf0] }
 0x199   : > { %v8109_v36 = vld [vmem:[%s8823_s17 + $0xb44] sm:$0xf]  ;;  %v6632_v44 = vor.u32 %v8045_v34, %v6629_v35  ;;  %3942 = vmatpush.bf16.msrb.mxu3 %v7432_v37 }
 0x19a   : > { %v6885_v38 = vld [vmem:[%s8823_s17 + $0xb60] sm:$0xf0] }
 0x19b   : > { %v8173_v39 = vld [vmem:[%s8823_s17 + $0xd44] sm:$0xf]  ;;  %v6888_v45 = vor.u32 %v8109_v36, %v6885_v38  ;;  %3901 = vmatpush.bf16.msrb.mxu0 %v6632_v44 }
 0x19c   : > { %v7141_v40 = vld [vmem:[%s8823_s17 + $0xd60] sm:$0xf0] }
 0x19d   : > { %v8237_v41 = vld [vmem:[%s8823_s17 + $0xf44] sm:$0xf]  ;;  %v7144_v48 = vor.u32 %v8173_v39, %v7141_v40  ;;  %3915 = vmatpush.bf16.msrb.mxu1 %v6888_v45 }
 0x19e   : > { %v7397_v43 = vld [vmem:[%s8823_s17 + $0xf60] sm:$0xf0] }
 0x19f   : > { %v8037_v49 = vld [vmem:[%s8823_s17 + $0x904] sm:$0xf]  ;;  %v7400_v53 = vor.u32 %v8237_v41, %v7397_v43  ;;  %3929 = vmatpush.bf16.msrb.mxu2 %v7144_v48 }
 0x1a0   : > { %v6597_v51 = vld [vmem:[%s8823_s17 + $0x920] sm:$0xf0] }
 0x1a1   : > { %v8101_v52 = vld [vmem:[%s8823_s17 + $0xb04] sm:$0xf]  ;;  %v6600_v59 = vor.u32 %v8037_v49, %v6597_v51  ;;  %3943 = vmatpush.bf16.msrb.mxu3 %v7400_v53  ;;  %v5675_v51 = vld [vmem:[%s8823_s17 + $0x1c8] sm:$0xf] }
 0x1a2   : > { %v6853_v54 = vld [vmem:[%s8823_s17 + $0xb20] sm:$0xf0]  ;;  %v5931_v53 = vld [vmem:[%s8823_s17 + $0x3c8] sm:$0xf] }
 0x1a3   : > { %v8165_v55 = vld [vmem:[%s8823_s17 + $0xd04] sm:$0xf]  ;;  %v6856_v60 = vor.u32 %v8101_v52, %v6853_v54  ;;  %3902 = vmatpush.bf16.msrb.mxu0 %v6600_v59  ;;  %v7810_v52 = vld [vmem:[%s8823_s17 + $0x1e4] sm:$0xf0] }
 0x1a4   : > { %v7109_v56 = vld [vmem:[%s8823_s17 + $0xd20] sm:$0xf0] }
 0x1a5   : > { %v8229_v57 = vld [vmem:[%s8823_s17 + $0xf04] sm:$0xf]  ;;  %v7112_v62 = vor.u32 %v8165_v55, %v7109_v56  ;;  %3916 = vmatpush.bf16.msrb.mxu1 %v6856_v60  ;;  %v7874_v55 = vld [vmem:[%s8823_s17 + $0x3e4] sm:$0xf0] }
 0x1a6   : > { %v7365_v58 = vld [vmem:[%s8823_s17 + $0xf20] sm:$0xf0]  ;;  %v6187_v56 = vld [vmem:[%s8823_s17 + $0x5c8] sm:$0xf] }
 0x1a7   : > { %v8029_v63 = vld [vmem:[%s8823_s17 + $0x8c4] sm:$0xf]  ;;  %v7368_v2 = vor.u32 %v8229_v57, %v7365_v58  ;;  %3930 = vmatpush.bf16.msrb.mxu2 %v7112_v62  ;;  %v7938_v57 = vld [vmem:[%s8823_s17 + $0x5e4] sm:$0xf0] }
 0x1a8   : > { %v6565_v0 = vld [vmem:[%s8823_s17 + $0x8e0] sm:$0xf0]  ;;  %v6443_v60 = vld [vmem:[%s8823_s17 + $0x7c8] sm:$0xf] }
 0x1a9   : > { %v8093_v1 = vld [vmem:[%s8823_s17 + $0xac4] sm:$0xf]  ;;  %v6568_v9 = vor.u32 %v8029_v63, %v6565_v0  ;;  %3944 = vmatpush.bf16.msrb.mxu3 %v7368_v2  ;;  %v8002_v62 = vld [vmem:[%s8823_s17 + $0x7e4] sm:$0xf0]  ;;  %v5676_v0 = vor.u32 %v7810_v52, %v5675_v51  ;;  %v6188_v2 = vor.u32 %v7938_v57, %v6187_v56 }
 0x1aa   : > { %v6821_v3 = vld [vmem:[%s8823_s17 + $0xae0] sm:$0xf0]  ;;  %v6059_v51 = vld [vmem:[%s8823_s17 + $0x4c8] sm:$0xf] }
 0x1ab   : > { %v8157_v5 = vld [vmem:[%s8823_s17 + $0xcc4] sm:$0xf]  ;;  %v6824_v10 = vor.u32 %v8093_v1, %v6821_v3  ;;  %3903 = vmatpush.bf16.msrb.mxu0 %v6568_v9  ;;  %v5932_v1 = vor.u32 %v7874_v55, %v5931_v53  ;;  %v5643_v3 = vld [vmem:[%s8823_s17 + $0x188] sm:$0xf] }
 0x1ac   : > { %v7077_v6 = vld [vmem:[%s8823_s17 + $0xce0] sm:$0xf0]  ;;  %v6155_v9 = vld [vmem:[%s8823_s17 + $0x588] sm:$0xf] }
 0x1ad   : > { %v8221_v7 = vld [vmem:[%s8823_s17 + $0xec4] sm:$0xf]  ;;  %v7080_v11 = vor.u32 %v8157_v5, %v7077_v6  ;;  %3917 = vmatpush.bf16.msrb.mxu1 %v6824_v10  ;;  %v7802_v5 = vld [vmem:[%s8823_s17 + $0x1a4] sm:$0xf0] }
 0x1ae   : > { %v7333_v8 = vld [vmem:[%s8823_s17 + $0xee0] sm:$0xf0]  ;;  %v5899_v6 = vld [vmem:[%s8823_s17 + $0x388] sm:$0xf] }
 0x1af   : > { %v8021_v12 = vld [vmem:[%s8823_s17 + $0x884] sm:$0xf]  ;;  %v7336_v16 = vor.u32 %v8221_v7, %v7333_v8  ;;  %3931 = vmatpush.bf16.msrb.mxu2 %v7080_v11  ;;  %v6444_v7 = vor.u32 %v8002_v62, %v6443_v60  ;;  %v7866_v8 = vld [vmem:[%s8823_s17 + $0x3a4] sm:$0xf0] }
 0x1b0   : > { %v6533_v14 = vld [vmem:[%s8823_s17 + $0x8a0] sm:$0xf0]  ;;  %v7930_v10 = vld [vmem:[%s8823_s17 + $0x5a4] sm:$0xf0] }
 0x1b1   : > { %v8085_v15 = vld [vmem:[%s8823_s17 + $0xa84] sm:$0xf]  ;;  %v6536_v23 = vor.u32 %v8021_v12, %v6533_v14  ;;  %3945 = vmatpush.bf16.msrb.mxu3 %v7336_v16  ;;  %v6411_v11 = vld [vmem:[%s8823_s17 + $0x788] sm:$0xf]  ;;  %v5644_v14 = vor.u32 %v7802_v5, %v5643_v3  ;;  %v6156_v16 = vor.u32 %v7930_v10, %v6155_v9 }
 0x1b2   : > { %v6789_v17 = vld [vmem:[%s8823_s17 + $0xaa0] sm:$0xf0]  ;;  %v7994_v12 = vld [vmem:[%s8823_s17 + $0x7a4] sm:$0xf0] }
 0x1b3   : > { %v8149_v18 = vld [vmem:[%s8823_s17 + $0xc84] sm:$0xf]  ;;  %v6792_v24 = vor.u32 %v8085_v15, %v6789_v17  ;;  %3904 = vmatpush.bf16.msrb.mxu0 %v6536_v23  ;;  %v5900_v15 = vor.u32 %v7866_v8, %v5899_v6  ;;  %v5611_v17 = vld [vmem:[%s8823_s17 + $0x148] sm:$0xf] }
 0x1b4   : > { %v7045_v19 = vld [vmem:[%s8823_s17 + $0xca0] sm:$0xf0]  ;;  %v6123_v23 = vld [vmem:[%s8823_s17 + $0x548] sm:$0xf] }
 0x1b5   : > { %v8213_v21 = vld [vmem:[%s8823_s17 + $0xe84] sm:$0xf]  ;;  %v7048_v25 = vor.u32 %v8149_v18, %v7045_v19  ;;  %3918 = vmatpush.bf16.msrb.mxu1 %v6792_v24  ;;  %v7794_v18 = vld [vmem:[%s8823_s17 + $0x164] sm:$0xf0] }
 0x1b6   : > { %v7301_v22 = vld [vmem:[%s8823_s17 + $0xea0] sm:$0xf0]  ;;  %v5867_v19 = vld [vmem:[%s8823_s17 + $0x348] sm:$0xf] }
 0x1b7   : > { %v8013_v26 = vld [vmem:[%s8823_s17 + $0x844] sm:$0xf]  ;;  %v7304_v29 = vor.u32 %v8213_v21, %v7301_v22  ;;  %3932 = vmatpush.bf16.msrb.mxu2 %v7048_v25  ;;  %v6412_v21 = vor.u32 %v7994_v12, %v6411_v11  ;;  %v7858_v22 = vld [vmem:[%s8823_s17 + $0x364] sm:$0xf0] }
 0x1b8   : > { %v6501_v27 = vld [vmem:[%s8823_s17 + $0x860] sm:$0xf0]  ;;  %v7922_v24 = vld [vmem:[%s8823_s17 + $0x564] sm:$0xf0] }
 0x1b9   : > { %v8077_v28 = vld [vmem:[%s8823_s17 + $0xa44] sm:$0xf]  ;;  %v6504_v35 = vor.u32 %v8013_v26, %v6501_v27  ;;  %3946 = vmatpush.bf16.msrb.mxu3 %v7304_v29  ;;  %v6379_v25 = vld [vmem:[%s8823_s17 + $0x748] sm:$0xf]  ;;  %v5612_v27 = vor.u32 %v7794_v18, %v5611_v17  ;;  %v6124_v29 = vor.u32 %v7922_v24, %v6123_v23 }
 0x1ba   : > { %v6757_v30 = vld [vmem:[%s8823_s17 + $0xa60] sm:$0xf0]  ;;  %v7986_v26 = vld [vmem:[%s8823_s17 + $0x764] sm:$0xf0] }
 0x1bb   : > { %v8141_v31 = vld [vmem:[%s8823_s17 + $0xc44] sm:$0xf]  ;;  %v6760_v38 = vor.u32 %v8077_v28, %v6757_v30  ;;  %3905 = vmatpush.bf16.msrb.mxu0 %v6504_v35  ;;  %v5868_v28 = vor.u32 %v7858_v22, %v5867_v19  ;;  %v5579_v30 = vld [vmem:[%s8823_s17 + $0x108] sm:$0xf] }
 0x1bc   : > { %v7013_v32 = vld [vmem:[%s8823_s17 + $0xc60] sm:$0xf0]  ;;  %v6091_v35 = vld [vmem:[%s8823_s17 + $0x508] sm:$0xf] }
 0x1bd   : > { %v8205_v33 = vld [vmem:[%s8823_s17 + $0xe44] sm:$0xf]  ;;  %v7016_v39 = vor.u32 %v8141_v31, %v7013_v32  ;;  %3919 = vmatpush.bf16.msrb.mxu1 %v6760_v38  ;;  %v7786_v31 = vld [vmem:[%s8823_s17 + $0x124] sm:$0xf0] }
 0x1be   : > { %v7269_v34 = vld [vmem:[%s8823_s17 + $0xe60] sm:$0xf0]  ;;  %v5835_v32 = vld [vmem:[%s8823_s17 + $0x308] sm:$0xf] }
 0x1bf   : > { %v8005_v36 = vld [vmem:[%s8823_s17 + $0x804] sm:$0xf]  ;;  %v7272_v44 = vor.u32 %v8205_v33, %v7269_v34  ;;  %3933 = vmatpush.bf16.msrb.mxu2 %v7016_v39  ;;  %v6380_v33 = vor.u32 %v7986_v26, %v6379_v25  ;;  %v7850_v34 = vld [vmem:[%s8823_s17 + $0x324] sm:$0xf0]  ;;  %v5580_v39 = vor.u32 %v7786_v31, %v5579_v30 }
 0x1c0   : > { %v6469_v37 = vld [vmem:[%s8823_s17 + $0x820] sm:$0xf0]  ;;  %v7978_v38 = vld [vmem:[%s8823_s17 + $0x724] sm:$0xf0] }
 0x1c1   : > { %v8069_v40 = vld [vmem:[%s8823_s17 + $0xa04] sm:$0xf]  ;;  %v6472_v54 = vor.u32 %v8005_v36, %v6469_v37  ;;  %3947 = vmatpush.bf16.msrb.mxu3 %v7272_v44  ;;  %v7914_v36 = vld [vmem:[%s8823_s17 + $0x524] sm:$0xf0] }
 0x1c2   : > { %v6725_v41 = vld [vmem:[%s8823_s17 + $0xa20] sm:$0xf0]  ;;  %v6347_v37 = vld [vmem:[%s8823_s17 + $0x708] sm:$0xf] }
 0x1c3   : > { %v8133_v43 = vld [vmem:[%s8823_s17 + $0xc04] sm:$0xf]  ;;  %v6728_v58 = vor.u32 %v8069_v40, %v6725_v41  ;;  %3906 = vmatpush.bf16.msrb.mxu0 %v6472_v54  ;;  %v5836_v40 = vor.u32 %v7850_v34, %v5835_v32  ;;  %v6092_v41 = vor.u32 %v7914_v36, %v6091_v35  ;;  %v7778_v44 = vld [vmem:[%s8823_s17 + $0xe4] sm:$0xf0] }
 0x1c4   : > { %v6981_v45 = vld [vmem:[%s8823_s17 + $0xc20] sm:$0xf0]  ;;  %v7906_v52 = vld [vmem:[%s8823_s17 + $0x4e4] sm:$0xf0] }
 0x1c5   : > { %v8197_v48 = vld [vmem:[%s8823_s17 + $0xe04] sm:$0xf]  ;;  %v6984_v59 = vor.u32 %v8133_v43, %v6981_v45  ;;  %3920 = vmatpush.bf16.msrb.mxu1 %v6728_v58  ;;  %v5547_v43 = vld [vmem:[%s8823_s17 + $0xc8] sm:$0xf]  ;;  %v6060_v57 = vor.u32 %v7906_v52, %v6059_v51 }
 0x1c6   : > { %v7237_v49 = vld [vmem:[%s8823_s17 + $0xe20] sm:$0xf0]  ;;  %3907 = vmatmul.bf16.vlgmr.msrb.gmra.mxu0 %v9022_v42  ;;  %v5803_v45 = vld [vmem:[%s8823_s17 + $0x2c8] sm:$0xf]  ;;  %v5548_v55 = vor.u32 %v7778_v44, %v5547_v43 }
 0x1c7   : > { %v7240_v63 = vor.u32 %v8197_v48, %v7237_v49  ;;  %3934 = vmatpush.bf16.msrb.mxu2 %v6984_v59  ;;  %3955 = vmatpush.bf16.msra.mxu0 %v5676_v0  ;;  %v6348_v48 = vor.u32 %v7978_v38, %v6347_v37  ;;  %v7842_v49 = vld [vmem:[%s8823_s17 + $0x2e4] sm:$0xf0] }
 0x1c8   : > { %3921 = vmatmul.bf16.vlgmr.msrb.gmra.mxu1 %v9029_v47  ;;  %v6315_v53 = vld [vmem:[%s8823_s17 + $0x6c8] sm:$0xf]  ;;  %v5804_v56 = vor.u32 %v7842_v49, %v5803_v45 }
 0x1c9   : > { %3948 = vmatpush.bf16.msrb.mxu3 %v7240_v63  ;;  %3969 = vmatpush.bf16.msra.mxu1 %v5932_v1  ;;  %v7970_v54 = vld [vmem:[%s8823_s17 + $0x6e4] sm:$0xf0] }
 0x1ca   : > { %3935 = vmatmul.bf16.vlgmr.msrb.gmra.mxu2 %v9027_v46  ;;  %v5515_v58 = vld [vmem:[%s8823_s17 + $0x88] sm:$0xf]  ;;  %v6316_v62 = vor.u32 %v7970_v54, %v6315_v53 }
 0x1cb   : > { %3983 = vmatpush.bf16.msra.mxu2 %v6188_v2  ;;  %3956 = vmatpush.bf16.msra.mxu0 %v5644_v14  ;;  %v7770_v59 = vld [vmem:[%s8823_s17 + $0xa4] sm:$0xf0] }
 0x1cc   : > { %3949 = vmatmul.bf16.vlgmr.msrb.gmra.mxu3 %v9033_v50  ;;  %v5771_v60 = vld [vmem:[%s8823_s17 + $0x288] sm:$0xf]  ;;  %v5516_v5 = vor.u32 %v7770_v59, %v5515_v58 }
 0x1cd   : > { %3997 = vmatpush.bf16.msra.mxu3 %v6444_v7  ;;  %3970 = vmatpush.bf16.msra.mxu1 %v5900_v15  ;;  %v7834_v63 = vld [vmem:[%s8823_s17 + $0x2a4] sm:$0xf0] }
 0x1ce   : > { %v6027_v0 = vld [vmem:[%s8823_s17 + $0x488] sm:$0xf]  ;;  %v5772_v6 = vor.u32 %v7834_v63, %v5771_v60 }
 0x1cf   : > { %3984 = vmatpush.bf16.msra.mxu2 %v6156_v16  ;;  %3957 = vmatpush.bf16.msra.mxu0 %v5612_v27  ;;  %v7898_v1 = vld [vmem:[%s8823_s17 + $0x4a4] sm:$0xf0] }
 0x1d0   : > { %v6283_v2 = vld [vmem:[%s8823_s17 + $0x688] sm:$0xf]  ;;  %v6028_v7 = vor.u32 %v7898_v1, %v6027_v0 }
 0x1d1   : > { %3998 = vmatpush.bf16.msra.mxu3 %v6412_v21  ;;  %3971 = vmatpush.bf16.msra.mxu1 %v5868_v28  ;;  %v7962_v3 = vld [vmem:[%s8823_s17 + $0x6a4] sm:$0xf0] }
 0x1d2   : > { %v5483_v8 = vld [vmem:[%s8823_s17 + $0x48] sm:$0xf]  ;;  %v6284_v11 = vor.u32 %v7962_v3, %v6283_v2 }
 0x1d3   : > { %3985 = vmatpush.bf16.msra.mxu2 %v6124_v29  ;;  %3958 = vmatpush.bf16.msra.mxu0 %v5580_v39  ;;  %v7762_v9 = vld [vmem:[%s8823_s17 + $0x64] sm:$0xf0] }
 0x1d4   : > { %v5739_v10 = vld [vmem:[%s8823_s17 + $0x248] sm:$0xf]  ;;  %v5484_v18 = vor.u32 %v7762_v9, %v5483_v8 }
 0x1d5   : > { %3999 = vmatpush.bf16.msra.mxu3 %v6380_v33  ;;  %3972 = vmatpush.bf16.msra.mxu1 %v5836_v40  ;;  %v7826_v12 = vld [vmem:[%s8823_s17 + $0x264] sm:$0xf0] }
 0x1d6   : > { %v5995_v14 = vld [vmem:[%s8823_s17 + $0x448] sm:$0xf]  ;;  %v5740_v22 = vor.u32 %v7826_v12, %v5739_v10 }
 0x1d7   : > { %3986 = vmatpush.bf16.msra.mxu2 %v6092_v41  ;;  %3959 = vmatpush.bf16.msra.mxu0 %v5548_v55  ;;  %v7890_v15 = vld [vmem:[%s8823_s17 + $0x464] sm:$0xf0] }
 0x1d8   : > { %v6251_v16 = vld [vmem:[%s8823_s17 + $0x648] sm:$0xf]  ;;  %v5996_v23 = vor.u32 %v7890_v15, %v5995_v14 }
 0x1d9   : > { %4000 = vmatpush.bf16.msra.mxu3 %v6348_v48  ;;  %3973 = vmatpush.bf16.msra.mxu1 %v5804_v56  ;;  %v7954_v17 = vld [vmem:[%s8823_s17 + $0x664] sm:$0xf0] }
 0x1da   : > { %v5451_v19 = vld [vmem:[%s8823_s17 + $0x8] sm:$0xf]  ;;  %v6252_v27 = vor.u32 %v7954_v17, %v6251_v16 }
 0x1db   : > { %3987 = vmatpush.bf16.msra.mxu2 %v6060_v57  ;;  %3960 = vmatpush.bf16.msra.mxu0 %v5516_v5  ;;  %v7754_v21 = vld [vmem:[%s8823_s17 + $0x24] sm:$0xf0] }
 0x1dc   : > { %v5707_v24 = vld [vmem:[%s8823_s17 + $0x208] sm:$0xf]  ;;  %v5452_v34 = vor.u32 %v7754_v21, %v5451_v19 }
 0x1dd   : > { %4001 = vmatpush.bf16.msra.mxu3 %v6316_v62  ;;  %3974 = vmatpush.bf16.msra.mxu1 %v5772_v6  ;;  %v7818_v25 = vld [vmem:[%s8823_s17 + $0x224] sm:$0xf0] }
 0x1de   : > { %v5963_v26 = vld [vmem:[%s8823_s17 + $0x408] sm:$0xf]  ;;  %v5708_v38 = vor.u32 %v7818_v25, %v5707_v24 }
 0x1df   : > { %3988 = vmatpush.bf16.msra.mxu2 %v6028_v7  ;;  %v7882_v28 = vld [vmem:[%s8823_s17 + $0x424] sm:$0xf0]  ;;  %3961 = vmatpush.bf16.msra.mxu0 %v5484_v18 }
 0x1e0   : > { %v6219_v29 = vld [vmem:[%s8823_s17 + $0x608] sm:$0xf]  ;;  %v5964_v39 = vor.u32 %v7882_v28, %v5963_v26 }
 0x1e1   : > { %4002 = vmatpush.bf16.msra.mxu3 %v6284_v11  ;;  %v7946_v30 = vld [vmem:[%s8823_s17 + $0x624] sm:$0xf0]  ;;  %3975 = vmatpush.bf16.msra.mxu1 %v5740_v22 }
 0x1e2   : > { %v6699_v31 = vld [vmem:[%s8823_s17 + $0x9c8] sm:$0xf]  ;;  %v6220_v43 = vor.u32 %v7946_v30, %v6219_v29 }
 0x1e3   : > { %v8066_v32 = vld [vmem:[%s8823_s17 + $0x9e4] sm:$0xf0]  ;;  %3989 = vmatpush.bf16.msra.mxu2 %v5996_v23  ;;  %3962 = vmatpush.bf16.msra.mxu0 %v5452_v34 }
 0x1e4   : > { %v6955_v33 = vld [vmem:[%s8823_s17 + $0xbc8] sm:$0xf]  ;;  %v6700_v44 = vor.u32 %v8066_v32, %v6699_v31 }
 0x1e5   : > { %v8130_v35 = vld [vmem:[%s8823_s17 + $0xbe4] sm:$0xf0]  ;;  %4003 = vmatpush.bf16.msra.mxu3 %v6252_v27  ;;  %3976 = vmatpush.bf16.msra.mxu1 %v5708_v38 }
 0x1e6   : > { %v7211_v36 = vld [vmem:[%s8823_s17 + $0xdc8] sm:$0xf]  ;;  %v6956_v45 = vor.u32 %v8130_v35, %v6955_v33  ;;  %3963 = vmatmul.bf16.vlgmr.msra.gmra.mxu0 %v8953_v61 }
 0x1e7   : > { %v8194_v37 = vld [vmem:[%s8823_s17 + $0xde4] sm:$0xf0]  ;;  %3990 = vmatpush.bf16.msra.mxu2 %v5964_v39  ;;  %4011 = vmatpush.bf16.msrb.mxu0 %v6700_v44 }
 0x1e8   : > { %v7467_v40 = vld [vmem:[%s8823_s17 + $0xfc8] sm:$0xf]  ;;  %v7212_v48 = vor.u32 %v8194_v37, %v7211_v36  ;;  %3977 = vmatmul.bf16.vlgmr.msra.gmra.mxu1 %v8965_v13 }
 0x1e9   : > { %v8258_v41 = vld [vmem:[%s8823_s17 + $0xfe4] sm:$0xf0]  ;;  %4004 = vmatpush.bf16.msra.mxu3 %v6220_v43  ;;  %4025 = vmatpush.bf16.msrb.mxu1 %v6956_v45 }
 0x1ea   : > { %v6667_v49 = vld [vmem:[%s8823_s17 + $0x988] sm:$0xf]  ;;  %v7468_v53 = vor.u32 %v8258_v41, %v7467_v40  ;;  %3991 = vmatmul.bf16.vlgmr.msra.gmra.mxu2 %v8958_v4 }
 0x1eb   : > { %v8058_v51 = vld [vmem:[%s8823_s17 + $0x9a4] sm:$0xf0]  ;;  %4039 = vmatpush.bf16.msrb.mxu2 %v7212_v48  ;;  %v9277_v48 = vld [vmem:[%s9274_s23] sm:$0xff] }
 0x1ec   : > { %v6923_v52 = vld [vmem:[%s8823_s17 + $0xb88] sm:$0xf]  ;;  %v6668_v59 = vor.u32 %v8058_v51, %v6667_v49  ;;  %4005 = vmatmul.bf16.vlgmr.msra.gmra.mxu3 %v8970_v20 }
 0x1ed   : > { %v8122_v54 = vld [vmem:[%s8823_s17 + $0xba4] sm:$0xf0]  ;;  %4053 = vmatpush.bf16.msrb.mxu3 %v7468_v53 }
 0x1ee   : > { %v7179_v55 = vld [vmem:[%s8823_s17 + $0xd88] sm:$0xf]  ;;  %v6924_v60 = vor.u32 %v8122_v54, %v6923_v52  ;;  %4012 = vmatpush.bf16.msrb.mxu0 %v6668_v59 }
 0x1ef   : > { %v8186_v56 = vld [vmem:[%s8823_s17 + $0xda4] sm:$0xf0] }
 0x1f0   : > { %v7435_v57 = vld [vmem:[%s8823_s17 + $0xf88] sm:$0xf]  ;;  %v7180_v62 = vor.u32 %v8186_v56, %v7179_v55  ;;  %4026 = vmatpush.bf16.msrb.mxu1 %v6924_v60  ;;  %v1155_v56 = vperm.slane %v9277_v48, 0 }
 0x1f1   : > { %v8250_v58 = vld [vmem:[%s8823_s17 + $0xfa4] sm:$0xf0] }
 0x1f2   : > { %v6635_v63 = vld [vmem:[%s8823_s17 + $0x948] sm:$0xf]  ;;  %v7436_v2 = vor.u32 %v8250_v58, %v7435_v57  ;;  %4040 = vmatpush.bf16.msrb.mxu2 %v7180_v62  ;;  %v3740_v57 = vpop.f32.mrf.mxu0 }
 0x1f3   : > { %v8050_v0 = vld [vmem:[%s8823_s17 + $0x964] sm:$0xf0] }
 0x1f4   : > { %v6891_v1 = vld [vmem:[%s8823_s17 + $0xb48] sm:$0xf]  ;;  %v6636_v9 = vor.u32 %v8050_v0, %v6635_v63  ;;  %4054 = vmatpush.bf16.msrb.mxu3 %v7436_v2 }
 0x1f5   : > { %v8114_v3 = vld [vmem:[%s8823_s17 + $0xb64] sm:$0xf0] }
 0x1f6   : > { %v7147_v5 = vld [vmem:[%s8823_s17 + $0xd48] sm:$0xf]  ;;  %v6892_v10 = vor.u32 %v8114_v3, %v6891_v1  ;;  %4013 = vmatpush.bf16.msrb.mxu0 %v6636_v9  ;;  %v3754_v1 = vpop.f32.mrf.mxu1 }
 0x1f7   : > { %v8178_v6 = vld [vmem:[%s8823_s17 + $0xd64] sm:$0xf0] }
 0x1f8   : > { %v7403_v7 = vld [vmem:[%s8823_s17 + $0xf48] sm:$0xf]  ;;  %v7148_v11 = vor.u32 %v8178_v6, %v7147_v5  ;;  %4027 = vmatpush.bf16.msrb.mxu1 %v6892_v10 }
 0x1f9   : > { %v8242_v8 = vld [vmem:[%s8823_s17 + $0xf64] sm:$0xf0] }
 0x1fa   : > { %v6603_v12 = vld [vmem:[%s8823_s17 + $0x908] sm:$0xf]  ;;  %v7404_v16 = vor.u32 %v8242_v8, %v7403_v7  ;;  %4041 = vmatpush.bf16.msrb.mxu2 %v7148_v11 }
 0x1fb   : > { %v8042_v14 = vld [vmem:[%s8823_s17 + $0x924] sm:$0xf0] }
 0x1fc   : > { %v6859_v15 = vld [vmem:[%s8823_s17 + $0xb08] sm:$0xf]  ;;  %v6604_v23 = vor.u32 %v8042_v14, %v6603_v12  ;;  %4055 = vmatpush.bf16.msrb.mxu3 %v7404_v16  ;;  %v3741_v14 = vadd.f32 %v3740_v57, %v1155_v56 }
 0x1fd   : > { %v8106_v17 = vld [vmem:[%s8823_s17 + $0xb24] sm:$0xf0] }
 0x1fe   : > { %v7115_v18 = vld [vmem:[%s8823_s17 + $0xd08] sm:$0xf]  ;;  %v6860_v24 = vor.u32 %v8106_v17, %v6859_v15  ;;  %4014 = vmatpush.bf16.msrb.mxu0 %v6604_v23 }
 0x1ff   : > { %v8170_v19 = vld [vmem:[%s8823_s17 + $0xd24] sm:$0xf0] }
 0x200   : > { %v7371_v21 = vld [vmem:[%s8823_s17 + $0xf08] sm:$0xf]  ;;  %v7116_v25 = vor.u32 %v8170_v19, %v7115_v18  ;;  %4028 = vmatpush.bf16.msrb.mxu1 %v6860_v24  ;;  %v7806_v19 = vld [vmem:[%s8823_s17 + $0x1cc] sm:$0xf] }
 0x201   : > { %v8234_v22 = vld [vmem:[%s8823_s17 + $0xf24] sm:$0xf0]  ;;  %v5933_v24 = vld [vmem:[%s8823_s17 + $0x3e8] sm:$0xf0] }
 0x202   : > { %v6571_v26 = vld [vmem:[%s8823_s17 + $0x8c8] sm:$0xf]  ;;  %v7372_v29 = vor.u32 %v8234_v22, %v7371_v21  ;;  %4042 = vmatpush.bf16.msrb.mxu2 %v7116_v25  ;;  %v5677_v21 = vld [vmem:[%s8823_s17 + $0x1e8] sm:$0xf0] }
 0x203   : > { %v8034_v27 = vld [vmem:[%s8823_s17 + $0x8e4] sm:$0xf0]  ;;  %v7870_v22 = vld [vmem:[%s8823_s17 + $0x3cc] sm:$0xf] }
 0x204   : > { %v6827_v28 = vld [vmem:[%s8823_s17 + $0xac8] sm:$0xf]  ;;  %v6572_v35 = vor.u32 %v8034_v27, %v6571_v26  ;;  %4056 = vmatpush.bf16.msrb.mxu3 %v7372_v29  ;;  %v7934_v25 = vld [vmem:[%s8823_s17 + $0x5cc] sm:$0xf]  ;;  %v3768_v27 = vpop.f32.mrf.mxu2 }
 0x205   : > { %v8098_v30 = vld [vmem:[%s8823_s17 + $0xae4] sm:$0xf0]  ;;  %v6189_v26 = vld [vmem:[%s8823_s17 + $0x5e8] sm:$0xf0] }
 0x206   : > { %v7083_v31 = vld [vmem:[%s8823_s17 + $0xcc8] sm:$0xf]  ;;  %v6828_v37 = vor.u32 %v8098_v30, %v6827_v28  ;;  %4015 = vmatpush.bf16.msrb.mxu0 %v6572_v35  ;;  %v7998_v30 = vld [vmem:[%s8823_s17 + $0x7cc] sm:$0xf]  ;;  %v5680_v35 = vor.u32 %v7806_v19, %v5677_v21 }
 0x207   : > { %v8162_v32 = vld [vmem:[%s8823_s17 + $0xce4] sm:$0xf0]  ;;  %v7910_v19 = vld [vmem:[%s8823_s17 + $0x50c] sm:$0xf] }
 0x208   : > { %v7339_v33 = vld [vmem:[%s8823_s17 + $0xec8] sm:$0xf]  ;;  %v7084_v38 = vor.u32 %v8162_v32, %v7083_v31  ;;  %4029 = vmatpush.bf16.msrb.mxu1 %v6828_v37  ;;  %v6445_v31 = vld [vmem:[%s8823_s17 + $0x7e8] sm:$0xf0]  ;;  %v3782_v32 = vpop.f32.mrf.mxu3  ;;  %v6192_v37 = vor.u32 %v7934_v25, %v6189_v26 }
 0x209   : > { %v8226_v34 = vld [vmem:[%s8823_s17 + $0xee4] sm:$0xf0]  ;;  %v6093_v21 = vld [vmem:[%s8823_s17 + $0x528] sm:$0xf0] }
 0x20a   : > { %v6539_v36 = vld [vmem:[%s8823_s17 + $0x888] sm:$0xf]  ;;  %v7340_v43 = vor.u32 %v8226_v34, %v7339_v33  ;;  %4043 = vmatpush.bf16.msrb.mxu2 %v7084_v38  ;;  %v3755_v33 = vadd.f32 %v3754_v1, %v3741_v14  ;;  %v3742_v38 = vpop.f32.mrf.mxu0  ;;  %v5869_v1 = vld [vmem:[%s8823_s17 + $0x368] sm:$0xf0] }
 0x20b   : > { %v8026_v39 = vld [vmem:[%s8823_s17 + $0x8a4] sm:$0xf0]  ;;  %v3743_v57 = vadd.f32 %v3742_v38, %v1155_v56  ;;  %v7982_v56 = vld [vmem:[%s8823_s17 + $0x74c] sm:$0xf] }
 0x20c   : > { %v6795_v40 = vld [vmem:[%s8823_s17 + $0xa88] sm:$0xf]  ;;  %v6540_v52 = vor.u32 %v8026_v39, %v6539_v36  ;;  %4057 = vmatpush.bf16.msrb.mxu3 %v7340_v43  ;;  %v5936_v36 = vor.u32 %v7870_v22, %v5933_v24  ;;  %v7798_v39 = vld [vmem:[%s8823_s17 + $0x18c] sm:$0xf]  ;;  %v6448_v43 = vor.u32 %v7998_v30, %v6445_v31  ;;  %v6096_v30 = vor.u32 %v7910_v19, %v6093_v21 }
 0x20d   : > { %v8090_v41 = vld [vmem:[%s8823_s17 + $0xaa4] sm:$0xf0]  ;;  %v7782_v14 = vld [vmem:[%s8823_s17 + $0x10c] sm:$0xf] }
 0x20e   : > { %v7051_v44 = vld [vmem:[%s8823_s17 + $0xc88] sm:$0xf]  ;;  %v6796_v54 = vor.u32 %v8090_v41, %v6795_v40  ;;  %4016 = vmatpush.bf16.msrb.mxu0 %v6540_v52  ;;  %v5645_v40 = vld [vmem:[%s8823_s17 + $0x1a8] sm:$0xf0] }
 0x20f   : > { %v8154_v45 = vld [vmem:[%s8823_s17 + $0xca4] sm:$0xf0]  ;;  %v7862_v41 = vld [vmem:[%s8823_s17 + $0x38c] sm:$0xf] }
 0x210   : > { %v7307_v49 = vld [vmem:[%s8823_s17 + $0xe88] sm:$0xf]  ;;  %v7052_v55 = vor.u32 %v8154_v45, %v7051_v44  ;;  %4030 = vmatpush.bf16.msrb.mxu1 %v6796_v54  ;;  %v5901_v44 = vld [vmem:[%s8823_s17 + $0x3a8] sm:$0xf0]  ;;  %v3769_v54 = vadd.f32 %v3768_v27, %v3755_v33 }
 0x211   : > { %v8218_v51 = vld [vmem:[%s8823_s17 + $0xea4] sm:$0xf0]  ;;  %v7926_v45 = vld [vmem:[%s8823_s17 + $0x58c] sm:$0xf] }
 0x212   : > { %v6507_v53 = vld [vmem:[%s8823_s17 + $0x848] sm:$0xf]  ;;  %v7308_v60 = vor.u32 %v8218_v51, %v7307_v49  ;;  %4044 = vmatpush.bf16.msrb.mxu2 %v7052_v55  ;;  %v6157_v49 = vld [vmem:[%s8823_s17 + $0x5a8] sm:$0xf0]  ;;  %v3756_v51 = vpop.f32.mrf.mxu1  ;;  %v5648_v55 = vor.u32 %v7798_v39, %v5645_v40  ;;  %v3796_v22 = vpop.f32.mrf.mxu0 }
 0x213   : > { %v8018_v58 = vld [vmem:[%s8823_s17 + $0x864] sm:$0xf0]  ;;  %v7990_v52 = vld [vmem:[%s8823_s17 + $0x78c] sm:$0xf] }
 0x214   : > { %v6763_v59 = vld [vmem:[%s8823_s17 + $0xa48] sm:$0xf]  ;;  %v6508_v5 = vor.u32 %v8018_v58, %v6507_v53  ;;  %4058 = vmatpush.bf16.msrb.mxu3 %v7308_v60  ;;  %v6413_v53 = vld [vmem:[%s8823_s17 + $0x7a8] sm:$0xf0]  ;;  %v5904_v58 = vor.u32 %v7862_v41, %v5901_v44 }
 0x215   : > { %v8082_v62 = vld [vmem:[%s8823_s17 + $0xa64] sm:$0xf0]  ;;  %v7790_v60 = vld [vmem:[%s8823_s17 + $0x14c] sm:$0xf] }
 0x216   : > { %v7019_v63 = vld [vmem:[%s8823_s17 + $0xc48] sm:$0xf]  ;;  %v6764_v8 = vor.u32 %v8082_v62, %v6763_v59  ;;  %4017 = vmatpush.bf16.msrb.mxu0 %v6508_v5  ;;  %v6160_v59 = vor.u32 %v7926_v45, %v6157_v49  ;;  %v5613_v62 = vld [vmem:[%s8823_s17 + $0x168] sm:$0xf0] }
 0x217   : > { %v8146_v0 = vld [vmem:[%s8823_s17 + $0xc64] sm:$0xf0]  ;;  %v6381_v5 = vld [vmem:[%s8823_s17 + $0x768] sm:$0xf0] }
 0x218   : > { %v7275_v2 = vld [vmem:[%s8823_s17 + $0xe48] sm:$0xf]  ;;  %v7020_v9 = vor.u32 %v8146_v0, %v7019_v63  ;;  %4031 = vmatpush.bf16.msrb.mxu1 %v6764_v8  ;;  %v7854_v63 = vld [vmem:[%s8823_s17 + $0x34c] sm:$0xf]  ;;  %v6416_v0 = vor.u32 %v7990_v52, %v6413_v53  ;;  %v3770_v8 = vpop.f32.mrf.mxu2 }
 0x219   : > { %v8210_v3 = vld [vmem:[%s8823_s17 + $0xe64] sm:$0xf0]  ;;  %v6349_v24 = vld [vmem:[%s8823_s17 + $0x728] sm:$0xf0] }
 0x21a   : > { %v6475_v6 = vld [vmem:[%s8823_s17 + $0x808] sm:$0xf]  ;;  %v7276_v15 = vor.u32 %v8210_v3, %v7275_v2  ;;  %4045 = vmatpush.bf16.msrb.mxu2 %v7020_v9  ;;  %v7918_v2 = vld [vmem:[%s8823_s17 + $0x54c] sm:$0xf]  ;;  %v3757_v9 = vadd.f32 %v3756_v51, %v3743_v57  ;;  %v3810_v27 = vpop.f32.mrf.mxu1 }
 0x21b   : > { %v8010_v7 = vld [vmem:[%s8823_s17 + $0x824] sm:$0xf0]  ;;  %v6125_v3 = vld [vmem:[%s8823_s17 + $0x568] sm:$0xf0] }
 0x21c   : > { %v6731_v10 = vld [vmem:[%s8823_s17 + $0xa08] sm:$0xf]  ;;  %v6476_v23 = vor.u32 %v8010_v7, %v6475_v6  ;;  %4059 = vmatpush.bf16.msrb.mxu3 %v7276_v15  ;;  %v3783_v6 = vadd.f32 %v3782_v32, %v3769_v54  ;;  %v5616_v7 = vor.u32 %v7790_v60, %v5613_v62  ;;  %v5581_v15 = vld [vmem:[%s8823_s17 + $0x128] sm:$0xf0]  ;;  %v3798_v60 = vpop.f32.mrf.mxu0 }
 0x21d   : > { %v8074_v11 = vld [vmem:[%s8823_s17 + $0xa24] sm:$0xf0]  ;;  %v5584_v26 = vor.u32 %v7782_v14, %v5581_v15  ;;  %v7774_v31 = vld [vmem:[%s8823_s17 + $0xcc] sm:$0xf] }
 0x21e   : > { %v6987_v12 = vld [vmem:[%s8823_s17 + $0xc08] sm:$0xf]  ;;  %v6732_v28 = vor.u32 %v8074_v11, %v6731_v10  ;;  %4018 = vmatpush.bf16.msrb.mxu0 %v6476_v23  ;;  %v5872_v10 = vor.u32 %v7854_v63, %v5869_v1  ;;  %v6128_v11 = vor.u32 %v7918_v2, %v6125_v3  ;;  %v7974_v23 = vld [vmem:[%s8823_s17 + $0x70c] sm:$0xf]  ;;  %v3797_v25 = vadd.f32 %v3796_v22, %v3783_v6 }
 0x21f   : > { %v8138_v16 = vld [vmem:[%s8823_s17 + $0xc24] sm:$0xf0]  ;;  %v5549_v32 = vld [vmem:[%s8823_s17 + $0xe8] sm:$0xf0] }
 0x220   : > { %v7243_v17 = vld [vmem:[%s8823_s17 + $0xe08] sm:$0xf]  ;;  %v6988_v29 = vor.u32 %v8138_v16, %v6987_v12  ;;  %4032 = vmatpush.bf16.msrb.mxu1 %v6732_v28  ;;  %v3784_v12 = vpop.f32.mrf.mxu3  ;;  %v7846_v16 = vld [vmem:[%s8823_s17 + $0x30c] sm:$0xf]  ;;  %v3771_v28 = vadd.f32 %v3770_v8, %v3757_v9  ;;  %v3811_v38 = vadd.f32 %v3810_v27, %v3797_v25  ;;  %v5552_v41 = vor.u32 %v7774_v31, %v5549_v32 }
 0x221   : > { %v8202_v18 = vld [vmem:[%s8823_s17 + $0xe24] sm:$0xf0]  ;;  %4019 = vmatmul.bf16.vlgmr.msrb.gmra.mxu0 %v9022_v42  ;;  %v7838_v33 = vld [vmem:[%s8823_s17 + $0x2cc] sm:$0xf] }
 0x222   : > { %v7244_v34 = vor.u32 %v8202_v18, %v7243_v17  ;;  %4046 = vmatpush.bf16.msrb.mxu2 %v6988_v29  ;;  %4067 = vmatpush.bf16.msra.mxu0 %v5680_v35  ;;  %v6384_v17 = vor.u32 %v7982_v56, %v6381_v5  ;;  %v5837_v18 = vld [vmem:[%s8823_s17 + $0x328] sm:$0xf0]  ;;  %v3785_v44 = vadd.f32 %v3784_v12, %v3771_v28 }
 0x223   : > { %4033 = vmatmul.bf16.vlgmr.msrb.gmra.mxu1 %v9029_v47  ;;  %v5840_v29 = vor.u32 %v7846_v16, %v5837_v18  ;;  %v5805_v35 = vld [vmem:[%s8823_s17 + $0x2e8] sm:$0xf0] }
 0x224   : > { %4060 = vmatpush.bf16.msrb.mxu3 %v7244_v34  ;;  %4081 = vmatpush.bf16.msra.mxu1 %v5936_v36  ;;  %v6352_v34 = vor.u32 %v7974_v23, %v6349_v24  ;;  %v7902_v36 = vld [vmem:[%s8823_s17 + $0x4cc] sm:$0xf]  ;;  %v5808_v45 = vor.u32 %v7838_v33, %v5805_v35  ;;  %v3799_v3 = vadd.f32 %v3798_v60, %v3785_v44 }
 0x225   : > { %4047 = vmatmul.bf16.vlgmr.msrb.gmra.mxu2 %v9027_v46  ;;  %v7966_v39 = vld [vmem:[%s8823_s17 + $0x6cc] sm:$0xf] }
 0x226   : > { %4095 = vmatpush.bf16.msra.mxu2 %v6192_v37  ;;  %4068 = vmatpush.bf16.msra.mxu0 %v5648_v55  ;;  %v6061_v37 = vld [vmem:[%s8823_s17 + $0x4e8] sm:$0xf0]  ;;  %v3824_v55 = vpop.f32.mrf.mxu2 }
 0x227   : > { %4061 = vmatmul.bf16.vlgmr.msrb.gmra.mxu3 %v9033_v50  ;;  %v6317_v40 = vld [vmem:[%s8823_s17 + $0x6e8] sm:$0xf0]  ;;  %v6064_v49 = vor.u32 %v7902_v36, %v6061_v37 }
 0x228   : > { %4109 = vmatpush.bf16.msra.mxu3 %v6448_v43  ;;  %4082 = vmatpush.bf16.msra.mxu1 %v5904_v58  ;;  %v7766_v43 = vld [vmem:[%s8823_s17 + $0x8c] sm:$0xf]  ;;  %v6320_v54 = vor.u32 %v7966_v39, %v6317_v40  ;;  %v3838_v62 = vpop.f32.mrf.mxu3 }
 0x229   : > { %v5517_v51 = vld [vmem:[%s8823_s17 + $0xa8] sm:$0xf0] }
 0x22a   : > { %4096 = vmatpush.bf16.msra.mxu2 %v6160_v59  ;;  %4069 = vmatpush.bf16.msra.mxu0 %v5616_v7  ;;  %v7830_v52 = vld [vmem:[%s8823_s17 + $0x28c] sm:$0xf]  ;;  %v3825_v59 = vadd.f32 %v3824_v55, %v3811_v38  ;;  %v5520_v1 = vor.u32 %v7766_v43, %v5517_v51 }
 0x22b   : > { %v5773_v53 = vld [vmem:[%s8823_s17 + $0x2a8] sm:$0xf0] }
 0x22c   : > { %4110 = vmatpush.bf16.msra.mxu3 %v6416_v0  ;;  %4083 = vmatpush.bf16.msra.mxu1 %v5872_v10  ;;  %v7894_v57 = vld [vmem:[%s8823_s17 + $0x48c] sm:$0xf]  ;;  %v5776_v2 = vor.u32 %v7830_v52, %v5773_v53  ;;  %v3839_v56 = vadd.f32 %v3838_v62, %v3825_v59  ;;  %v3812_v10 = vpop.f32.mrf.mxu1 }
 0x22d   : > { %v6029_v58 = vld [vmem:[%s8823_s17 + $0x4a8] sm:$0xf0]  ;;  %v3813_v23 = vadd.f32 %v3812_v10, %v3799_v3 }
 0x22e   : > { %4097 = vmatpush.bf16.msra.mxu2 %v6128_v11  ;;  %4070 = vmatpush.bf16.msra.mxu0 %v5584_v26  ;;  %v7958_v63 = vld [vmem:[%s8823_s17 + $0x68c] sm:$0xf]  ;;  %v6032_v5 = vor.u32 %v7894_v57, %v6029_v58  ;;  %v4627_v15 = vmax.f32 %v3839_v56, 0.0 }
 0x22f   : > { %v6285_v0 = vld [vmem:[%s8823_s17 + $0x6a8] sm:$0xf0] }
 0x230   : > { %4111 = vmatpush.bf16.msra.mxu3 %v6384_v17  ;;  %4084 = vmatpush.bf16.msra.mxu1 %v5840_v29  ;;  %v7758_v6 = vld [vmem:[%s8823_s17 + $0x4c] sm:$0xf]  ;;  %v6288_v9 = vor.u32 %v7958_v63, %v6285_v0  ;;  %4643 = vst [vmem:[#allocation2 + $0x30] sm:$0xff] %v4627_v15  ;;  %v3826_v29 = vpop.f32.mrf.mxu2 }
 0x231   : > { %v5485_v7 = vld [vmem:[%s8823_s17 + $0x68] sm:$0xf0]  ;;  %v3827_v33 = vadd.f32 %v3826_v29, %v3813_v23 }
 0x232   : > { %4098 = vmatpush.bf16.msra.mxu2 %v6096_v30  ;;  %4071 = vmatpush.bf16.msra.mxu0 %v5552_v41  ;;  %v7822_v8 = vld [vmem:[%s8823_s17 + $0x24c] sm:$0xf]  ;;  %v5488_v18 = vor.u32 %v7758_v6, %v5485_v7 }
 0x233   : > { %v5741_v11 = vld [vmem:[%s8823_s17 + $0x268] sm:$0xf0] }
 0x234   : > { %4112 = vmatpush.bf16.msra.mxu3 %v6352_v34  ;;  %4085 = vmatpush.bf16.msra.mxu1 %v5808_v45  ;;  %v7886_v12 = vld [vmem:[%s8823_s17 + $0x44c] sm:$0xf]  ;;  %v5744_v24 = vor.u32 %v7822_v8, %v5741_v11  ;;  %v3840_v34 = vpop.f32.mrf.mxu3 }
 0x235   : > { %v5997_v14 = vld [vmem:[%s8823_s17 + $0x468] sm:$0xf0]  ;;  %v3841_v43 = vadd.f32 %v3840_v34, %v3827_v33 }
 0x236   : > { %4099 = vmatpush.bf16.msra.mxu2 %v6064_v49  ;;  %v7950_v16 = vld [vmem:[%s8823_s17 + $0x64c] sm:$0xf]  ;;  %4072 = vmatpush.bf16.msra.mxu0 %v5520_v1  ;;  %v6000_v25 = vor.u32 %v7886_v12, %v5997_v14 }
 0x237   : > { %v6253_v17 = vld [vmem:[%s8823_s17 + $0x668] sm:$0xf0]  ;;  %v4635_v55 = vmax.f32 %v3841_v43, 0.0 }
 0x238   : > { %4113 = vmatpush.bf16.msra.mxu3 %v6320_v54  ;;  %v7750_v19 = vld [vmem:[%s8823_s17 + $0xc] sm:$0xf]  ;;  %4086 = vmatpush.bf16.msra.mxu1 %v5776_v2  ;;  %v6256_v28 = vor.u32 %v7950_v16, %v6253_v17 }
 0x239   : > { %v5453_v21 = vld [vmem:[%s8823_s17 + $0x28] sm:$0xf0]  ;;  %4651 = vst [vmem:[#allocation2 + $0x40] sm:$0xff] %v4635_v55 }
 0x23a   : > { %v7814_v22 = vld [vmem:[%s8823_s17 + $0x20c] sm:$0xf]  ;;  %4100 = vmatpush.bf16.msra.mxu2 %v6032_v5  ;;  %4073 = vmatpush.bf16.msra.mxu0 %v5488_v18  ;;  %v5456_v38 = vor.u32 %v7750_v19, %v5453_v21 }
 0x23b   : > { %v5709_v26 = vld [vmem:[%s8823_s17 + $0x228] sm:$0xf0] }
 0x23c   : > { %v7878_v27 = vld [vmem:[%s8823_s17 + $0x40c] sm:$0xf]  ;;  %4114 = vmatpush.bf16.msra.mxu3 %v6288_v9  ;;  %4087 = vmatpush.bf16.msra.mxu1 %v5744_v24  ;;  %v5712_v44 = vor.u32 %v7814_v22, %v5709_v26 }
 0x23d   : > { %v5965_v30 = vld [vmem:[%s8823_s17 + $0x428] sm:$0xf0] }
 0x23e   : > { %v7942_v31 = vld [vmem:[%s8823_s17 + $0x60c] sm:$0xf]  ;;  %4101 = vmatpush.bf16.msra.mxu2 %v6000_v25  ;;  %v5968_v45 = vor.u32 %v7878_v27, %v5965_v30  ;;  %4074 = vmatpush.bf16.msra.mxu0 %v5456_v38 }
 0x23f   : > { %v6221_v32 = vld [vmem:[%s8823_s17 + $0x628] sm:$0xf0] }
 0x240   : > { %v8062_v35 = vld [vmem:[%s8823_s17 + $0x9cc] sm:$0xf]  ;;  %4115 = vmatpush.bf16.msra.mxu3 %v6256_v28  ;;  %v6224_v52 = vor.u32 %v7942_v31, %v6221_v32  ;;  %4088 = vmatpush.bf16.msra.mxu1 %v5712_v44 }
 0x241   : > { %v6701_v36 = vld [vmem:[%s8823_s17 + $0x9e8] sm:$0xf0]  ;;  %4075 = vmatmul.bf16.vlgmr.msra.gmra.mxu0 %v8953_v61 }
 0x242   : > { %v8126_v37 = vld [vmem:[%s8823_s17 + $0xbcc] sm:$0xf]  ;;  %v6704_v53 = vor.u32 %v8062_v35, %v6701_v36  ;;  %4102 = vmatpush.bf16.msra.mxu2 %v5968_v45 }
 0x243   : > { %v6957_v39 = vld [vmem:[%s8823_s17 + $0xbe8] sm:$0xf0]  ;;  %4089 = vmatmul.bf16.vlgmr.msra.gmra.mxu1 %v8965_v13 }
 0x244   : > { %v8190_v40 = vld [vmem:[%s8823_s17 + $0xdcc] sm:$0xf]  ;;  %v6960_v57 = vor.u32 %v8126_v37, %v6957_v39  ;;  %4116 = vmatpush.bf16.msra.mxu3 %v6224_v52  ;;  %4123 = vmatpush.bf16.msrb.mxu0 %v6704_v53 }
 0x245   : > { %v7213_v41 = vld [vmem:[%s8823_s17 + $0xde8] sm:$0xf0]  ;;  %4103 = vmatmul.bf16.vlgmr.msra.gmra.mxu2 %v8958_v4 }
 0x246   : > { %v8254_v49 = vld [vmem:[%s8823_s17 + $0xfcc] sm:$0xf]  ;;  %v7216_v58 = vor.u32 %v8190_v40, %v7213_v41  ;;  %4137 = vmatpush.bf16.msrb.mxu1 %v6960_v57 }
 0x247   : > { %v7469_v51 = vld [vmem:[%s8823_s17 + $0xfe8] sm:$0xf0]  ;;  %4117 = vmatmul.bf16.vlgmr.msra.gmra.mxu3 %v8970_v20 }
 0x248   : > { %v8054_v54 = vld [vmem:[%s8823_s17 + $0x98c] sm:$0xf]  ;;  %v7472_v62 = vor.u32 %v8254_v49, %v7469_v51  ;;  %4151 = vmatpush.bf16.msrb.mxu2 %v7216_v58 }
 0x249   : > { %v6669_v59 = vld [vmem:[%s8823_s17 + $0x9a8] sm:$0xf0] }
 0x24a   : > { %v8118_v60 = vld [vmem:[%s8823_s17 + $0xb8c] sm:$0xf]  ;;  %v6672_v56 = vor.u32 %v8054_v54, %v6669_v59  ;;  %4165 = vmatpush.bf16.msrb.mxu3 %v7472_v62  ;;  %v1156_v62 = vperm.slane %v9277_v48, 1  ;;  %v6387_v48 = vld [vmem:[%s8823_s17 + $0x750] sm:$0xf] }
 0x24b   : > { %v6925_v63 = vld [vmem:[%s8823_s17 + $0xba8] sm:$0xf0] }
 0x24c   : > { %v8182_v0 = vld [vmem:[%s8823_s17 + $0xd8c] sm:$0xf]  ;;  %v6928_v5 = vor.u32 %v8118_v60, %v6925_v63  ;;  %4124 = vmatpush.bf16.msrb.mxu0 %v6672_v56 }
 0x24d   : > { %v7181_v1 = vld [vmem:[%s8823_s17 + $0xda8] sm:$0xf0] }
 0x24e   : > { %v8246_v2 = vld [vmem:[%s8823_s17 + $0xf8c] sm:$0xf]  ;;  %v7184_v6 = vor.u32 %v8182_v0, %v7181_v1  ;;  %4138 = vmatpush.bf16.msrb.mxu1 %v6928_v5  ;;  %v3852_v1 = vpop.f32.mrf.mxu0 }
 0x24f   : > { %v7437_v3 = vld [vmem:[%s8823_s17 + $0xfa8] sm:$0xf0] }
 0x250   : > { %v8046_v7 = vld [vmem:[%s8823_s17 + $0x94c] sm:$0xf]  ;;  %v7440_v10 = vor.u32 %v8246_v2, %v7437_v3  ;;  %4152 = vmatpush.bf16.msrb.mxu2 %v7184_v6 }
 0x251   : > { %v6637_v8 = vld [vmem:[%s8823_s17 + $0x968] sm:$0xf0] }
 0x252   : > { %v8110_v9 = vld [vmem:[%s8823_s17 + $0xb4c] sm:$0xf]  ;;  %v6640_v17 = vor.u32 %v8046_v7, %v6637_v8  ;;  %4166 = vmatpush.bf16.msrb.mxu3 %v7440_v10 }
 0x253   : > { %v6893_v11 = vld [vmem:[%s8823_s17 + $0xb68] sm:$0xf0] }
 0x254   : > { %v8174_v12 = vld [vmem:[%s8823_s17 + $0xd4c] sm:$0xf]  ;;  %v6896_v18 = vor.u32 %v8110_v9, %v6893_v11  ;;  %4125 = vmatpush.bf16.msrb.mxu0 %v6640_v17  ;;  %v3866_v9 = vpop.f32.mrf.mxu1 }
 0x255   : > { %v7149_v14 = vld [vmem:[%s8823_s17 + $0xd68] sm:$0xf0] }
 0x256   : > { %v8238_v15 = vld [vmem:[%s8823_s17 + $0xf4c] sm:$0xf]  ;;  %v7152_v19 = vor.u32 %v8174_v12, %v7149_v14  ;;  %4139 = vmatpush.bf16.msrb.mxu1 %v6896_v18 }
 0x257   : > { %v7405_v16 = vld [vmem:[%s8823_s17 + $0xf68] sm:$0xf0] }
 0x258   : > { %v8038_v21 = vld [vmem:[%s8823_s17 + $0x90c] sm:$0xf]  ;;  %v7408_v24 = vor.u32 %v8238_v15, %v7405_v16  ;;  %4153 = vmatpush.bf16.msrb.mxu2 %v7152_v19 }
 0x259   : > { %v6605_v22 = vld [vmem:[%s8823_s17 + $0x928] sm:$0xf0] }
 0x25a   : > { %v8102_v23 = vld [vmem:[%s8823_s17 + $0xb0c] sm:$0xf]  ;;  %v6608_v30 = vor.u32 %v8038_v21, %v6605_v22  ;;  %4167 = vmatpush.bf16.msrb.mxu3 %v7408_v24  ;;  %v3853_v22 = vadd.f32 %v3852_v1, %v1156_v62 }
 0x25b   : > { %v6861_v25 = vld [vmem:[%s8823_s17 + $0xb28] sm:$0xf0] }
 0x25c   : > { %v8166_v26 = vld [vmem:[%s8823_s17 + $0xd0c] sm:$0xf]  ;;  %v6864_v31 = vor.u32 %v8102_v23, %v6861_v25  ;;  %4126 = vmatpush.bf16.msrb.mxu0 %v6608_v30 }
 0x25d   : > { %v7117_v27 = vld [vmem:[%s8823_s17 + $0xd28] sm:$0xf0] }
 0x25e   : > { %v8230_v28 = vld [vmem:[%s8823_s17 + $0xf0c] sm:$0xf]  ;;  %v7120_v32 = vor.u32 %v8166_v26, %v7117_v27  ;;  %4140 = vmatpush.bf16.msrb.mxu1 %v6864_v31  ;;  %v5683_v27 = vld [vmem:[%s8823_s17 + $0x1d0] sm:$0xf] }
 0x25f   : > { %v7373_v29 = vld [vmem:[%s8823_s17 + $0xf28] sm:$0xf0]  ;;  %v7875_v31 = vld [vmem:[%s8823_s17 + $0x3ec] sm:$0xf0] }
 0x260   : > { %v8030_v33 = vld [vmem:[%s8823_s17 + $0x8cc] sm:$0xf]  ;;  %v7376_v36 = vor.u32 %v8230_v28, %v7373_v29  ;;  %4154 = vmatpush.bf16.msrb.mxu2 %v7120_v32  ;;  %v7811_v28 = vld [vmem:[%s8823_s17 + $0x1ec] sm:$0xf0] }
 0x261   : > { %v6573_v34 = vld [vmem:[%s8823_s17 + $0x8e8] sm:$0xf0]  ;;  %v5939_v29 = vld [vmem:[%s8823_s17 + $0x3d0] sm:$0xf] }
 0x262   : > { %v8094_v35 = vld [vmem:[%s8823_s17 + $0xacc] sm:$0xf]  ;;  %v6576_v43 = vor.u32 %v8030_v33, %v6573_v34  ;;  %4168 = vmatpush.bf16.msrb.mxu3 %v7376_v36  ;;  %v6195_v32 = vld [vmem:[%s8823_s17 + $0x5d0] sm:$0xf]  ;;  %v3880_v34 = vpop.f32.mrf.mxu2 }
 0x263   : > { %v6829_v37 = vld [vmem:[%s8823_s17 + $0xae8] sm:$0xf0]  ;;  %v7939_v33 = vld [vmem:[%s8823_s17 + $0x5ec] sm:$0xf0] }
 0x264   : > { %v8158_v38 = vld [vmem:[%s8823_s17 + $0xccc] sm:$0xf]  ;;  %v6832_v44 = vor.u32 %v8094_v35, %v6829_v37  ;;  %4127 = vmatpush.bf16.msrb.mxu0 %v6576_v43  ;;  %v6451_v37 = vld [vmem:[%s8823_s17 + $0x7d0] sm:$0xf]  ;;  %v5684_v43 = vor.u32 %v7811_v28, %v5683_v27 }
 0x265   : > { %v7085_v39 = vld [vmem:[%s8823_s17 + $0xce8] sm:$0xf0]  ;;  %v7915_v27 = vld [vmem:[%s8823_s17 + $0x52c] sm:$0xf0] }
 0x266   : > { %v8222_v40 = vld [vmem:[%s8823_s17 + $0xecc] sm:$0xf]  ;;  %v7088_v45 = vor.u32 %v8158_v38, %v7085_v39  ;;  %4141 = vmatpush.bf16.msrb.mxu1 %v6832_v44  ;;  %v8003_v38 = vld [vmem:[%s8823_s17 + $0x7ec] sm:$0xf0]  ;;  %v3894_v39 = vpop.f32.mrf.mxu3  ;;  %v5940_v44 = vor.u32 %v7875_v31, %v5939_v29 }
 0x267   : > { %v7341_v41 = vld [vmem:[%s8823_s17 + $0xee8] sm:$0xf0]  ;;  %v6355_v29 = vld [vmem:[%s8823_s17 + $0x710] sm:$0xf] }
 0x268   : > { %v8022_v49 = vld [vmem:[%s8823_s17 + $0x88c] sm:$0xf]  ;;  %v7344_v53 = vor.u32 %v8222_v40, %v7341_v41  ;;  %4155 = vmatpush.bf16.msrb.mxu2 %v7088_v45  ;;  %v3867_v40 = vadd.f32 %v3866_v9, %v3853_v22  ;;  %v6196_v45 = vor.u32 %v7939_v33, %v6195_v32  ;;  %v7859_v9 = vld [vmem:[%s8823_s17 + $0x36c] sm:$0xf0] }
 0x269   : > { %v6541_v51 = vld [vmem:[%s8823_s17 + $0x8a8] sm:$0xf0]  ;;  %v7787_v22 = vld [vmem:[%s8823_s17 + $0x12c] sm:$0xf0] }
 0x26a   : > { %v8086_v52 = vld [vmem:[%s8823_s17 + $0xa8c] sm:$0xf]  ;;  %v6544_v60 = vor.u32 %v8022_v49, %v6541_v51  ;;  %4169 = vmatpush.bf16.msrb.mxu3 %v7344_v53  ;;  %v3854_v49 = vpop.f32.mrf.mxu0  ;;  %v5651_v51 = vld [vmem:[%s8823_s17 + $0x190] sm:$0xf] }
 0x26b   : > { %v6797_v54 = vld [vmem:[%s8823_s17 + $0xaa8] sm:$0xf0]  ;;  %v5907_v53 = vld [vmem:[%s8823_s17 + $0x390] sm:$0xf] }
 0x26c   : > { %v8150_v55 = vld [vmem:[%s8823_s17 + $0xc8c] sm:$0xf]  ;;  %v6800_v63 = vor.u32 %v8086_v52, %v6797_v54  ;;  %4128 = vmatpush.bf16.msrb.mxu0 %v6544_v60  ;;  %v7803_v52 = vld [vmem:[%s8823_s17 + $0x1ac] sm:$0xf0]  ;;  %v6452_v54 = vor.u32 %v8003_v38, %v6451_v37 }
 0x26d   : > { %v7053_v57 = vld [vmem:[%s8823_s17 + $0xca8] sm:$0xf0]  ;;  %v6419_v60 = vld [vmem:[%s8823_s17 + $0x790] sm:$0xf]  ;;  %v5652_v1 = vor.u32 %v7803_v52, %v5651_v51 }
 0x26e   : > { %v8214_v58 = vld [vmem:[%s8823_s17 + $0xe8c] sm:$0xf]  ;;  %v7056_v0 = vor.u32 %v8150_v55, %v7053_v57  ;;  %4142 = vmatpush.bf16.msrb.mxu1 %v6800_v63  ;;  %v7867_v55 = vld [vmem:[%s8823_s17 + $0x3ac] sm:$0xf0] }
 0x26f   : > { %v7309_v59 = vld [vmem:[%s8823_s17 + $0xea8] sm:$0xf0]  ;;  %v6163_v57 = vld [vmem:[%s8823_s17 + $0x590] sm:$0xf] }
 0x270   : > { %v8014_v2 = vld [vmem:[%s8823_s17 + $0x84c] sm:$0xf]  ;;  %v7312_v5 = vor.u32 %v8214_v58, %v7309_v59  ;;  %4156 = vmatpush.bf16.msrb.mxu2 %v7056_v0  ;;  %v7931_v58 = vld [vmem:[%s8823_s17 + $0x5ac] sm:$0xf0]  ;;  %v3868_v59 = vpop.f32.mrf.mxu1  ;;  %v3881_v0 = vadd.f32 %v3880_v34, %v3867_v40 }
 0x271   : > { %v6509_v3 = vld [vmem:[%s8823_s17 + $0x868] sm:$0xf0]  ;;  %v7995_v63 = vld [vmem:[%s8823_s17 + $0x7ac] sm:$0xf0] }
 0x272   : > { %v8078_v56 = vld [vmem:[%s8823_s17 + $0xa4c] sm:$0xf]  ;;  %v6512_v12 = vor.u32 %v8014_v2, %v6509_v3  ;;  %4170 = vmatpush.bf16.msrb.mxu3 %v7312_v5  ;;  %v3855_v2 = vadd.f32 %v3854_v49, %v1156_v62  ;;  %v5908_v3 = vor.u32 %v7867_v55, %v5907_v53  ;;  %v5619_v5 = vld [vmem:[%s8823_s17 + $0x150] sm:$0xf]  ;;  %v3908_v28 = vpop.f32.mrf.mxu0 }
 0x273   : > { %v6765_v6 = vld [vmem:[%s8823_s17 + $0xa68] sm:$0xf0]  ;;  %v7987_v62 = vld [vmem:[%s8823_s17 + $0x76c] sm:$0xf0] }
 0x274   : > { %v8142_v7 = vld [vmem:[%s8823_s17 + $0xc4c] sm:$0xf]  ;;  %v6768_v16 = vor.u32 %v8078_v56, %v6765_v6  ;;  %4129 = vmatpush.bf16.msrb.mxu0 %v6512_v12  ;;  %v6164_v56 = vor.u32 %v7931_v58, %v6163_v57  ;;  %v7795_v6 = vld [vmem:[%s8823_s17 + $0x16c] sm:$0xf0]  ;;  %v3895_v12 = vadd.f32 %v3894_v39, %v3881_v0 }
 0x275   : > { %v7021_v8 = vld [vmem:[%s8823_s17 + $0xc68] sm:$0xf0]  ;;  %v5555_v37 = vld [vmem:[%s8823_s17 + $0xd0] sm:$0xf] }
 0x276   : > { %v8206_v10 = vld [vmem:[%s8823_s17 + $0xe4c] sm:$0xf]  ;;  %v7024_v17 = vor.u32 %v8142_v7, %v7021_v8  ;;  %4143 = vmatpush.bf16.msrb.mxu1 %v6768_v16  ;;  %v5875_v7 = vld [vmem:[%s8823_s17 + $0x350] sm:$0xf]  ;;  %v6420_v8 = vor.u32 %v7995_v63, %v6419_v60  ;;  %v3869_v16 = vadd.f32 %v3868_v59, %v3855_v2  ;;  %v3909_v31 = vadd.f32 %v3908_v28, %v3895_v12 }
 0x277   : > { %v7277_v11 = vld [vmem:[%s8823_s17 + $0xe68] sm:$0xf0]  ;;  %v7779_v38 = vld [vmem:[%s8823_s17 + $0xec] sm:$0xf0] }
 0x278   : > { %v8006_v14 = vld [vmem:[%s8823_s17 + $0x80c] sm:$0xf]  ;;  %v7280_v23 = vor.u32 %v8206_v10, %v7277_v11  ;;  %4157 = vmatpush.bf16.msrb.mxu2 %v7024_v17  ;;  %v6131_v10 = vld [vmem:[%s8823_s17 + $0x550] sm:$0xf]  ;;  %v5876_v17 = vor.u32 %v7859_v9, %v5875_v7  ;;  %v3922_v33 = vpop.f32.mrf.mxu1  ;;  %v5556_v52 = vor.u32 %v7779_v38, %v5555_v37 }
 0x279   : > { %v6477_v15 = vld [vmem:[%s8823_s17 + $0x828] sm:$0xf0]  ;;  %v7923_v11 = vld [vmem:[%s8823_s17 + $0x56c] sm:$0xf0] }
 0x27a   : > { %v8070_v18 = vld [vmem:[%s8823_s17 + $0xa0c] sm:$0xf]  ;;  %v6480_v30 = vor.u32 %v8006_v14, %v6477_v15  ;;  %4171 = vmatpush.bf16.msrb.mxu3 %v7280_v23  ;;  %v5620_v14 = vor.u32 %v7795_v6, %v5619_v5  ;;  %v3882_v15 = vpop.f32.mrf.mxu2  ;;  %v5843_v23 = vld [vmem:[%s8823_s17 + $0x310] sm:$0xf] }
 0x27b   : > { %v6733_v19 = vld [vmem:[%s8823_s17 + $0xa28] sm:$0xf0]  ;;  %v3883_v34 = vadd.f32 %v3882_v15, %v3869_v16  ;;  %v5811_v39 = vld [vmem:[%s8823_s17 + $0x2d0] sm:$0xf] }
 0x27c   : > { %v8134_v21 = vld [vmem:[%s8823_s17 + $0xc0c] sm:$0xf]  ;;  %v6736_v35 = vor.u32 %v8070_v18, %v6733_v19  ;;  %4130 = vmatpush.bf16.msrb.mxu0 %v6480_v30  ;;  %v6132_v18 = vor.u32 %v7923_v11, %v6131_v10  ;;  %v3896_v19 = vpop.f32.mrf.mxu3  ;;  %v7979_v30 = vld [vmem:[%s8823_s17 + $0x72c] sm:$0xf0] }
 0x27d   : > { %v6989_v24 = vld [vmem:[%s8823_s17 + $0xc28] sm:$0xf0]  ;;  %v6356_v40 = vor.u32 %v7979_v30, %v6355_v29  ;;  %v6323_v49 = vld [vmem:[%s8823_s17 + $0x6d0] sm:$0xf] }
 0x27e   : > { %v8198_v25 = vld [vmem:[%s8823_s17 + $0xe0c] sm:$0xf]  ;;  %v6992_v36 = vor.u32 %v8134_v21, %v6989_v24  ;;  %4144 = vmatpush.bf16.msrb.mxu1 %v6736_v35  ;;  %v5587_v21 = vld [vmem:[%s8823_s17 + $0x110] sm:$0xf]  ;;  %v6388_v24 = vor.u32 %v7987_v62, %v6387_v48 }
 0x27f   : > { %v7245_v26 = vld [vmem:[%s8823_s17 + $0xe28] sm:$0xf0]  ;;  %4131 = vmatmul.bf16.vlgmr.msrb.gmra.mxu0 %v9022_v42  ;;  %v5588_v32 = vor.u32 %v7787_v22, %v5587_v21  ;;  %v7971_v51 = vld [vmem:[%s8823_s17 + $0x6ec] sm:$0xf0] }
 0x280   : > { %v7248_v41 = vor.u32 %v8198_v25, %v7245_v26  ;;  %4158 = vmatpush.bf16.msrb.mxu2 %v6992_v36  ;;  %4179 = vmatpush.bf16.msra.mxu0 %v5684_v43  ;;  %v7851_v25 = vld [vmem:[%s8823_s17 + $0x32c] sm:$0xf0]  ;;  %v6324_v63 = vor.u32 %v7971_v51, %v6323_v49  ;;  %v3924_v16 = vpop.f32.mrf.mxu1 }
 0x281   : > { %4145 = vmatmul.bf16.vlgmr.msrb.gmra.mxu1 %v9029_v47  ;;  %v6099_v26 = vld [vmem:[%s8823_s17 + $0x510] sm:$0xf]  ;;  %v5844_v35 = vor.u32 %v7851_v25, %v5843_v23 }
 0x282   : > { %4172 = vmatpush.bf16.msrb.mxu3 %v7248_v41  ;;  %4193 = vmatpush.bf16.msra.mxu1 %v5940_v44  ;;  %v6100_v36 = vor.u32 %v7915_v27, %v6099_v26  ;;  %v7843_v41 = vld [vmem:[%s8823_s17 + $0x2ec] sm:$0xf0]  ;;  %v3936_v0 = vpop.f32.mrf.mxu2 }
 0x283   : > { %4159 = vmatmul.bf16.vlgmr.msrb.gmra.mxu2 %v9027_v46  ;;  %v6067_v43 = vld [vmem:[%s8823_s17 + $0x4d0] sm:$0xf]  ;;  %v5812_v55 = vor.u32 %v7843_v41, %v5811_v39 }
 0x284   : > { %4207 = vmatpush.bf16.msra.mxu2 %v6196_v45  ;;  %4180 = vmatpush.bf16.msra.mxu0 %v5652_v1  ;;  %v7907_v44 = vld [vmem:[%s8823_s17 + $0x4ec] sm:$0xf0]  ;;  %v3923_v45 = vadd.f32 %v3922_v33, %v3909_v31  ;;  %v3950_v5 = vpop.f32.mrf.mxu3 }
 0x285   : > { %4173 = vmatmul.bf16.vlgmr.msrb.gmra.mxu3 %v9033_v50  ;;  %v5523_v53 = vld [vmem:[%s8823_s17 + $0x90] sm:$0xf]  ;;  %v6068_v57 = vor.u32 %v7907_v44, %v6067_v43 }
 0x286   : > { %4221 = vmatpush.bf16.msra.mxu3 %v6452_v54  ;;  %4194 = vmatpush.bf16.msra.mxu1 %v5908_v3  ;;  %v3897_v54 = vadd.f32 %v3896_v19, %v3883_v34  ;;  %v7771_v58 = vld [vmem:[%s8823_s17 + $0xac] sm:$0xf0]  ;;  %v3937_v3 = vadd.f32 %v3936_v0, %v3923_v45 }
 0x287   : > { %v5779_v59 = vld [vmem:[%s8823_s17 + $0x290] sm:$0xf] }
 0x288   : > { %4208 = vmatpush.bf16.msra.mxu2 %v6164_v56  ;;  %4181 = vmatpush.bf16.msra.mxu0 %v5620_v14  ;;  %v7835_v60 = vld [vmem:[%s8823_s17 + $0x2ac] sm:$0xf0]  ;;  %v3910_v56 = vpop.f32.mrf.mxu0  ;;  %v3951_v11 = vadd.f32 %v3950_v5, %v3937_v3 }
 0x289   : > { %v6035_v1 = vld [vmem:[%s8823_s17 + $0x490] sm:$0xf]  ;;  %v5780_v9 = vor.u32 %v7835_v60, %v5779_v59  ;;  %v3911_v10 = vadd.f32 %v3910_v56, %v3897_v54 }
 0x28a   : > { %4222 = vmatpush.bf16.msra.mxu3 %v6420_v8  ;;  %4195 = vmatpush.bf16.msra.mxu1 %v5876_v17  ;;  %v7899_v2 = vld [vmem:[%s8823_s17 + $0x4ac] sm:$0xf0]  ;;  %v5524_v8 = vor.u32 %v7771_v58, %v5523_v53  ;;  %v4628_v21 = vmax.f32 %v3951_v11, 0.0  ;;  %v3938_v34 = vpop.f32.mrf.mxu2 }
 0x28b   : > { %v6291_v6 = vld [vmem:[%s8823_s17 + $0x690] sm:$0xf]  ;;  %v6036_v48 = vor.u32 %v7899_v2, %v6035_v1  ;;  %v3925_v28 = vadd.f32 %v3924_v16, %v3911_v10 }
 0x28c   : > { %4209 = vmatpush.bf16.msra.mxu2 %v6132_v18  ;;  %4182 = vmatpush.bf16.msra.mxu0 %v5588_v32  ;;  %v7963_v7 = vld [vmem:[%s8823_s17 + $0x6ac] sm:$0xf0]  ;;  %4644 = vst [vmem:[#allocation2] sm:$0xff] %v4628_v21  ;;  %v3952_v39 = vpop.f32.mrf.mxu3 }
 0x28d   : > { %v5491_v62 = vld [vmem:[%s8823_s17 + $0x50] sm:$0xf]  ;;  %v6292_v15 = vor.u32 %v7963_v7, %v6291_v6  ;;  %v3939_v38 = vadd.f32 %v3938_v34, %v3925_v28 }
 0x28e   : > { %4223 = vmatpush.bf16.msra.mxu3 %v6388_v24  ;;  %4196 = vmatpush.bf16.msra.mxu1 %v5844_v35  ;;  %v7763_v12 = vld [vmem:[%s8823_s17 + $0x6c] sm:$0xf0] }
 0x28f   : > { %v5747_v14 = vld [vmem:[%s8823_s17 + $0x250] sm:$0xf]  ;;  %v5492_v24 = vor.u32 %v7763_v12, %v5491_v62 }
 0x290   : > { %4210 = vmatpush.bf16.msra.mxu2 %v6100_v36  ;;  %4183 = vmatpush.bf16.msra.mxu0 %v5556_v52  ;;  %v7827_v17 = vld [vmem:[%s8823_s17 + $0x26c] sm:$0xf0]  ;;  %v3953_v52 = vadd.f32 %v3952_v39, %v3939_v38 }
 0x291   : > { %v6003_v18 = vld [vmem:[%s8823_s17 + $0x450] sm:$0xf]  ;;  %v5748_v29 = vor.u32 %v7827_v17, %v5747_v14 }
 0x292   : > { %4224 = vmatpush.bf16.msra.mxu3 %v6356_v40  ;;  %4197 = vmatpush.bf16.msra.mxu1 %v5812_v55  ;;  %v7891_v19 = vld [vmem:[%s8823_s17 + $0x46c] sm:$0xf0] }
 0x293   : > { %v6259_v22 = vld [vmem:[%s8823_s17 + $0x650] sm:$0xf]  ;;  %v6004_v30 = vor.u32 %v7891_v19, %v6003_v18 }
 0x294   : > { %4211 = vmatpush.bf16.msra.mxu2 %v6068_v57  ;;  %v7955_v23 = vld [vmem:[%s8823_s17 + $0x66c] sm:$0xf0]  ;;  %4184 = vmatpush.bf16.msra.mxu0 %v5524_v8 }
 0x295   : > { %v5459_v25 = vld [vmem:[%s8823_s17 + $0x10] sm:$0xf]  ;;  %v6260_v33 = vor.u32 %v7955_v23, %v6259_v22 }
 0x296   : > { %4225 = vmatpush.bf16.msra.mxu3 %v6324_v63  ;;  %v7755_v26 = vld [vmem:[%s8823_s17 + $0x2c] sm:$0xf0]  ;;  %4198 = vmatpush.bf16.msra.mxu1 %v5780_v9  ;;  %v4636_v63 = vmax.f32 %v3953_v52, 0.0 }
 0x297   : > { %v5715_v27 = vld [vmem:[%s8823_s17 + $0x210] sm:$0xf]  ;;  %v5460_v44 = vor.u32 %v7755_v26, %v5459_v25 }
 0x298   : > { %4212 = vmatpush.bf16.msra.mxu2 %v6036_v48  ;;  %v7819_v31 = vld [vmem:[%s8823_s17 + $0x22c] sm:$0xf0]  ;;  %4185 = vmatpush.bf16.msra.mxu0 %v5492_v24  ;;  %4652 = vst [vmem:[#allocation2 + $0x20] sm:$0xff] %v4636_v63 }
 0x299   : > { %v5971_v32 = vld [vmem:[%s8823_s17 + $0x410] sm:$0xf]  ;;  %v5716_v53 = vor.u32 %v7819_v31, %v5715_v27 }
 0x29a   : > { %4226 = vmatpush.bf16.msra.mxu3 %v6292_v15  ;;  %v7883_v35 = vld [vmem:[%s8823_s17 + $0x42c] sm:$0xf0]  ;;  %4199 = vmatpush.bf16.msra.mxu1 %v5748_v29 }
 0x29b   : > { %v6227_v36 = vld [vmem:[%s8823_s17 + $0x610] sm:$0xf]  ;;  %v5972_v54 = vor.u32 %v7883_v35, %v5971_v32 }
 0x29c   : > { %v7947_v37 = vld [vmem:[%s8823_s17 + $0x62c] sm:$0xf0]  ;;  %4213 = vmatpush.bf16.msra.mxu2 %v6004_v30  ;;  %4186 = vmatpush.bf16.msra.mxu0 %v5460_v44 }
 0x29d   : > { %v6707_v40 = vld [vmem:[%s8823_s17 + $0x9d0] sm:$0xf]  ;;  %v6228_v58 = vor.u32 %v7947_v37, %v6227_v36 }
 0x29e   : > { %v8067_v41 = vld [vmem:[%s8823_s17 + $0x9ec] sm:$0xf0]  ;;  %4227 = vmatpush.bf16.msra.mxu3 %v6260_v33  ;;  %4200 = vmatpush.bf16.msra.mxu1 %v5716_v53 }
 0x29f   : > { %v6963_v43 = vld [vmem:[%s8823_s17 + $0xbd0] sm:$0xf]  ;;  %v6708_v59 = vor.u32 %v8067_v41, %v6707_v40  ;;  %4187 = vmatmul.bf16.vlgmr.msra.gmra.mxu0 %v8953_v61 }
 0x2a0   : > { %v8131_v45 = vld [vmem:[%s8823_s17 + $0xbec] sm:$0xf0]  ;;  %4214 = vmatpush.bf16.msra.mxu2 %v5972_v54 }
 0x2a1   : > { %v7219_v49 = vld [vmem:[%s8823_s17 + $0xdd0] sm:$0xf]  ;;  %v6964_v0 = vor.u32 %v8131_v45, %v6963_v43  ;;  %4235 = vmatpush.bf16.msrb.mxu0 %v6708_v59  ;;  %4201 = vmatmul.bf16.vlgmr.msra.gmra.mxu1 %v8965_v13 }
 0x2a2   : > { %v8195_v51 = vld [vmem:[%s8823_s17 + $0xdec] sm:$0xf0]  ;;  %4228 = vmatpush.bf16.msra.mxu3 %v6228_v58 }
 0x2a3   : > { %v7475_v55 = vld [vmem:[%s8823_s17 + $0xfd0] sm:$0xf]  ;;  %v7220_v1 = vor.u32 %v8195_v51, %v7219_v49  ;;  %4249 = vmatpush.bf16.msrb.mxu1 %v6964_v0  ;;  %4215 = vmatmul.bf16.vlgmr.msra.gmra.mxu2 %v8958_v4 }
 0x2a4   : > { %v8259_v57 = vld [vmem:[%s8823_s17 + $0xfec] sm:$0xf0] }
 0x2a5   : > { %v6675_v60 = vld [vmem:[%s8823_s17 + $0x990] sm:$0xf]  ;;  %v7476_v56 = vor.u32 %v8259_v57, %v7475_v55  ;;  %4263 = vmatpush.bf16.msrb.mxu2 %v7220_v1  ;;  %4229 = vmatmul.bf16.vlgmr.msra.gmra.mxu3 %v8970_v20 }
 0x2a6   : > { %v8059_v2 = vld [vmem:[%s8823_s17 + $0x9ac] sm:$0xf0] }
 0x2a7   : > { %v6931_v3 = vld [vmem:[%s8823_s17 + $0xb90] sm:$0xf]  ;;  %v6676_v10 = vor.u32 %v8059_v2, %v6675_v60  ;;  %4277 = vmatpush.bf16.msrb.mxu3 %v7476_v56 }
 0x2a8   : > { %v8123_v5 = vld [vmem:[%s8823_s17 + $0xbac] sm:$0xf0] }
 0x2a9   : > { %v7187_v6 = vld [vmem:[%s8823_s17 + $0xd90] sm:$0xf]  ;;  %v6932_v11 = vor.u32 %v8123_v5, %v6931_v3  ;;  %4236 = vmatpush.bf16.msrb.mxu0 %v6676_v10  ;;  %v9564_v3 = vld [vmem:[%s9274_s23] sm:$0xff] }
 0x2aa   : > { %v8187_v7 = vld [vmem:[%s8823_s17 + $0xdac] sm:$0xf0]  ;;  %v1157_v56 = vperm.slane %v9564_v3, 2 }
 0x2ab   : > { %v7443_v8 = vld [vmem:[%s8823_s17 + $0xf90] sm:$0xf]  ;;  %v7188_v48 = vor.u32 %v8187_v7, %v7187_v6  ;;  %4250 = vmatpush.bf16.msrb.mxu1 %v6932_v11  ;;  %v3964_v7 = vpop.f32.mrf.mxu0 }
 0x2ac   : > { %v8251_v9 = vld [vmem:[%s8823_s17 + $0xfac] sm:$0xf0] }
 0x2ad   : > { %v6643_v62 = vld [vmem:[%s8823_s17 + $0x950] sm:$0xf]  ;;  %v7444_v15 = vor.u32 %v8251_v9, %v7443_v8  ;;  %4264 = vmatpush.bf16.msrb.mxu2 %v7188_v48 }
 0x2ae   : > { %v8051_v12 = vld [vmem:[%s8823_s17 + $0x96c] sm:$0xf0] }
 0x2af   : > { %v6899_v14 = vld [vmem:[%s8823_s17 + $0xb50] sm:$0xf]  ;;  %v6644_v22 = vor.u32 %v8051_v12, %v6643_v62  ;;  %4278 = vmatpush.bf16.msrb.mxu3 %v7444_v15 }
 0x2b0   : > { %v8115_v16 = vld [vmem:[%s8823_s17 + $0xb6c] sm:$0xf0] }
 0x2b1   : > { %v7155_v17 = vld [vmem:[%s8823_s17 + $0xd50] sm:$0xf]  ;;  %v6900_v23 = vor.u32 %v8115_v16, %v6899_v14  ;;  %4237 = vmatpush.bf16.msrb.mxu0 %v6644_v22  ;;  %v3978_v14 = vpop.f32.mrf.mxu1 }
 0x2b2   : > { %v8179_v18 = vld [vmem:[%s8823_s17 + $0xd6c] sm:$0xf0] }
 0x2b3   : > { %v7411_v19 = vld [vmem:[%s8823_s17 + $0xf50] sm:$0xf]  ;;  %v7156_v24 = vor.u32 %v8179_v18, %v7155_v17  ;;  %4251 = vmatpush.bf16.msrb.mxu1 %v6900_v23 }
 0x2b4   : > { %v8243_v21 = vld [vmem:[%s8823_s17 + $0xf6c] sm:$0xf0] }
 0x2b5   : > { %v6611_v25 = vld [vmem:[%s8823_s17 + $0x910] sm:$0xf]  ;;  %v7412_v28 = vor.u32 %v8243_v21, %v7411_v19  ;;  %4265 = vmatpush.bf16.msrb.mxu2 %v7156_v24 }
 0x2b6   : > { %v8043_v26 = vld [vmem:[%s8823_s17 + $0x92c] sm:$0xf0] }
 0x2b7   : > { %v6867_v27 = vld [vmem:[%s8823_s17 + $0xb10] sm:$0xf]  ;;  %v6612_v34 = vor.u32 %v8043_v26, %v6611_v25  ;;  %4279 = vmatpush.bf16.msrb.mxu3 %v7412_v28  ;;  %v3965_v26 = vadd.f32 %v3964_v7, %v1157_v56 }
 0x2b8   : > { %v8107_v29 = vld [vmem:[%s8823_s17 + $0xb2c] sm:$0xf0] }
 0x2b9   : > { %v7123_v30 = vld [vmem:[%s8823_s17 + $0xd10] sm:$0xf]  ;;  %v6868_v35 = vor.u32 %v8107_v29, %v6867_v27  ;;  %4238 = vmatpush.bf16.msrb.mxu0 %v6612_v34 }
 0x2ba   : > { %v8171_v31 = vld [vmem:[%s8823_s17 + $0xd2c] sm:$0xf0] }
 0x2bb   : > { %v7379_v32 = vld [vmem:[%s8823_s17 + $0xf10] sm:$0xf]  ;;  %v7124_v36 = vor.u32 %v8171_v31, %v7123_v30  ;;  %4252 = vmatpush.bf16.msrb.mxu1 %v6868_v35  ;;  %v7807_v31 = vld [vmem:[%s8823_s17 + $0x1d4] sm:$0xf] }
 0x2bc   : > { %v8235_v33 = vld [vmem:[%s8823_s17 + $0xf2c] sm:$0xf0]  ;;  %v5941_v35 = vld [vmem:[%s8823_s17 + $0x3f0] sm:$0xf0] }
 0x2bd   : > { %v6579_v37 = vld [vmem:[%s8823_s17 + $0x8d0] sm:$0xf]  ;;  %v7380_v40 = vor.u32 %v8235_v33, %v7379_v32  ;;  %4266 = vmatpush.bf16.msrb.mxu2 %v7124_v36  ;;  %v5685_v32 = vld [vmem:[%s8823_s17 + $0x1f0] sm:$0xf0] }
 0x2be   : > { %v8035_v38 = vld [vmem:[%s8823_s17 + $0x8ec] sm:$0xf0]  ;;  %v7871_v33 = vld [vmem:[%s8823_s17 + $0x3d4] sm:$0xf] }
 0x2bf   : > { %v6835_v39 = vld [vmem:[%s8823_s17 + $0xad0] sm:$0xf]  ;;  %v6580_v51 = vor.u32 %v8035_v38, %v6579_v37  ;;  %4280 = vmatpush.bf16.msrb.mxu3 %v7380_v40  ;;  %v7935_v36 = vld [vmem:[%s8823_s17 + $0x5d4] sm:$0xf]  ;;  %v3992_v38 = vpop.f32.mrf.mxu2 }
 0x2c0   : > { %v8099_v41 = vld [vmem:[%s8823_s17 + $0xaec] sm:$0xf0]  ;;  %v6197_v37 = vld [vmem:[%s8823_s17 + $0x5f0] sm:$0xf0] }
 0x2c1   : > { %v7091_v43 = vld [vmem:[%s8823_s17 + $0xcd0] sm:$0xf]  ;;  %v6836_v52 = vor.u32 %v8099_v41, %v6835_v39  ;;  %4239 = vmatpush.bf16.msrb.mxu0 %v6580_v51  ;;  %v7999_v41 = vld [vmem:[%s8823_s17 + $0x7d4] sm:$0xf]  ;;  %v5688_v51 = vor.u32 %v7807_v31, %v5685_v32 }
 0x2c2   : > { %v8163_v44 = vld [vmem:[%s8823_s17 + $0xcec] sm:$0xf0]  ;;  %v7911_v31 = vld [vmem:[%s8823_s17 + $0x514] sm:$0xf] }
 0x2c3   : > { %v7347_v45 = vld [vmem:[%s8823_s17 + $0xed0] sm:$0xf]  ;;  %v7092_v53 = vor.u32 %v8163_v44, %v7091_v43  ;;  %4253 = vmatpush.bf16.msrb.mxu1 %v6836_v52  ;;  %v6453_v43 = vld [vmem:[%s8823_s17 + $0x7f0] sm:$0xf0]  ;;  %v4006_v44 = vpop.f32.mrf.mxu3  ;;  %v5944_v52 = vor.u32 %v7871_v33, %v5941_v35 }
 0x2c4   : > { %v8227_v49 = vld [vmem:[%s8823_s17 + $0xeec] sm:$0xf0]  ;;  %v6101_v32 = vld [vmem:[%s8823_s17 + $0x530] sm:$0xf0] }
 0x2c5   : > { %v6547_v54 = vld [vmem:[%s8823_s17 + $0x890] sm:$0xf]  ;;  %v7348_v58 = vor.u32 %v8227_v49, %v7347_v45  ;;  %4267 = vmatpush.bf16.msrb.mxu2 %v7092_v53  ;;  %v3979_v45 = vadd.f32 %v3978_v14, %v3965_v26  ;;  %v6200_v53 = vor.u32 %v7935_v36, %v6197_v37  ;;  %v5877_v14 = vld [vmem:[%s8823_s17 + $0x370] sm:$0xf0] }
 0x2c6   : > { %v8027_v55 = vld [vmem:[%s8823_s17 + $0x8ac] sm:$0xf0]  ;;  %v7783_v26 = vld [vmem:[%s8823_s17 + $0x114] sm:$0xf] }
 0x2c7   : > { %v6803_v57 = vld [vmem:[%s8823_s17 + $0xa90] sm:$0xf]  ;;  %v6548_v2 = vor.u32 %v8027_v55, %v6547_v54  ;;  %4281 = vmatpush.bf16.msrb.mxu3 %v7348_v58  ;;  %v3966_v54 = vpop.f32.mrf.mxu0  ;;  %v7799_v55 = vld [vmem:[%s8823_s17 + $0x194] sm:$0xf] }
 0x2c8   : > { %v8091_v59 = vld [vmem:[%s8823_s17 + $0xaac] sm:$0xf0]  ;;  %v7863_v58 = vld [vmem:[%s8823_s17 + $0x394] sm:$0xf] }
 0x2c9   : > { %v7059_v60 = vld [vmem:[%s8823_s17 + $0xc90] sm:$0xf]  ;;  %v6804_v5 = vor.u32 %v8091_v59, %v6803_v57  ;;  %4240 = vmatpush.bf16.msrb.mxu0 %v6548_v2  ;;  %v5653_v57 = vld [vmem:[%s8823_s17 + $0x1b0] sm:$0xf0]  ;;  %v6456_v59 = vor.u32 %v7999_v41, %v6453_v43  ;;  %v6104_v41 = vor.u32 %v7911_v31, %v6101_v32 }
 0x2ca   : > { %v8155_v63 = vld [vmem:[%s8823_s17 + $0xcac] sm:$0xf0]  ;;  %v7991_v2 = vld [vmem:[%s8823_s17 + $0x794] sm:$0xf]  ;;  %v5656_v7 = vor.u32 %v7799_v55, %v5653_v57 }
 0x2cb   : > { %v7315_v0 = vld [vmem:[%s8823_s17 + $0xe90] sm:$0xf]  ;;  %v7060_v6 = vor.u32 %v8155_v63, %v7059_v60  ;;  %4254 = vmatpush.bf16.msrb.mxu1 %v6804_v5  ;;  %v5909_v60 = vld [vmem:[%s8823_s17 + $0x3b0] sm:$0xf0] }
 0x2cc   : > { %v8219_v1 = vld [vmem:[%s8823_s17 + $0xeac] sm:$0xf0]  ;;  %v7927_v63 = vld [vmem:[%s8823_s17 + $0x594] sm:$0xf] }
 0x2cd   : > { %v6515_v8 = vld [vmem:[%s8823_s17 + $0x850] sm:$0xf]  ;;  %v7316_v11 = vor.u32 %v8219_v1, %v7315_v0  ;;  %4268 = vmatpush.bf16.msrb.mxu2 %v7060_v6  ;;  %v6165_v0 = vld [vmem:[%s8823_s17 + $0x5b0] sm:$0xf0]  ;;  %v3980_v1 = vpop.f32.mrf.mxu1  ;;  %v3993_v6 = vadd.f32 %v3992_v38, %v3979_v45 }
 0x2ce   : > { %v8019_v9 = vld [vmem:[%s8823_s17 + $0x86c] sm:$0xf0]  ;;  %v6421_v5 = vld [vmem:[%s8823_s17 + $0x7b0] sm:$0xf0] }
 0x2cf   : > { %v6771_v10 = vld [vmem:[%s8823_s17 + $0xa50] sm:$0xf]  ;;  %v6516_v17 = vor.u32 %v8019_v9, %v6515_v8  ;;  %4282 = vmatpush.bf16.msrb.mxu3 %v7316_v11  ;;  %v3967_v8 = vadd.f32 %v3966_v54, %v1157_v56  ;;  %v5912_v9 = vor.u32 %v7863_v58, %v5909_v60  ;;  %v7791_v11 = vld [vmem:[%s8823_s17 + $0x154] sm:$0xf]  ;;  %v4020_v33 = vpop.f32.mrf.mxu0 }
 0x2d0   : > { %v8083_v48 = vld [vmem:[%s8823_s17 + $0xa6c] sm:$0xf0]  ;;  %v7983_v56 = vld [vmem:[%s8823_s17 + $0x754] sm:$0xf] }
 0x2d1   : > { %v7027_v62 = vld [vmem:[%s8823_s17 + $0xc50] sm:$0xf]  ;;  %v6772_v21 = vor.u32 %v8083_v48, %v6771_v10  ;;  %4241 = vmatpush.bf16.msrb.mxu0 %v6516_v17  ;;  %v6168_v10 = vor.u32 %v7927_v63, %v6165_v0  ;;  %v5621_v48 = vld [vmem:[%s8823_s17 + $0x170] sm:$0xf0] }
 0x2d2   : > { %v8147_v12 = vld [vmem:[%s8823_s17 + $0xc6c] sm:$0xf0]  ;;  %v6389_v17 = vld [vmem:[%s8823_s17 + $0x770] sm:$0xf0] }
 0x2d3   : > { %v7283_v15 = vld [vmem:[%s8823_s17 + $0xe50] sm:$0xf]  ;;  %v7028_v22 = vor.u32 %v8147_v12, %v7027_v62  ;;  %4255 = vmatpush.bf16.msrb.mxu1 %v6772_v21  ;;  %v7855_v62 = vld [vmem:[%s8823_s17 + $0x354] sm:$0xf]  ;;  %v6424_v12 = vor.u32 %v7991_v2, %v6421_v5  ;;  %v3994_v21 = vpop.f32.mrf.mxu2 }
 0x2d4   : > { %v8211_v16 = vld [vmem:[%s8823_s17 + $0xe6c] sm:$0xf0]  ;;  %v6357_v35 = vld [vmem:[%s8823_s17 + $0x730] sm:$0xf0] }
 0x2d5   : > { %v6483_v18 = vld [vmem:[%s8823_s17 + $0x810] sm:$0xf]  ;;  %v7284_v27 = vor.u32 %v8211_v16, %v7283_v15  ;;  %4269 = vmatpush.bf16.msrb.mxu2 %v7028_v22  ;;  %v7919_v15 = vld [vmem:[%s8823_s17 + $0x554] sm:$0xf]  ;;  %v3981_v22 = vadd.f32 %v3980_v1, %v3967_v8  ;;  %v4034_v38 = vpop.f32.mrf.mxu1 }
 0x2d6   : > { %v8011_v19 = vld [vmem:[%s8823_s17 + $0x82c] sm:$0xf0]  ;;  %v6133_v16 = vld [vmem:[%s8823_s17 + $0x570] sm:$0xf0] }
 0x2d7   : > { %v6739_v23 = vld [vmem:[%s8823_s17 + $0xa10] sm:$0xf]  ;;  %v6484_v34 = vor.u32 %v8011_v19, %v6483_v18  ;;  %4283 = vmatpush.bf16.msrb.mxu3 %v7284_v27  ;;  %v4007_v18 = vadd.f32 %v4006_v44, %v3993_v6  ;;  %v5624_v19 = vor.u32 %v7791_v11, %v5621_v48  ;;  %v5589_v27 = vld [vmem:[%s8823_s17 + $0x130] sm:$0xf0]  ;;  %v4022_v11 = vpop.f32.mrf.mxu0 }
 0x2d8   : > { %v8075_v24 = vld [vmem:[%s8823_s17 + $0xa2c] sm:$0xf0]  ;;  %v5592_v37 = vor.u32 %v7783_v26, %v5589_v27  ;;  %v7775_v43 = vld [vmem:[%s8823_s17 + $0xd4] sm:$0xf] }
 0x2d9   : > { %v6995_v25 = vld [vmem:[%s8823_s17 + $0xc10] sm:$0xf]  ;;  %v6740_v39 = vor.u32 %v8075_v24, %v6739_v23  ;;  %4242 = vmatpush.bf16.msrb.mxu0 %v6484_v34  ;;  %v5880_v23 = vor.u32 %v7855_v62, %v5877_v14  ;;  %v6136_v24 = vor.u32 %v7919_v15, %v6133_v16  ;;  %v7975_v34 = vld [vmem:[%s8823_s17 + $0x714] sm:$0xf]  ;;  %v4021_v36 = vadd.f32 %v4020_v33, %v4007_v18 }
 0x2da   : > { %v8139_v28 = vld [vmem:[%s8823_s17 + $0xc2c] sm:$0xf0]  ;;  %v5557_v44 = vld [vmem:[%s8823_s17 + $0xf0] sm:$0xf0] }
 0x2db   : > { %v7251_v29 = vld [vmem:[%s8823_s17 + $0xe10] sm:$0xf]  ;;  %v6996_v40 = vor.u32 %v8139_v28, %v6995_v25  ;;  %4256 = vmatpush.bf16.msrb.mxu1 %v6740_v39  ;;  %v4008_v25 = vpop.f32.mrf.mxu3  ;;  %v7847_v28 = vld [vmem:[%s8823_s17 + $0x314] sm:$0xf]  ;;  %v3995_v39 = vadd.f32 %v3994_v21, %v3981_v22  ;;  %v4035_v54 = vadd.f32 %v4034_v38, %v4021_v36  ;;  %v5560_v58 = vor.u32 %v7775_v43, %v5557_v44 }
 0x2dc   : > { %v8203_v30 = vld [vmem:[%s8823_s17 + $0xe2c] sm:$0xf0]  ;;  %4243 = vmatmul.bf16.vlgmr.msrb.gmra.mxu0 %v9022_v42  ;;  %v7839_v45 = vld [vmem:[%s8823_s17 + $0x2d4] sm:$0xf] }
 0x2dd   : > { %v7252_v49 = vor.u32 %v8203_v30, %v7251_v29  ;;  %4270 = vmatpush.bf16.msrb.mxu2 %v6996_v40  ;;  %4291 = vmatpush.bf16.msra.mxu0 %v5688_v51  ;;  %v6392_v29 = vor.u32 %v7983_v56, %v6389_v17  ;;  %v5845_v30 = vld [vmem:[%s8823_s17 + $0x330] sm:$0xf0]  ;;  %v4009_v60 = vadd.f32 %v4008_v25, %v3995_v39 }
 0x2de   : > { %4257 = vmatmul.bf16.vlgmr.msrb.gmra.mxu1 %v9029_v47  ;;  %v5848_v40 = vor.u32 %v7847_v28, %v5845_v30  ;;  %v5813_v51 = vld [vmem:[%s8823_s17 + $0x2f0] sm:$0xf0] }
 0x2df   : > { %4284 = vmatpush.bf16.msrb.mxu3 %v7252_v49  ;;  %4305 = vmatpush.bf16.msra.mxu1 %v5944_v52  ;;  %v6360_v49 = vor.u32 %v7975_v34, %v6357_v35  ;;  %v7903_v52 = vld [vmem:[%s8823_s17 + $0x4d4] sm:$0xf]  ;;  %v5816_v63 = vor.u32 %v7839_v45, %v5813_v51  ;;  %v4023_v16 = vadd.f32 %v4022_v11, %v4009_v60 }
 0x2e0   : > { %4271 = vmatmul.bf16.vlgmr.msrb.gmra.mxu2 %v9027_v46  ;;  %v7967_v55 = vld [vmem:[%s8823_s17 + $0x6d4] sm:$0xf] }
 0x2e1   : > { %4319 = vmatpush.bf16.msra.mxu2 %v6200_v53  ;;  %4292 = vmatpush.bf16.msra.mxu0 %v5656_v7  ;;  %v6069_v53 = vld [vmem:[%s8823_s17 + $0x4f0] sm:$0xf0]  ;;  %v4048_v7 = vpop.f32.mrf.mxu2 }
 0x2e2   : > { %4285 = vmatmul.bf16.vlgmr.msrb.gmra.mxu3 %v9033_v50  ;;  %v6325_v57 = vld [vmem:[%s8823_s17 + $0x6f0] sm:$0xf0]  ;;  %v6072_v0 = vor.u32 %v7903_v52, %v6069_v53 }
 0x2e3   : > { %4333 = vmatpush.bf16.msra.mxu3 %v6456_v59  ;;  %4306 = vmatpush.bf16.msra.mxu1 %v5912_v9  ;;  %v7767_v59 = vld [vmem:[%s8823_s17 + $0x94] sm:$0xf]  ;;  %v6328_v6 = vor.u32 %v7967_v55, %v6325_v57  ;;  %v4062_v48 = vpop.f32.mrf.mxu3 }
 0x2e4   : > { %v5525_v1 = vld [vmem:[%s8823_s17 + $0xb0] sm:$0xf0] }
 0x2e5   : > { %4320 = vmatpush.bf16.msra.mxu2 %v6168_v10  ;;  %4293 = vmatpush.bf16.msra.mxu0 %v5624_v19  ;;  %v7831_v2 = vld [vmem:[%s8823_s17 + $0x294] sm:$0xf]  ;;  %v4049_v10 = vadd.f32 %v4048_v7, %v4035_v54  ;;  %v5528_v14 = vor.u32 %v7767_v59, %v5525_v1 }
 0x2e6   : > { %v5781_v5 = vld [vmem:[%s8823_s17 + $0x2b0] sm:$0xf0] }
 0x2e7   : > { %4334 = vmatpush.bf16.msra.mxu3 %v6424_v12  ;;  %4307 = vmatpush.bf16.msra.mxu1 %v5880_v23  ;;  %v7895_v8 = vld [vmem:[%s8823_s17 + $0x494] sm:$0xf]  ;;  %v5784_v15 = vor.u32 %v7831_v2, %v5781_v5  ;;  %v4063_v56 = vadd.f32 %v4062_v48, %v4049_v10  ;;  %v4036_v23 = vpop.f32.mrf.mxu1 }
 0x2e8   : > { %v6037_v9 = vld [vmem:[%s8823_s17 + $0x4b0] sm:$0xf0]  ;;  %v4037_v34 = vadd.f32 %v4036_v23, %v4023_v16 }
 0x2e9   : > { %4321 = vmatpush.bf16.msra.mxu2 %v6136_v24  ;;  %4294 = vmatpush.bf16.msra.mxu0 %v5592_v37  ;;  %v7959_v62 = vld [vmem:[%s8823_s17 + $0x694] sm:$0xf]  ;;  %v6040_v17 = vor.u32 %v7895_v8, %v6037_v9  ;;  %v4629_v27 = vmax.f32 %v4063_v56, 0.0 }
 0x2ea   : > { %v6293_v12 = vld [vmem:[%s8823_s17 + $0x6b0] sm:$0xf0] }
 0x2eb   : > { %4335 = vmatpush.bf16.msra.mxu3 %v6392_v29  ;;  %4308 = vmatpush.bf16.msra.mxu1 %v5848_v40  ;;  %v7759_v18 = vld [vmem:[%s8823_s17 + $0x54] sm:$0xf]  ;;  %v6296_v22 = vor.u32 %v7959_v62, %v6293_v12  ;;  %4645 = vst [vmem:[#allocation2 + $0x58] sm:$0xff] %v4629_v27  ;;  %v4050_v40 = vpop.f32.mrf.mxu2 }
 0x2ec   : > { %v5493_v19 = vld [vmem:[%s8823_s17 + $0x70] sm:$0xf0]  ;;  %v4051_v45 = vadd.f32 %v4050_v40, %v4037_v34 }
 0x2ed   : > { %4322 = vmatpush.bf16.msra.mxu2 %v6104_v41  ;;  %4295 = vmatpush.bf16.msra.mxu0 %v5560_v58  ;;  %v7823_v21 = vld [vmem:[%s8823_s17 + $0x254] sm:$0xf]  ;;  %v5496_v30 = vor.u32 %v7759_v18, %v5493_v19 }
 0x2ee   : > { %v5749_v24 = vld [vmem:[%s8823_s17 + $0x270] sm:$0xf0] }
 0x2ef   : > { %4336 = vmatpush.bf16.msra.mxu3 %v6360_v49  ;;  %4309 = vmatpush.bf16.msra.mxu1 %v5816_v63  ;;  %v7887_v25 = vld [vmem:[%s8823_s17 + $0x454] sm:$0xf]  ;;  %v5752_v35 = vor.u32 %v7823_v21, %v5749_v24  ;;  %v4064_v49 = vpop.f32.mrf.mxu3 }
 0x2f0   : > { %v6005_v26 = vld [vmem:[%s8823_s17 + $0x470] sm:$0xf0]  ;;  %v4065_v59 = vadd.f32 %v4064_v49, %v4051_v45 }
 0x2f1   : > { %4323 = vmatpush.bf16.msra.mxu2 %v6072_v0  ;;  %v7951_v28 = vld [vmem:[%s8823_s17 + $0x654] sm:$0xf]  ;;  %4296 = vmatpush.bf16.msra.mxu0 %v5528_v14  ;;  %v6008_v36 = vor.u32 %v7887_v25, %v6005_v26 }
 0x2f2   : > { %v6261_v29 = vld [vmem:[%s8823_s17 + $0x670] sm:$0xf0]  ;;  %v4637_v7 = vmax.f32 %v4065_v59, 0.0 }
 0x2f3   : > { %4337 = vmatpush.bf16.msra.mxu3 %v6328_v6  ;;  %v7751_v31 = vld [vmem:[%s8823_s17 + $0x14] sm:$0xf]  ;;  %4310 = vmatpush.bf16.msra.mxu1 %v5784_v15  ;;  %v6264_v39 = vor.u32 %v7951_v28, %v6261_v29 }
 0x2f4   : > { %v5461_v32 = vld [vmem:[%s8823_s17 + $0x30] sm:$0xf0]  ;;  %4653 = vst [vmem:[#allocation2 + $0x10] sm:$0xff] %v4637_v7 }
 0x2f5   : > { %v7815_v33 = vld [vmem:[%s8823_s17 + $0x214] sm:$0xf]  ;;  %4324 = vmatpush.bf16.msra.mxu2 %v6040_v17  ;;  %4297 = vmatpush.bf16.msra.mxu0 %v5496_v30  ;;  %v5464_v54 = vor.u32 %v7751_v31, %v5461_v32 }
 0x2f6   : > { %v5717_v37 = vld [vmem:[%s8823_s17 + $0x230] sm:$0xf0] }
 0x2f7   : > { %v7879_v38 = vld [vmem:[%s8823_s17 + $0x414] sm:$0xf]  ;;  %4338 = vmatpush.bf16.msra.mxu3 %v6296_v22  ;;  %4311 = vmatpush.bf16.msra.mxu1 %v5752_v35  ;;  %v5720_v60 = vor.u32 %v7815_v33, %v5717_v37 }
 0x2f8   : > { %v5973_v41 = vld [vmem:[%s8823_s17 + $0x430] sm:$0xf0] }
 0x2f9   : > { %v7943_v43 = vld [vmem:[%s8823_s17 + $0x614] sm:$0xf]  ;;  %4325 = vmatpush.bf16.msra.mxu2 %v6008_v36  ;;  %v5976_v63 = vor.u32 %v7879_v38, %v5973_v41  ;;  %4298 = vmatpush.bf16.msra.mxu0 %v5464_v54 }
 0x2fa   : > { %v6229_v44 = vld [vmem:[%s8823_s17 + $0x630] sm:$0xf0] }
 0x2fb   : > { %v8063_v51 = vld [vmem:[%s8823_s17 + $0x9d4] sm:$0xf]  ;;  %4339 = vmatpush.bf16.msra.mxu3 %v6264_v39  ;;  %v6232_v2 = vor.u32 %v7943_v43, %v6229_v44  ;;  %4312 = vmatpush.bf16.msra.mxu1 %v5720_v60 }
 0x2fc   : > { %v6709_v52 = vld [vmem:[%s8823_s17 + $0x9f0] sm:$0xf0]  ;;  %4299 = vmatmul.bf16.vlgmr.msra.gmra.mxu0 %v8953_v61 }
 0x2fd   : > { %v8127_v53 = vld [vmem:[%s8823_s17 + $0xbd4] sm:$0xf]  ;;  %v6712_v5 = vor.u32 %v8063_v51, %v6709_v52  ;;  %4326 = vmatpush.bf16.msra.mxu2 %v5976_v63 }
 0x2fe   : > { %v6965_v55 = vld [vmem:[%s8823_s17 + $0xbf0] sm:$0xf0]  ;;  %4313 = vmatmul.bf16.vlgmr.msra.gmra.mxu1 %v8965_v13 }
 0x2ff   : > { %v8191_v57 = vld [vmem:[%s8823_s17 + $0xdd4] sm:$0xf]  ;;  %v6968_v8 = vor.u32 %v8127_v53, %v6965_v55  ;;  %4340 = vmatpush.bf16.msra.mxu3 %v6232_v2  ;;  %4347 = vmatpush.bf16.msrb.mxu0 %v6712_v5 }
 0x300   : > { %v7221_v58 = vld [vmem:[%s8823_s17 + $0xdf0] sm:$0xf0]  ;;  %4327 = vmatmul.bf16.vlgmr.msra.gmra.mxu2 %v8958_v4 }
 0x301   : > { %v8255_v0 = vld [vmem:[%s8823_s17 + $0xfd4] sm:$0xf]  ;;  %v7224_v9 = vor.u32 %v8191_v57, %v7221_v58  ;;  %4361 = vmatpush.bf16.msrb.mxu1 %v6968_v8 }
 0x302   : > { %v7477_v1 = vld [vmem:[%s8823_s17 + $0xff0] sm:$0xf0]  ;;  %4341 = vmatmul.bf16.vlgmr.msra.gmra.mxu3 %v8970_v20 }
 0x303   : > { %v8055_v6 = vld [vmem:[%s8823_s17 + $0x994] sm:$0xf]  ;;  %v7480_v48 = vor.u32 %v8255_v0, %v7477_v1  ;;  %4375 = vmatpush.bf16.msrb.mxu2 %v7224_v9 }
 0x304   : > { %v6677_v10 = vld [vmem:[%s8823_s17 + $0x9b0] sm:$0xf0] }
 0x305   : > { %v8119_v11 = vld [vmem:[%s8823_s17 + $0xb94] sm:$0xf]  ;;  %v6680_v56 = vor.u32 %v8055_v6, %v6677_v10  ;;  %4389 = vmatpush.bf16.msrb.mxu3 %v7480_v48  ;;  %v1158_v48 = vperm.slane %v9564_v3, 3  ;;  %v6395_v3 = vld [vmem:[%s8823_s17 + $0x758] sm:$0xf] }
 0x306   : > { %v6933_v62 = vld [vmem:[%s8823_s17 + $0xbb0] sm:$0xf0] }
 0x307   : > { %v8183_v12 = vld [vmem:[%s8823_s17 + $0xd94] sm:$0xf]  ;;  %v6936_v17 = vor.u32 %v8119_v11, %v6933_v62  ;;  %4348 = vmatpush.bf16.msrb.mxu0 %v6680_v56 }
 0x308   : > { %v7189_v14 = vld [vmem:[%s8823_s17 + $0xdb0] sm:$0xf0] }
 0x309   : > { %v8247_v15 = vld [vmem:[%s8823_s17 + $0xf94] sm:$0xf]  ;;  %v7192_v18 = vor.u32 %v8183_v12, %v7189_v14  ;;  %4362 = vmatpush.bf16.msrb.mxu1 %v6936_v17  ;;  %v4076_v14 = vpop.f32.mrf.mxu0 }
 0x30a   : > { %v7445_v16 = vld [vmem:[%s8823_s17 + $0xfb0] sm:$0xf0] }
 0x30b   : > { %v8047_v19 = vld [vmem:[%s8823_s17 + $0x954] sm:$0xf]  ;;  %v7448_v23 = vor.u32 %v8247_v15, %v7445_v16  ;;  %4376 = vmatpush.bf16.msrb.mxu2 %v7192_v18 }
 0x30c   : > { %v6645_v21 = vld [vmem:[%s8823_s17 + $0x970] sm:$0xf0] }
 0x30d   : > { %v8111_v22 = vld [vmem:[%s8823_s17 + $0xb54] sm:$0xf]  ;;  %v6648_v29 = vor.u32 %v8047_v19, %v6645_v21  ;;  %4390 = vmatpush.bf16.msrb.mxu3 %v7448_v23 }
 0x30e   : > { %v6901_v24 = vld [vmem:[%s8823_s17 + $0xb70] sm:$0xf0] }
 0x30f   : > { %v8175_v25 = vld [vmem:[%s8823_s17 + $0xd54] sm:$0xf]  ;;  %v6904_v30 = vor.u32 %v8111_v22, %v6901_v24  ;;  %4349 = vmatpush.bf16.msrb.mxu0 %v6648_v29  ;;  %v4090_v22 = vpop.f32.mrf.mxu1 }
 0x310   : > { %v7157_v26 = vld [vmem:[%s8823_s17 + $0xd70] sm:$0xf0] }
 0x311   : > { %v8239_v27 = vld [vmem:[%s8823_s17 + $0xf54] sm:$0xf]  ;;  %v7160_v31 = vor.u32 %v8175_v25, %v7157_v26  ;;  %4363 = vmatpush.bf16.msrb.mxu1 %v6904_v30 }
 0x312   : > { %v7413_v28 = vld [vmem:[%s8823_s17 + $0xf70] sm:$0xf0] }
 0x313   : > { %v8039_v32 = vld [vmem:[%s8823_s17 + $0x914] sm:$0xf]  ;;  %v7416_v35 = vor.u32 %v8239_v27, %v7413_v28  ;;  %4377 = vmatpush.bf16.msrb.mxu2 %v7160_v31 }
 0x314   : > { %v6613_v33 = vld [vmem:[%s8823_s17 + $0x930] sm:$0xf0] }
 0x315   : > { %v8103_v34 = vld [vmem:[%s8823_s17 + $0xb14] sm:$0xf]  ;;  %v6616_v41 = vor.u32 %v8039_v32, %v6613_v33  ;;  %4391 = vmatpush.bf16.msrb.mxu3 %v7416_v35  ;;  %v4077_v33 = vadd.f32 %v4076_v14, %v1158_v48 }
 0x316   : > { %v6869_v36 = vld [vmem:[%s8823_s17 + $0xb30] sm:$0xf0] }
 0x317   : > { %v8167_v37 = vld [vmem:[%s8823_s17 + $0xd14] sm:$0xf]  ;;  %v6872_v43 = vor.u32 %v8103_v34, %v6869_v36  ;;  %4350 = vmatpush.bf16.msrb.mxu0 %v6616_v41 }
 0x318   : > { %v7125_v38 = vld [vmem:[%s8823_s17 + $0xd30] sm:$0xf0] }
 0x319   : > { %v8231_v39 = vld [vmem:[%s8823_s17 + $0xf14] sm:$0xf]  ;;  %v7128_v44 = vor.u32 %v8167_v37, %v7125_v38  ;;  %4364 = vmatpush.bf16.msrb.mxu1 %v6872_v43  ;;  %v5691_v38 = vld [vmem:[%s8823_s17 + $0x1d8] sm:$0xf] }
 0x31a   : > { %v7381_v40 = vld [vmem:[%s8823_s17 + $0xf30] sm:$0xf0]  ;;  %v7876_v43 = vld [vmem:[%s8823_s17 + $0x3f4] sm:$0xf0] }
 0x31b   : > { %v8031_v45 = vld [vmem:[%s8823_s17 + $0x8d4] sm:$0xf]  ;;  %v7384_v52 = vor.u32 %v8231_v39, %v7381_v40  ;;  %4378 = vmatpush.bf16.msrb.mxu2 %v7128_v44  ;;  %v7812_v39 = vld [vmem:[%s8823_s17 + $0x1f4] sm:$0xf0] }
 0x31c   : > { %v6581_v49 = vld [vmem:[%s8823_s17 + $0x8f0] sm:$0xf0]  ;;  %v5947_v40 = vld [vmem:[%s8823_s17 + $0x3d8] sm:$0xf] }
 0x31d   : > { %v8095_v51 = vld [vmem:[%s8823_s17 + $0xad4] sm:$0xf]  ;;  %v6584_v59 = vor.u32 %v8031_v45, %v6581_v49  ;;  %4392 = vmatpush.bf16.msrb.mxu3 %v7384_v52  ;;  %v6203_v44 = vld [vmem:[%s8823_s17 + $0x5d8] sm:$0xf]  ;;  %v4104_v49 = vpop.f32.mrf.mxu2 }
 0x31e   : > { %v6837_v53 = vld [vmem:[%s8823_s17 + $0xaf0] sm:$0xf0]  ;;  %v7940_v45 = vld [vmem:[%s8823_s17 + $0x5f4] sm:$0xf0] }
 0x31f   : > { %v8159_v54 = vld [vmem:[%s8823_s17 + $0xcd4] sm:$0xf]  ;;  %v6840_v60 = vor.u32 %v8095_v51, %v6837_v53  ;;  %4351 = vmatpush.bf16.msrb.mxu0 %v6584_v59  ;;  %v6459_v53 = vld [vmem:[%s8823_s17 + $0x7d8] sm:$0xf]  ;;  %v5692_v59 = vor.u32 %v7812_v39, %v5691_v38 }
 0x320   : > { %v7093_v55 = vld [vmem:[%s8823_s17 + $0xcf0] sm:$0xf0]  ;;  %v7916_v38 = vld [vmem:[%s8823_s17 + $0x534] sm:$0xf0] }
 0x321   : > { %v8223_v57 = vld [vmem:[%s8823_s17 + $0xed4] sm:$0xf]  ;;  %v7096_v63 = vor.u32 %v8159_v54, %v7093_v55  ;;  %4365 = vmatpush.bf16.msrb.mxu1 %v6840_v60  ;;  %v8004_v54 = vld [vmem:[%s8823_s17 + $0x7f4] sm:$0xf0]  ;;  %v4118_v55 = vpop.f32.mrf.mxu3  ;;  %v5948_v60 = vor.u32 %v7876_v43, %v5947_v40 }
 0x322   : > { %v7349_v58 = vld [vmem:[%s8823_s17 + $0xef0] sm:$0xf0]  ;;  %v6363_v40 = vld [vmem:[%s8823_s17 + $0x718] sm:$0xf] }
 0x323   : > { %v8023_v0 = vld [vmem:[%s8823_s17 + $0x894] sm:$0xf]  ;;  %v7352_v5 = vor.u32 %v8223_v57, %v7349_v58  ;;  %4379 = vmatpush.bf16.msrb.mxu2 %v7096_v63  ;;  %v4091_v57 = vadd.f32 %v4090_v22, %v4077_v33  ;;  %v6204_v63 = vor.u32 %v7940_v45, %v6203_v44  ;;  %v7860_v22 = vld [vmem:[%s8823_s17 + $0x374] sm:$0xf0] }
 0x324   : > { %v6549_v1 = vld [vmem:[%s8823_s17 + $0x8b0] sm:$0xf0]  ;;  %v7788_v33 = vld [vmem:[%s8823_s17 + $0x134] sm:$0xf0] }
 0x325   : > { %v8087_v2 = vld [vmem:[%s8823_s17 + $0xa94] sm:$0xf]  ;;  %v6552_v11 = vor.u32 %v8023_v0, %v6549_v1  ;;  %4393 = vmatpush.bf16.msrb.mxu3 %v7352_v5  ;;  %v4078_v0 = vpop.f32.mrf.mxu0  ;;  %v5659_v1 = vld [vmem:[%s8823_s17 + $0x198] sm:$0xf] }
 0x326   : > { %v6805_v6 = vld [vmem:[%s8823_s17 + $0xab0] sm:$0xf0]  ;;  %v5915_v5 = vld [vmem:[%s8823_s17 + $0x398] sm:$0xf] }
 0x327   : > { %v8151_v7 = vld [vmem:[%s8823_s17 + $0xc94] sm:$0xf]  ;;  %v6808_v62 = vor.u32 %v8087_v2, %v6805_v6  ;;  %4352 = vmatpush.bf16.msrb.mxu0 %v6552_v11  ;;  %v7804_v2 = vld [vmem:[%s8823_s17 + $0x1b4] sm:$0xf0]  ;;  %v6460_v6 = vor.u32 %v8004_v54, %v6459_v53 }
 0x328   : > { %v7061_v8 = vld [vmem:[%s8823_s17 + $0xcb0] sm:$0xf0]  ;;  %v6427_v11 = vld [vmem:[%s8823_s17 + $0x798] sm:$0xf]  ;;  %v5660_v14 = vor.u32 %v7804_v2, %v5659_v1 }
 0x329   : > { %v8215_v9 = vld [vmem:[%s8823_s17 + $0xe94] sm:$0xf]  ;;  %v7064_v12 = vor.u32 %v8151_v7, %v7061_v8  ;;  %4366 = vmatpush.bf16.msrb.mxu1 %v6808_v62  ;;  %v7868_v7 = vld [vmem:[%s8823_s17 + $0x3b4] sm:$0xf0] }
 0x32a   : > { %v7317_v10 = vld [vmem:[%s8823_s17 + $0xeb0] sm:$0xf0]  ;;  %v6171_v8 = vld [vmem:[%s8823_s17 + $0x598] sm:$0xf] }
 0x32b   : > { %v8015_v15 = vld [vmem:[%s8823_s17 + $0x854] sm:$0xf]  ;;  %v7320_v17 = vor.u32 %v8215_v9, %v7317_v10  ;;  %4380 = vmatpush.bf16.msrb.mxu2 %v7064_v12  ;;  %v7932_v9 = vld [vmem:[%s8823_s17 + $0x5b4] sm:$0xf0]  ;;  %v4092_v10 = vpop.f32.mrf.mxu1  ;;  %v4105_v12 = vadd.f32 %v4104_v49, %v4091_v57 }
 0x32c   : > { %v6517_v16 = vld [vmem:[%s8823_s17 + $0x870] sm:$0xf0]  ;;  %v7996_v62 = vld [vmem:[%s8823_s17 + $0x7b4] sm:$0xf0] }
 0x32d   : > { %v8079_v56 = vld [vmem:[%s8823_s17 + $0xa54] sm:$0xf]  ;;  %v6520_v25 = vor.u32 %v8015_v15, %v6517_v16  ;;  %4394 = vmatpush.bf16.msrb.mxu3 %v7320_v17  ;;  %v4079_v15 = vadd.f32 %v4078_v0, %v1158_v48  ;;  %v5916_v16 = vor.u32 %v7868_v7, %v5915_v5  ;;  %v5627_v17 = vld [vmem:[%s8823_s17 + $0x158] sm:$0xf]  ;;  %v4132_v39 = vpop.f32.mrf.mxu0 }
 0x32e   : > { %v6773_v18 = vld [vmem:[%s8823_s17 + $0xa70] sm:$0xf0]  ;;  %v7988_v48 = vld [vmem:[%s8823_s17 + $0x774] sm:$0xf0] }
 0x32f   : > { %v8143_v19 = vld [vmem:[%s8823_s17 + $0xc54] sm:$0xf]  ;;  %v6776_v28 = vor.u32 %v8079_v56, %v6773_v18  ;;  %4353 = vmatpush.bf16.msrb.mxu0 %v6520_v25  ;;  %v6172_v56 = vor.u32 %v7932_v9, %v6171_v8  ;;  %v7796_v18 = vld [vmem:[%s8823_s17 + $0x174] sm:$0xf0]  ;;  %v4119_v25 = vadd.f32 %v4118_v55, %v4105_v12 }
 0x330   : > { %v7029_v21 = vld [vmem:[%s8823_s17 + $0xc70] sm:$0xf0]  ;;  %v5563_v53 = vld [vmem:[%s8823_s17 + $0xd8] sm:$0xf] }
 0x331   : > { %v8207_v23 = vld [vmem:[%s8823_s17 + $0xe54] sm:$0xf]  ;;  %v7032_v29 = vor.u32 %v8143_v19, %v7029_v21  ;;  %4367 = vmatpush.bf16.msrb.mxu1 %v6776_v28  ;;  %v5883_v19 = vld [vmem:[%s8823_s17 + $0x358] sm:$0xf]  ;;  %v6428_v21 = vor.u32 %v7996_v62, %v6427_v11  ;;  %v4093_v28 = vadd.f32 %v4092_v10, %v4079_v15  ;;  %v4133_v43 = vadd.f32 %v4132_v39, %v4119_v25 }
 0x332   : > { %v7285_v24 = vld [vmem:[%s8823_s17 + $0xe70] sm:$0xf0]  ;;  %v7780_v54 = vld [vmem:[%s8823_s17 + $0xf4] sm:$0xf0] }
 0x333   : > { %v8007_v26 = vld [vmem:[%s8823_s17 + $0x814] sm:$0xf]  ;;  %v7288_v34 = vor.u32 %v8207_v23, %v7285_v24  ;;  %4381 = vmatpush.bf16.msrb.mxu2 %v7032_v29  ;;  %v6139_v23 = vld [vmem:[%s8823_s17 + $0x558] sm:$0xf]  ;;  %v5884_v29 = vor.u32 %v7860_v22, %v5883_v19  ;;  %v4146_v45 = vpop.f32.mrf.mxu1  ;;  %v5564_v2 = vor.u32 %v7780_v54, %v5563_v53 }
 0x334   : > { %v6485_v27 = vld [vmem:[%s8823_s17 + $0x830] sm:$0xf0]  ;;  %v7924_v24 = vld [vmem:[%s8823_s17 + $0x574] sm:$0xf0] }
 0x335   : > { %v8071_v30 = vld [vmem:[%s8823_s17 + $0xa14] sm:$0xf]  ;;  %v6488_v41 = vor.u32 %v8007_v26, %v6485_v27  ;;  %4395 = vmatpush.bf16.msrb.mxu3 %v7288_v34  ;;  %v5628_v26 = vor.u32 %v7796_v18, %v5627_v17  ;;  %v4106_v27 = vpop.f32.mrf.mxu2  ;;  %v5851_v34 = vld [vmem:[%s8823_s17 + $0x318] sm:$0xf] }
 0x336   : > { %v6741_v31 = vld [vmem:[%s8823_s17 + $0xa30] sm:$0xf0]  ;;  %v4107_v49 = vadd.f32 %v4106_v27, %v4093_v28  ;;  %v5819_v55 = vld [vmem:[%s8823_s17 + $0x2d8] sm:$0xf] }
 0x337   : > { %v8135_v32 = vld [vmem:[%s8823_s17 + $0xc14] sm:$0xf]  ;;  %v6744_v51 = vor.u32 %v8071_v30, %v6741_v31  ;;  %4354 = vmatpush.bf16.msrb.mxu0 %v6488_v41  ;;  %v6140_v30 = vor.u32 %v7924_v24, %v6139_v23  ;;  %v4120_v31 = vpop.f32.mrf.mxu3  ;;  %v7980_v41 = vld [vmem:[%s8823_s17 + $0x734] sm:$0xf0] }
 0x338   : > { %v6997_v35 = vld [vmem:[%s8823_s17 + $0xc30] sm:$0xf0]  ;;  %v6364_v57 = vor.u32 %v7980_v41, %v6363_v40  ;;  %v6331_v0 = vld [vmem:[%s8823_s17 + $0x6d8] sm:$0xf] }
 0x339   : > { %v8199_v36 = vld [vmem:[%s8823_s17 + $0xe14] sm:$0xf]  ;;  %v7000_v52 = vor.u32 %v8135_v32, %v6997_v35  ;;  %4368 = vmatpush.bf16.msrb.mxu1 %v6744_v51  ;;  %v5595_v32 = vld [vmem:[%s8823_s17 + $0x118] sm:$0xf]  ;;  %v6396_v35 = vor.u32 %v7988_v48, %v6395_v3 }
 0x33a   : > { %v7253_v37 = vld [vmem:[%s8823_s17 + $0xe30] sm:$0xf0]  ;;  %4355 = vmatmul.bf16.vlgmr.msrb.gmra.mxu0 %v9022_v42  ;;  %v5596_v44 = vor.u32 %v7788_v33, %v5595_v32  ;;  %v7972_v1 = vld [vmem:[%s8823_s17 + $0x6f4] sm:$0xf0] }
 0x33b   : > { %v7256_v58 = vor.u32 %v8199_v36, %v7253_v37  ;;  %4382 = vmatpush.bf16.msrb.mxu2 %v7000_v52  ;;  %4403 = vmatpush.bf16.msra.mxu0 %v5692_v59  ;;  %v7852_v36 = vld [vmem:[%s8823_s17 + $0x334] sm:$0xf0]  ;;  %v6332_v62 = vor.u32 %v7972_v1, %v6331_v0  ;;  %v4148_v28 = vpop.f32.mrf.mxu1 }
 0x33c   : > { %4369 = vmatmul.bf16.vlgmr.msrb.gmra.mxu1 %v9029_v47  ;;  %v6107_v37 = vld [vmem:[%s8823_s17 + $0x518] sm:$0xf]  ;;  %v5852_v51 = vor.u32 %v7852_v36, %v5851_v34 }
 0x33d   : > { %4396 = vmatpush.bf16.msrb.mxu3 %v7256_v58  ;;  %4417 = vmatpush.bf16.msra.mxu1 %v5948_v60  ;;  %v6108_v52 = vor.u32 %v7916_v38, %v6107_v37  ;;  %v7844_v58 = vld [vmem:[%s8823_s17 + $0x2f4] sm:$0xf0]  ;;  %v4160_v12 = vpop.f32.mrf.mxu2 }
 0x33e   : > { %4383 = vmatmul.bf16.vlgmr.msrb.gmra.mxu2 %v9027_v46  ;;  %v6075_v59 = vld [vmem:[%s8823_s17 + $0x4d8] sm:$0xf]  ;;  %v5820_v7 = vor.u32 %v7844_v58, %v5819_v55 }
 0x33f   : > { %4431 = vmatpush.bf16.msra.mxu2 %v6204_v63  ;;  %4404 = vmatpush.bf16.msra.mxu0 %v5660_v14  ;;  %v7908_v60 = vld [vmem:[%s8823_s17 + $0x4f4] sm:$0xf0]  ;;  %v4147_v63 = vadd.f32 %v4146_v45, %v4133_v43  ;;  %v4174_v17 = vpop.f32.mrf.mxu3 }
 0x340   : > { %4397 = vmatmul.bf16.vlgmr.msrb.gmra.mxu3 %v9033_v50  ;;  %v5531_v5 = vld [vmem:[%s8823_s17 + $0x98] sm:$0xf]  ;;  %v6076_v8 = vor.u32 %v7908_v60, %v6075_v59 }
 0x341   : > { %4445 = vmatpush.bf16.msra.mxu3 %v6460_v6  ;;  %4418 = vmatpush.bf16.msra.mxu1 %v5916_v16  ;;  %v4121_v6 = vadd.f32 %v4120_v31, %v4107_v49  ;;  %v7772_v9 = vld [vmem:[%s8823_s17 + $0xb4] sm:$0xf0]  ;;  %v4161_v16 = vadd.f32 %v4160_v12, %v4147_v63 }
 0x342   : > { %v5787_v10 = vld [vmem:[%s8823_s17 + $0x298] sm:$0xf] }
 0x343   : > { %4432 = vmatpush.bf16.msra.mxu2 %v6172_v56  ;;  %4405 = vmatpush.bf16.msra.mxu0 %v5628_v26  ;;  %v7836_v11 = vld [vmem:[%s8823_s17 + $0x2b4] sm:$0xf0]  ;;  %v4134_v56 = vpop.f32.mrf.mxu0  ;;  %v4175_v24 = vadd.f32 %v4174_v17, %v4161_v16 }
 0x344   : > { %v6043_v14 = vld [vmem:[%s8823_s17 + $0x498] sm:$0xf]  ;;  %v5788_v22 = vor.u32 %v7836_v11, %v5787_v10  ;;  %v4135_v23 = vadd.f32 %v4134_v56, %v4121_v6 }
 0x345   : > { %4446 = vmatpush.bf16.msra.mxu3 %v6428_v21  ;;  %4419 = vmatpush.bf16.msra.mxu1 %v5884_v29  ;;  %v7900_v15 = vld [vmem:[%s8823_s17 + $0x4b4] sm:$0xf0]  ;;  %v5532_v21 = vor.u32 %v7772_v9, %v5531_v5  ;;  %v4630_v32 = vmax.f32 %v4175_v24, 0.0  ;;  %v4162_v49 = vpop.f32.mrf.mxu2 }
 0x346   : > { %v6299_v18 = vld [vmem:[%s8823_s17 + $0x698] sm:$0xf]  ;;  %v6044_v3 = vor.u32 %v7900_v15, %v6043_v14  ;;  %v4149_v39 = vadd.f32 %v4148_v28, %v4135_v23 }
 0x347   : > { %4433 = vmatpush.bf16.msra.mxu2 %v6140_v30  ;;  %4406 = vmatpush.bf16.msra.mxu0 %v5596_v44  ;;  %v7964_v19 = vld [vmem:[%s8823_s17 + $0x6b4] sm:$0xf0]  ;;  %4646 = vst [vmem:[#allocation2 + $0x18] sm:$0xff] %v4630_v32  ;;  %v4176_v55 = vpop.f32.mrf.mxu3 }
 0x348   : > { %v5499_v48 = vld [vmem:[%s8823_s17 + $0x58] sm:$0xf]  ;;  %v6300_v27 = vor.u32 %v7964_v19, %v6299_v18  ;;  %v4163_v54 = vadd.f32 %v4162_v49, %v4149_v39 }
 0x349   : > { %4447 = vmatpush.bf16.msra.mxu3 %v6396_v35  ;;  %4420 = vmatpush.bf16.msra.mxu1 %v5852_v51  ;;  %v7764_v25 = vld [vmem:[%s8823_s17 + $0x74] sm:$0xf0] }
 0x34a   : > { %v5755_v26 = vld [vmem:[%s8823_s17 + $0x258] sm:$0xf]  ;;  %v5500_v35 = vor.u32 %v7764_v25, %v5499_v48 }
 0x34b   : > { %4434 = vmatpush.bf16.msra.mxu2 %v6108_v52  ;;  %4407 = vmatpush.bf16.msra.mxu0 %v5564_v2  ;;  %v7828_v29 = vld [vmem:[%s8823_s17 + $0x274] sm:$0xf0]  ;;  %v4177_v2 = vadd.f32 %v4176_v55, %v4163_v54 }
 0x34c   : > { %v6011_v30 = vld [vmem:[%s8823_s17 + $0x458] sm:$0xf]  ;;  %v5756_v40 = vor.u32 %v7828_v29, %v5755_v26 }
 0x34d   : > { %4448 = vmatpush.bf16.msra.mxu3 %v6364_v57  ;;  %4421 = vmatpush.bf16.msra.mxu1 %v5820_v7  ;;  %v7892_v31 = vld [vmem:[%s8823_s17 + $0x474] sm:$0xf0] }
 0x34e   : > { %v6267_v33 = vld [vmem:[%s8823_s17 + $0x658] sm:$0xf]  ;;  %v6012_v41 = vor.u32 %v7892_v31, %v6011_v30 }
 0x34f   : > { %4435 = vmatpush.bf16.msra.mxu2 %v6076_v8  ;;  %v7956_v34 = vld [vmem:[%s8823_s17 + $0x674] sm:$0xf0]  ;;  %4408 = vmatpush.bf16.msra.mxu0 %v5532_v21 }
 0x350   : > { %v5467_v36 = vld [vmem:[%s8823_s17 + $0x18] sm:$0xf]  ;;  %v6268_v45 = vor.u32 %v7956_v34, %v6267_v33 }
 0x351   : > { %4449 = vmatpush.bf16.msra.mxu3 %v6332_v62  ;;  %v7756_v37 = vld [vmem:[%s8823_s17 + $0x34] sm:$0xf0]  ;;  %4422 = vmatpush.bf16.msra.mxu1 %v5788_v22  ;;  %v4638_v62 = vmax.f32 %v4177_v2, 0.0 }
 0x352   : > { %v5723_v38 = vld [vmem:[%s8823_s17 + $0x218] sm:$0xf]  ;;  %v5468_v60 = vor.u32 %v7756_v37, %v5467_v36 }
 0x353   : > { %4436 = vmatpush.bf16.msra.mxu2 %v6044_v3  ;;  %v7820_v43 = vld [vmem:[%s8823_s17 + $0x234] sm:$0xf0]  ;;  %4409 = vmatpush.bf16.msra.mxu0 %v5500_v35  ;;  %4654 = vst [vmem:[#allocation2 + $0x38] sm:$0xff] %v4638_v62 }
 0x354   : > { %v5979_v44 = vld [vmem:[%s8823_s17 + $0x418] sm:$0xf]  ;;  %v5724_v5 = vor.u32 %v7820_v43, %v5723_v38 }
 0x355   : > { %4450 = vmatpush.bf16.msra.mxu3 %v6300_v27  ;;  %v7884_v51 = vld [vmem:[%s8823_s17 + $0x434] sm:$0xf0]  ;;  %4423 = vmatpush.bf16.msra.mxu1 %v5756_v40 }
 0x356   : > { %v6235_v52 = vld [vmem:[%s8823_s17 + $0x618] sm:$0xf]  ;;  %v5980_v6 = vor.u32 %v7884_v51, %v5979_v44 }
 0x357   : > { %v7948_v53 = vld [vmem:[%s8823_s17 + $0x634] sm:$0xf0]  ;;  %4437 = vmatpush.bf16.msra.mxu2 %v6012_v41  ;;  %4410 = vmatpush.bf16.msra.mxu0 %v5468_v60 }
 0x358   : > { %v6715_v57 = vld [vmem:[%s8823_s17 + $0x9d8] sm:$0xf]  ;;  %v6236_v9 = vor.u32 %v7948_v53, %v6235_v52 }
 0x359   : > { %v8068_v58 = vld [vmem:[%s8823_s17 + $0x9f4] sm:$0xf0]  ;;  %4451 = vmatpush.bf16.msra.mxu3 %v6268_v45  ;;  %4424 = vmatpush.bf16.msra.mxu1 %v5724_v5 }
 0x35a   : > { %v6971_v59 = vld [vmem:[%s8823_s17 + $0xbd8] sm:$0xf]  ;;  %v6716_v10 = vor.u32 %v8068_v58, %v6715_v57  ;;  %4411 = vmatmul.bf16.vlgmr.msra.gmra.mxu0 %v8953_v61 }
 0x35b   : > { %v8132_v63 = vld [vmem:[%s8823_s17 + $0xbf4] sm:$0xf0]  ;;  %4438 = vmatpush.bf16.msra.mxu2 %v5980_v6 }
 0x35c   : > { %v7227_v0 = vld [vmem:[%s8823_s17 + $0xdd8] sm:$0xf]  ;;  %v6972_v12 = vor.u32 %v8132_v63, %v6971_v59  ;;  %4459 = vmatpush.bf16.msrb.mxu0 %v6716_v10  ;;  %4425 = vmatmul.bf16.vlgmr.msra.gmra.mxu1 %v8965_v13 }
 0x35d   : > { %v8196_v1 = vld [vmem:[%s8823_s17 + $0xdf4] sm:$0xf0]  ;;  %4452 = vmatpush.bf16.msra.mxu3 %v6236_v9 }
 0x35e   : > { %v7483_v7 = vld [vmem:[%s8823_s17 + $0xfd8] sm:$0xf]  ;;  %v7228_v14 = vor.u32 %v8196_v1, %v7227_v0  ;;  %4473 = vmatpush.bf16.msrb.mxu1 %v6972_v12  ;;  %4439 = vmatmul.bf16.vlgmr.msra.gmra.mxu2 %v8958_v4 }
 0x35f   : > { %v8260_v8 = vld [vmem:[%s8823_s17 + $0xff4] sm:$0xf0] }
 0x360   : > { %v6683_v11 = vld [vmem:[%s8823_s17 + $0x998] sm:$0xf]  ;;  %v7484_v56 = vor.u32 %v8260_v8, %v7483_v7  ;;  %4487 = vmatpush.bf16.msrb.mxu2 %v7228_v14  ;;  %4453 = vmatmul.bf16.vlgmr.msra.gmra.mxu3 %v8970_v20 }
 0x361   : > { %v8060_v15 = vld [vmem:[%s8823_s17 + $0x9b4] sm:$0xf0] }
 0x362   : > { %v6939_v16 = vld [vmem:[%s8823_s17 + $0xb98] sm:$0xf]  ;;  %v6684_v23 = vor.u32 %v8060_v15, %v6683_v11  ;;  %4501 = vmatpush.bf16.msrb.mxu3 %v7484_v56 }
 0x363   : > { %v8124_v17 = vld [vmem:[%s8823_s17 + $0xbb4] sm:$0xf0] }
 0x364   : > { %v7195_v18 = vld [vmem:[%s8823_s17 + $0xd98] sm:$0xf]  ;;  %v6940_v24 = vor.u32 %v8124_v17, %v6939_v16  ;;  %4460 = vmatpush.bf16.msrb.mxu0 %v6684_v23 }
 0x365   : > { %v8188_v19 = vld [vmem:[%s8823_s17 + $0xdb4] sm:$0xf0] }
 0x366   : > { %v7451_v21 = vld [vmem:[%s8823_s17 + $0xf98] sm:$0xf]  ;;  %v7196_v3 = vor.u32 %v8188_v19, %v7195_v18  ;;  %4474 = vmatpush.bf16.msrb.mxu1 %v6940_v24  ;;  %v4188_v19 = vpop.f32.mrf.mxu0 }
 0x367   : > { %v8252_v22 = vld [vmem:[%s8823_s17 + $0xfb4] sm:$0xf0] }
 0x368   : > { %v6651_v48 = vld [vmem:[%s8823_s17 + $0x958] sm:$0xf]  ;;  %v7452_v27 = vor.u32 %v8252_v22, %v7451_v21  ;;  %4488 = vmatpush.bf16.msrb.mxu2 %v7196_v3 }
 0x369   : > { %v8052_v25 = vld [vmem:[%s8823_s17 + $0x974] sm:$0xf0] }
 0x36a   : > { %v6907_v26 = vld [vmem:[%s8823_s17 + $0xb58] sm:$0xf]  ;;  %v6652_v33 = vor.u32 %v8052_v25, %v6651_v48  ;;  %4502 = vmatpush.bf16.msrb.mxu3 %v7452_v27 }
 0x36b   : > { %v8116_v28 = vld [vmem:[%s8823_s17 + $0xb74] sm:$0xf0] }
 0x36c   : > { %v7163_v29 = vld [vmem:[%s8823_s17 + $0xd58] sm:$0xf]  ;;  %v6908_v34 = vor.u32 %v8116_v28, %v6907_v26  ;;  %4461 = vmatpush.bf16.msrb.mxu0 %v6652_v33  ;;  %v4202_v26 = vpop.f32.mrf.mxu1 }
 0x36d   : > { %v8180_v30 = vld [vmem:[%s8823_s17 + $0xd74] sm:$0xf0] }
 0x36e   : > { %v7419_v31 = vld [vmem:[%s8823_s17 + $0xf58] sm:$0xf]  ;;  %v7164_v35 = vor.u32 %v8180_v30, %v7163_v29  ;;  %4475 = vmatpush.bf16.msrb.mxu1 %v6908_v34 }
 0x36f   : > { %v8244_v32 = vld [vmem:[%s8823_s17 + $0xf74] sm:$0xf0] }
 0x370   : > { %v6619_v36 = vld [vmem:[%s8823_s17 + $0x918] sm:$0xf]  ;;  %v7420_v39 = vor.u32 %v8244_v32, %v7419_v31  ;;  %4489 = vmatpush.bf16.msrb.mxu2 %v7164_v35 }
 0x371   : > { %v8044_v37 = vld [vmem:[%s8823_s17 + $0x934] sm:$0xf0] }
 0x372   : > { %v6875_v38 = vld [vmem:[%s8823_s17 + $0xb18] sm:$0xf]  ;;  %v6620_v49 = vor.u32 %v8044_v37, %v6619_v36  ;;  %4503 = vmatpush.bf16.msrb.mxu3 %v7420_v39 }
 0x373   : > { %v8108_v40 = vld [vmem:[%s8823_s17 + $0xb34] sm:$0xf0] }
 0x374   : > { %v7131_v41 = vld [vmem:[%s8823_s17 + $0xd18] sm:$0xf]  ;;  %v6876_v51 = vor.u32 %v8108_v40, %v6875_v38  ;;  %4462 = vmatpush.bf16.msrb.mxu0 %v6620_v49 }
 0x375   : > { %v8172_v43 = vld [vmem:[%s8823_s17 + $0xd34] sm:$0xf0] }
 0x376   : > { %v7387_v44 = vld [vmem:[%s8823_s17 + $0xf18] sm:$0xf]  ;;  %v7132_v52 = vor.u32 %v8172_v43, %v7131_v41  ;;  %4476 = vmatpush.bf16.msrb.mxu1 %v6876_v51  ;;  %v7808_v43 = vld [vmem:[%s8823_s17 + $0x1dc] sm:$0xf] }
 0x377   : > { %v8236_v45 = vld [vmem:[%s8823_s17 + $0xf34] sm:$0xf0]  ;;  %v5949_v51 = vld [vmem:[%s8823_s17 + $0x3f8] sm:$0xf0] }
 0x378   : > { %v6587_v53 = vld [vmem:[%s8823_s17 + $0x8d8] sm:$0xf]  ;;  %v7388_v57 = vor.u32 %v8236_v45, %v7387_v44  ;;  %4490 = vmatpush.bf16.msrb.mxu2 %v7132_v52  ;;  %v5693_v44 = vld [vmem:[%s8823_s17 + $0x1f8] sm:$0xf0] }
 0x379   : > { %v8036_v54 = vld [vmem:[%s8823_s17 + $0x8f4] sm:$0xf0]  ;;  %v7872_v45 = vld [vmem:[%s8823_s17 + $0x3dc] sm:$0xf] }
 0x37a   : > { %v6843_v55 = vld [vmem:[%s8823_s17 + $0xad8] sm:$0xf]  ;;  %v6588_v1 = vor.u32 %v8036_v54, %v6587_v53  ;;  %4504 = vmatpush.bf16.msrb.mxu3 %v7388_v57  ;;  %v7936_v52 = vld [vmem:[%s8823_s17 + $0x5dc] sm:$0xf]  ;;  %v4216_v54 = vpop.f32.mrf.mxu2 }
 0x37b   : > { %v8100_v58 = vld [vmem:[%s8823_s17 + $0xaf4] sm:$0xf0]  ;;  %v6205_v53 = vld [vmem:[%s8823_s17 + $0x5f8] sm:$0xf0] }
 0x37c   : > { %v7099_v59 = vld [vmem:[%s8823_s17 + $0xcd8] sm:$0xf]  ;;  %v6844_v2 = vor.u32 %v8100_v58, %v6843_v55  ;;  %4463 = vmatpush.bf16.msrb.mxu0 %v6588_v1  ;;  %v8000_v58 = vld [vmem:[%s8823_s17 + $0x7dc] sm:$0xf]  ;;  %v5696_v1 = vor.u32 %v7808_v43, %v5693_v44 }
 0x37d   : > { %v8164_v60 = vld [vmem:[%s8823_s17 + $0xcf4] sm:$0xf0]  ;;  %v7912_v43 = vld [vmem:[%s8823_s17 + $0x51c] sm:$0xf] }
 0x37e   : > { %v7355_v63 = vld [vmem:[%s8823_s17 + $0xed8] sm:$0xf]  ;;  %v7100_v5 = vor.u32 %v8164_v60, %v7099_v59  ;;  %4477 = vmatpush.bf16.msrb.mxu1 %v6844_v2  ;;  %v6461_v59 = vld [vmem:[%s8823_s17 + $0x7f8] sm:$0xf0]  ;;  %v4230_v60 = vpop.f32.mrf.mxu3  ;;  %v5952_v2 = vor.u32 %v7872_v45, %v5949_v51 }
 0x37f   : > { %v8228_v0 = vld [vmem:[%s8823_s17 + $0xef4] sm:$0xf0]  ;;  %v6109_v44 = vld [vmem:[%s8823_s17 + $0x538] sm:$0xf0] }
 0x380   : > { %v6555_v6 = vld [vmem:[%s8823_s17 + $0x898] sm:$0xf]  ;;  %v7356_v9 = vor.u32 %v8228_v0, %v7355_v63  ;;  %4491 = vmatpush.bf16.msrb.mxu2 %v7100_v5  ;;  %v6208_v5 = vor.u32 %v7936_v52, %v6205_v53  ;;  %v6365_v51 = vld [vmem:[%s8823_s17 + $0x738] sm:$0xf0] }
 0x381   : > { %v8028_v7 = vld [vmem:[%s8823_s17 + $0x8b4] sm:$0xf0] }
 0x382   : > { %v6811_v8 = vld [vmem:[%s8823_s17 + $0xa98] sm:$0xf]  ;;  %v6556_v15 = vor.u32 %v8028_v7, %v6555_v6  ;;  %4505 = vmatpush.bf16.msrb.mxu3 %v7356_v9  ;;  %v4190_v6 = vpop.f32.mrf.mxu0  ;;  %v7800_v7 = vld [vmem:[%s8823_s17 + $0x19c] sm:$0xf] }
 0x383   : > { %v8092_v10 = vld [vmem:[%s8823_s17 + $0xab4] sm:$0xf0]  ;;  %v7864_v9 = vld [vmem:[%s8823_s17 + $0x39c] sm:$0xf] }
 0x384   : > { %v7067_v11 = vld [vmem:[%s8823_s17 + $0xc98] sm:$0xf]  ;;  %v6812_v17 = vor.u32 %v8092_v10, %v6811_v8  ;;  %4464 = vmatpush.bf16.msrb.mxu0 %v6556_v15  ;;  %v5661_v8 = vld [vmem:[%s8823_s17 + $0x1b8] sm:$0xf0]  ;;  %v6464_v10 = vor.u32 %v8000_v58, %v6461_v59  ;;  %v6112_v58 = vor.u32 %v7912_v43, %v6109_v44 }
 0x385   : > { %v8156_v62 = vld [vmem:[%s8823_s17 + $0xcb4] sm:$0xf0]  ;;  %v7992_v15 = vld [vmem:[%s8823_s17 + $0x79c] sm:$0xf] }
 0x386   : > { %v7323_v12 = vld [vmem:[%s8823_s17 + $0xe98] sm:$0xf]  ;;  %v7068_v18 = vor.u32 %v8156_v62, %v7067_v11  ;;  %4478 = vmatpush.bf16.msrb.mxu1 %v6812_v17  ;;  %v5917_v11 = vld [vmem:[%s8823_s17 + $0x3b8] sm:$0xf0] }
 0x387   : > { %v8220_v14 = vld [vmem:[%s8823_s17 + $0xeb4] sm:$0xf0]  ;;  %v7928_v62 = vld [vmem:[%s8823_s17 + $0x59c] sm:$0xf] }
 0x388   : > { %v9849_v16 = vld [vmem:[%s9274_s23] sm:$0xff]  ;;  %v7324_v24 = vor.u32 %v8220_v14, %v7323_v12  ;;  %4492 = vmatpush.bf16.msrb.mxu2 %v7068_v18  ;;  %v4204_v14 = vpop.f32.mrf.mxu1 }
 0x389   : > { %v1159_v56 = vperm.slane %v9849_v16, 4  ;;  %v6523_v21 = vld [vmem:[%s8823_s17 + $0x858] sm:$0xf]  ;;  %v6173_v12 = vld [vmem:[%s8823_s17 + $0x5b8] sm:$0xf0] }
 0x38a   : > { %v8020_v22 = vld [vmem:[%s8823_s17 + $0x874] sm:$0xf0]  ;;  %4506 = vmatpush.bf16.msrb.mxu3 %v7324_v24  ;;  %v6429_v17 = vld [vmem:[%s8823_s17 + $0x7b8] sm:$0xf0]  ;;  %v4244_v45 = vpop.f32.mrf.mxu0 }
 0x38b   : > { %v6779_v23 = vld [vmem:[%s8823_s17 + $0xa58] sm:$0xf]  ;;  %v6524_v29 = vor.u32 %v8020_v22, %v6523_v21  ;;  %v4189_v37 = vadd.f32 %v4188_v19, %v1159_v56  ;;  %v5664_v19 = vor.u32 %v7800_v7, %v5661_v8  ;;  %v4191_v21 = vadd.f32 %v4190_v6, %v1159_v56  ;;  %v7792_v24 = vld [vmem:[%s8823_s17 + $0x15c] sm:$0xf] }
 0x38c   : > { %v8084_v3 = vld [vmem:[%s8823_s17 + $0xa74] sm:$0xf0]  ;;  %v5920_v22 = vor.u32 %v7864_v9, %v5917_v11  ;;  %v7984_v56 = vld [vmem:[%s8823_s17 + $0x75c] sm:$0xf] }
 0x38d   : > { %v7035_v48 = vld [vmem:[%s8823_s17 + $0xc58] sm:$0xf]  ;;  %v6780_v32 = vor.u32 %v8084_v3, %v6779_v23  ;;  %4465 = vmatpush.bf16.msrb.mxu0 %v6524_v29  ;;  %v4203_v63 = vadd.f32 %v4202_v26, %v4189_v37  ;;  %v6176_v23 = vor.u32 %v7928_v62, %v6173_v12  ;;  %v5629_v3 = vld [vmem:[%s8823_s17 + $0x178] sm:$0xf0] }
 0x38e   : > { %v8148_v25 = vld [vmem:[%s8823_s17 + $0xc74] sm:$0xf0]  ;;  %v5885_v26 = vld [vmem:[%s8823_s17 + $0x378] sm:$0xf0] }
 0x38f   : > { %v7291_v27 = vld [vmem:[%s8823_s17 + $0xe58] sm:$0xf]  ;;  %v7036_v33 = vor.u32 %v8148_v25, %v7035_v48  ;;  %4479 = vmatpush.bf16.msrb.mxu1 %v6780_v32  ;;  %v4217_v18 = vadd.f32 %v4216_v54, %v4203_v63  ;;  %v7856_v48 = vld [vmem:[%s8823_s17 + $0x35c] sm:$0xf]  ;;  %v6432_v25 = vor.u32 %v7992_v15, %v6429_v17  ;;  %v4218_v32 = vpop.f32.mrf.mxu2 }
 0x390   : > { %v8212_v28 = vld [vmem:[%s8823_s17 + $0xe74] sm:$0xf0]  ;;  %v6397_v29 = vld [vmem:[%s8823_s17 + $0x778] sm:$0xf0]  ;;  %v4258_v54 = vpop.f32.mrf.mxu1 }
 0x391   : > { %v6491_v30 = vld [vmem:[%s8823_s17 + $0x818] sm:$0xf]  ;;  %v7292_v38 = vor.u32 %v8212_v28, %v7291_v27  ;;  %4493 = vmatpush.bf16.msrb.mxu2 %v7036_v33  ;;  %v7920_v27 = vld [vmem:[%s8823_s17 + $0x55c] sm:$0xf]  ;;  %v4205_v33 = vadd.f32 %v4204_v14, %v4191_v21 }
 0x392   : > { %v8012_v31 = vld [vmem:[%s8823_s17 + $0x834] sm:$0xf0]  ;;  %v6141_v28 = vld [vmem:[%s8823_s17 + $0x578] sm:$0xf0] }
 0x393   : > { %v6747_v34 = vld [vmem:[%s8823_s17 + $0xa18] sm:$0xf]  ;;  %v6492_v49 = vor.u32 %v8012_v31, %v6491_v30  ;;  %4507 = vmatpush.bf16.msrb.mxu3 %v7292_v38  ;;  %v4231_v30 = vadd.f32 %v4230_v60, %v4217_v18  ;;  %v5632_v31 = vor.u32 %v7792_v24, %v5629_v3  ;;  %v7784_v37 = vld [vmem:[%s8823_s17 + $0x11c] sm:$0xf]  ;;  %v4246_v24 = vpop.f32.mrf.mxu0 }
 0x394   : > { %v8076_v35 = vld [vmem:[%s8823_s17 + $0xa34] sm:$0xf0]  ;;  %v5597_v38 = vld [vmem:[%s8823_s17 + $0x138] sm:$0xf0] }
 0x395   : > { %v7003_v36 = vld [vmem:[%s8823_s17 + $0xc18] sm:$0xf]  ;;  %v6748_v55 = vor.u32 %v8076_v35, %v6747_v34  ;;  %4466 = vmatpush.bf16.msrb.mxu0 %v6492_v49  ;;  %v5888_v34 = vor.u32 %v7856_v48, %v5885_v26  ;;  %v6144_v35 = vor.u32 %v7920_v27, %v6141_v28  ;;  %v7976_v49 = vld [vmem:[%s8823_s17 + $0x71c] sm:$0xf]  ;;  %v4245_v52 = vadd.f32 %v4244_v45, %v4231_v30 }
 0x396   : > { %v8140_v39 = vld [vmem:[%s8823_s17 + $0xc34] sm:$0xf0]  ;;  %v5600_v53 = vor.u32 %v7784_v37, %v5597_v38  ;;  %v7776_v59 = vld [vmem:[%s8823_s17 + $0xdc] sm:$0xf] }
 0x397   : > { %v7259_v40 = vld [vmem:[%s8823_s17 + $0xe18] sm:$0xf]  ;;  %v7004_v57 = vor.u32 %v8140_v39, %v7003_v36  ;;  %4480 = vmatpush.bf16.msrb.mxu1 %v6748_v55  ;;  %v4232_v36 = vpop.f32.mrf.mxu3  ;;  %v7848_v39 = vld [vmem:[%s8823_s17 + $0x31c] sm:$0xf]  ;;  %v4219_v55 = vadd.f32 %v4218_v32, %v4205_v33  ;;  %v4259_v6 = vadd.f32 %v4258_v54, %v4245_v52 }
 0x398   : > { %v8204_v41 = vld [vmem:[%s8823_s17 + $0xe34] sm:$0xf0]  ;;  %4467 = vmatmul.bf16.vlgmr.msrb.gmra.mxu0 %v9022_v42  ;;  %v5565_v60 = vld [vmem:[%s8823_s17 + $0xf8] sm:$0xf0] }
 0x399   : > { %v7260_v0 = vor.u32 %v8204_v41, %v7259_v40  ;;  %4494 = vmatpush.bf16.msrb.mxu2 %v7004_v57  ;;  %4515 = vmatpush.bf16.msra.mxu0 %v5696_v1  ;;  %v6400_v40 = vor.u32 %v7984_v56, %v6397_v29  ;;  %v5853_v41 = vld [vmem:[%s8823_s17 + $0x338] sm:$0xf0]  ;;  %v5568_v9 = vor.u32 %v7776_v59, %v5565_v60 }
 0x39a   : > { %4481 = vmatmul.bf16.vlgmr.msrb.gmra.mxu1 %v9029_v47  ;;  %v5856_v57 = vor.u32 %v7848_v39, %v5853_v41  ;;  %v7840_v63 = vld [vmem:[%s8823_s17 + $0x2dc] sm:$0xf]  ;;  %v4233_v11 = vadd.f32 %v4232_v36, %v4219_v55 }
 0x39b   : > { %4508 = vmatpush.bf16.msrb.mxu3 %v7260_v0  ;;  %4529 = vmatpush.bf16.msra.mxu1 %v5952_v2  ;;  %v6368_v0 = vor.u32 %v7976_v49, %v6365_v51  ;;  %v5821_v1 = vld [vmem:[%s8823_s17 + $0x2f8] sm:$0xf0] }
 0x39c   : > { %4495 = vmatmul.bf16.vlgmr.msrb.gmra.mxu2 %v9027_v46  ;;  %v7904_v2 = vld [vmem:[%s8823_s17 + $0x4dc] sm:$0xf]  ;;  %v5824_v62 = vor.u32 %v7840_v63, %v5821_v1  ;;  %v4247_v28 = vadd.f32 %v4246_v24, %v4233_v11 }
 0x39d   : > { %4543 = vmatpush.bf16.msra.mxu2 %v6208_v5  ;;  %4516 = vmatpush.bf16.msra.mxu0 %v5664_v19  ;;  %v6077_v5 = vld [vmem:[%s8823_s17 + $0x4f8] sm:$0xf0]  ;;  %v4272_v19 = vpop.f32.mrf.mxu2 }
 0x39e   : > { %4509 = vmatmul.bf16.vlgmr.msrb.gmra.mxu3 %v9033_v50  ;;  %v7968_v7 = vld [vmem:[%s8823_s17 + $0x6dc] sm:$0xf]  ;;  %v6080_v12 = vor.u32 %v7904_v2, %v6077_v5 }
 0x39f   : > { %4557 = vmatpush.bf16.msra.mxu3 %v6464_v10  ;;  %4530 = vmatpush.bf16.msra.mxu1 %v5920_v22  ;;  %v6333_v8 = vld [vmem:[%s8823_s17 + $0x6f8] sm:$0xf0]  ;;  %v4286_v3 = vpop.f32.mrf.mxu3 }
 0x3a0   : > { %v7768_v10 = vld [vmem:[%s8823_s17 + $0x9c] sm:$0xf]  ;;  %v6336_v18 = vor.u32 %v7968_v7, %v6333_v8 }
 0x3a1   : > { %4544 = vmatpush.bf16.msra.mxu2 %v6176_v23  ;;  %4517 = vmatpush.bf16.msra.mxu0 %v5632_v31  ;;  %v5533_v14 = vld [vmem:[%s8823_s17 + $0xb8] sm:$0xf0]  ;;  %v4273_v23 = vadd.f32 %v4272_v19, %v4259_v6 }
 0x3a2   : > { %v7832_v15 = vld [vmem:[%s8823_s17 + $0x29c] sm:$0xf]  ;;  %v5536_v26 = vor.u32 %v7768_v10, %v5533_v14 }
 0x3a3   : > { %4558 = vmatpush.bf16.msra.mxu3 %v6432_v25  ;;  %4531 = vmatpush.bf16.msra.mxu1 %v5888_v34  ;;  %v5789_v17 = vld [vmem:[%s8823_s17 + $0x2b8] sm:$0xf0]  ;;  %v4287_v56 = vadd.f32 %v4286_v3, %v4273_v23  ;;  %v4260_v34 = vpop.f32.mrf.mxu1 }
 0x3a4   : > { %v7896_v21 = vld [vmem:[%s8823_s17 + $0x49c] sm:$0xf]  ;;  %v5792_v27 = vor.u32 %v7832_v15, %v5789_v17  ;;  %v4261_v49 = vadd.f32 %v4260_v34, %v4247_v28 }
 0x3a5   : > { %4545 = vmatpush.bf16.msra.mxu2 %v6144_v35  ;;  %4518 = vmatpush.bf16.msra.mxu0 %v5600_v53  ;;  %v6045_v22 = vld [vmem:[%s8823_s17 + $0x4b8] sm:$0xf0]  ;;  %v4631_v38 = vmax.f32 %v4287_v56, 0.0 }
 0x3a6   : > { %v7960_v48 = vld [vmem:[%s8823_s17 + $0x69c] sm:$0xf]  ;;  %v6048_v29 = vor.u32 %v7896_v21, %v6045_v22 }
 0x3a7   : > { %4559 = vmatpush.bf16.msra.mxu3 %v6400_v40  ;;  %4532 = vmatpush.bf16.msra.mxu1 %v5856_v57  ;;  %v6301_v25 = vld [vmem:[%s8823_s17 + $0x6b8] sm:$0xf0]  ;;  %4647 = vst [vmem:[#allocation2 + $0x50] sm:$0xff] %v4631_v38  ;;  %v4274_v57 = vpop.f32.mrf.mxu2 }
 0x3a8   : > { %v7760_v30 = vld [vmem:[%s8823_s17 + $0x5c] sm:$0xf]  ;;  %v6304_v33 = vor.u32 %v7960_v48, %v6301_v25  ;;  %v4275_v63 = vadd.f32 %v4274_v57, %v4261_v49 }
 0x3a9   : > { %4546 = vmatpush.bf16.msra.mxu2 %v6112_v58  ;;  %4519 = vmatpush.bf16.msra.mxu0 %v5568_v9  ;;  %v5501_v31 = vld [vmem:[%s8823_s17 + $0x78] sm:$0xf0] }
 0x3aa   : > { %v7824_v32 = vld [vmem:[%s8823_s17 + $0x25c] sm:$0xf]  ;;  %v5504_v41 = vor.u32 %v7760_v30, %v5501_v31 }
 0x3ab   : > { %4560 = vmatpush.bf16.msra.mxu3 %v6368_v0  ;;  %4533 = vmatpush.bf16.msra.mxu1 %v5824_v62  ;;  %v5757_v35 = vld [vmem:[%s8823_s17 + $0x278] sm:$0xf0]  ;;  %v4288_v0 = vpop.f32.mrf.mxu3 }
 0x3ac   : > { %v7888_v36 = vld [vmem:[%s8823_s17 + $0x45c] sm:$0xf]  ;;  %v5760_v51 = vor.u32 %v7824_v32, %v5757_v35  ;;  %v4289_v10 = vadd.f32 %v4288_v0, %v4275_v63 }
 0x3ad   : > { %4547 = vmatpush.bf16.msra.mxu2 %v6080_v12  ;;  %v6013_v37 = vld [vmem:[%s8823_s17 + $0x478] sm:$0xf0]  ;;  %4520 = vmatpush.bf16.msra.mxu0 %v5536_v26 }
 0x3ae   : > { %v7952_v39 = vld [vmem:[%s8823_s17 + $0x65c] sm:$0xf]  ;;  %v6016_v52 = vor.u32 %v7888_v36, %v6013_v37  ;;  %v4639_v19 = vmax.f32 %v4289_v10, 0.0 }
 0x3af   : > { %4561 = vmatpush.bf16.msra.mxu3 %v6336_v18  ;;  %v6269_v40 = vld [vmem:[%s8823_s17 + $0x678] sm:$0xf0]  ;;  %4534 = vmatpush.bf16.msra.mxu1 %v5792_v27 }
 0x3b0   : > { %v7752_v43 = vld [vmem:[%s8823_s17 + $0x1c] sm:$0xf]  ;;  %v6272_v55 = vor.u32 %v7952_v39, %v6269_v40  ;;  %4655 = vst [vmem:[#allocation2 + $0x60] sm:$0xff] %v4639_v19 }
 0x3b1   : > { %v5469_v44 = vld [vmem:[%s8823_s17 + $0x38] sm:$0xf0]  ;;  %4548 = vmatpush.bf16.msra.mxu2 %v6048_v29  ;;  %4521 = vmatpush.bf16.msra.mxu0 %v5504_v41 }
 0x3b2   : > { %v7816_v45 = vld [vmem:[%s8823_s17 + $0x21c] sm:$0xf]  ;;  %v5472_v6 = vor.u32 %v7752_v43, %v5469_v44 }
 0x3b3   : > { %v5725_v53 = vld [vmem:[%s8823_s17 + $0x238] sm:$0xf0]  ;;  %4562 = vmatpush.bf16.msra.mxu3 %v6304_v33  ;;  %4535 = vmatpush.bf16.msra.mxu1 %v5760_v51 }
 0x3b4   : > { %v7880_v54 = vld [vmem:[%s8823_s17 + $0x41c] sm:$0xf]  ;;  %v5728_v11 = vor.u32 %v7816_v45, %v5725_v53 }
 0x3b5   : > { %v5981_v58 = vld [vmem:[%s8823_s17 + $0x438] sm:$0xf0]  ;;  %4549 = vmatpush.bf16.msra.mxu2 %v6016_v52  ;;  %4522 = vmatpush.bf16.msra.mxu0 %v5472_v6 }
 0x3b6   : > { %v7944_v59 = vld [vmem:[%s8823_s17 + $0x61c] sm:$0xf]  ;;  %v5984_v62 = vor.u32 %v7880_v54, %v5981_v58 }
 0x3b7   : > { %v6237_v60 = vld [vmem:[%s8823_s17 + $0x638] sm:$0xf0]  ;;  %4563 = vmatpush.bf16.msra.mxu3 %v6272_v55  ;;  %4536 = vmatpush.bf16.msra.mxu1 %v5728_v11 }
 0x3b8   : > { %v8064_v1 = vld [vmem:[%s8823_s17 + $0x9dc] sm:$0xf]  ;;  %v6240_v15 = vor.u32 %v7944_v59, %v6237_v60  ;;  %4523 = vmatmul.bf16.vlgmr.msra.gmra.mxu0 %v8953_v61 }
 0x3b9   : > { %v6717_v2 = vld [vmem:[%s8823_s17 + $0x9f8] sm:$0xf0]  ;;  %4550 = vmatpush.bf16.msra.mxu2 %v5984_v62 }
 0x3ba   : > { %v8128_v5 = vld [vmem:[%s8823_s17 + $0xbdc] sm:$0xf]  ;;  %v6720_v17 = vor.u32 %v8064_v1, %v6717_v2  ;;  %4537 = vmatmul.bf16.vlgmr.msra.gmra.mxu1 %v8965_v13 }
 0x3bb   : > { %v6973_v7 = vld [vmem:[%s8823_s17 + $0xbf8] sm:$0xf0]  ;;  %4564 = vmatpush.bf16.msra.mxu3 %v6240_v15 }
 0x3bc   : > { %v8192_v8 = vld [vmem:[%s8823_s17 + $0xddc] sm:$0xf]  ;;  %v6976_v21 = vor.u32 %v8128_v5, %v6973_v7  ;;  %4571 = vmatpush.bf16.msrb.mxu0 %v6720_v17  ;;  %4551 = vmatmul.bf16.vlgmr.msra.gmra.mxu2 %v8958_v4 }
 0x3bd   : > { %v7229_v9 = vld [vmem:[%s8823_s17 + $0xdf8] sm:$0xf0] }
 0x3be   : > { %v8256_v12 = vld [vmem:[%s8823_s17 + $0xfdc] sm:$0xf]  ;;  %v7232_v22 = vor.u32 %v8192_v8, %v7229_v9  ;;  %4585 = vmatpush.bf16.msrb.mxu1 %v6976_v21  ;;  %4565 = vmatmul.bf16.vlgmr.msra.gmra.mxu3 %v8970_v20  ;;  %v1160_v21 = vperm.slane %v9849_v16, 5 }
 0x3bf   : > { %v7485_v14 = vld [vmem:[%s8823_s17 + $0xff8] sm:$0xf0] }
 0x3c0   : > { %v8056_v18 = vld [vmem:[%s8823_s17 + $0x99c] sm:$0xf]  ;;  %v7488_v3 = vor.u32 %v8256_v12, %v7485_v14  ;;  %4599 = vmatpush.bf16.msrb.mxu2 %v7232_v22 }
 0x3c1   : > { %v6685_v23 = vld [vmem:[%s8823_s17 + $0x9b8] sm:$0xf0] }
 0x3c2   : > { %v8120_v24 = vld [vmem:[%s8823_s17 + $0xb9c] sm:$0xf]  ;;  %v6688_v56 = vor.u32 %v8056_v18, %v6685_v23  ;;  %4613 = vmatpush.bf16.msrb.mxu3 %v7488_v3 }
 0x3c3   : > { %v6941_v48 = vld [vmem:[%s8823_s17 + $0xbb8] sm:$0xf0] }
 0x3c4   : > { %v8184_v25 = vld [vmem:[%s8823_s17 + $0xd9c] sm:$0xf]  ;;  %v6944_v29 = vor.u32 %v8120_v24, %v6941_v48  ;;  %4572 = vmatpush.bf16.msrb.mxu0 %v6688_v56  ;;  %v4300_v24 = vpop.f32.mrf.mxu0 }
 0x3c5   : > { %v7197_v26 = vld [vmem:[%s8823_s17 + $0xdb8] sm:$0xf0] }
 0x3c6   : > { %v8248_v27 = vld [vmem:[%s8823_s17 + $0xf9c] sm:$0xf]  ;;  %v7200_v30 = vor.u32 %v8184_v25, %v7197_v26  ;;  %4586 = vmatpush.bf16.msrb.mxu1 %v6944_v29  ;;  %v4314_v29 = vpop.f32.mrf.mxu1 }
 0x3c7   : > { %v7453_v28 = vld [vmem:[%s8823_s17 + $0xfb8] sm:$0xf0] }
 0x3c8   : > { %v8048_v31 = vld [vmem:[%s8823_s17 + $0x95c] sm:$0xf]  ;;  %v7456_v34 = vor.u32 %v8248_v27, %v7453_v28  ;;  %4600 = vmatpush.bf16.msrb.mxu2 %v7200_v30 }
 0x3c9   : > { %v6653_v32 = vld [vmem:[%s8823_s17 + $0x978] sm:$0xf0] }
 0x3ca   : > { %v8112_v33 = vld [vmem:[%s8823_s17 + $0xb5c] sm:$0xf]  ;;  %v6656_v40 = vor.u32 %v8048_v31, %v6653_v32  ;;  %4614 = vmatpush.bf16.msrb.mxu3 %v7456_v34 }
 0x3cb   : > { %v6909_v35 = vld [vmem:[%s8823_s17 + $0xb78] sm:$0xf0] }
 0x3cc   : > { %v8176_v36 = vld [vmem:[%s8823_s17 + $0xd5c] sm:$0xf]  ;;  %v6912_v4 = vor.u32 %v8112_v33, %v6909_v35  ;;  %4573 = vmatpush.bf16.msrb.mxu0 %v6656_v40 }
 0x3cd   : > { %v7165_v37 = vld [vmem:[%s8823_s17 + $0xd78] sm:$0xf0] }
 0x3ce   : > { %v8240_v38 = vld [vmem:[%s8823_s17 + $0xf5c] sm:$0xf]  ;;  %v7168_v41 = vor.u32 %v8176_v36, %v7165_v37  ;;  %4587 = vmatpush.bf16.msrb.mxu1 %v6912_v4 }
 0x3cf   : > { %v7421_v39 = vld [vmem:[%s8823_s17 + $0xf78] sm:$0xf0] }
 0x3d0   : > { %v8040_v43 = vld [vmem:[%s8823_s17 + $0x91c] sm:$0xf]  ;;  %v7424_v61 = vor.u32 %v8240_v38, %v7421_v39  ;;  %4601 = vmatpush.bf16.msrb.mxu2 %v7168_v41  ;;  %v4301_v38 = vadd.f32 %v4300_v24, %v1160_v21 }
 0x3d1   : > { %v6621_v44 = vld [vmem:[%s8823_s17 + $0x938] sm:$0xf0] }
 0x3d2   : > { %v8104_v45 = vld [vmem:[%s8823_s17 + $0xb1c] sm:$0xf]  ;;  %v6624_v53 = vor.u32 %v8040_v43, %v6621_v44  ;;  %4615 = vmatpush.bf16.msrb.mxu3 %v7424_v61  ;;  %v4328_v61 = vpop.f32.mrf.mxu2 }
 0x3d3   : > { %v6877_v49 = vld [vmem:[%s8823_s17 + $0xb38] sm:$0xf0] }
 0x3d4   : > { %v8168_v20 = vld [vmem:[%s8823_s17 + $0xd1c] sm:$0xf]  ;;  %v6880_v54 = vor.u32 %v8104_v45, %v6877_v49  ;;  %4574 = vmatpush.bf16.msrb.mxu0 %v6624_v53  ;;  %v4302_v53 = vpop.f32.mrf.mxu0 }
 0x3d5   : > { %v7133_v51 = vld [vmem:[%s8823_s17 + $0xd38] sm:$0xf0] }
 0x3d6   : > { %v8232_v52 = vld [vmem:[%s8823_s17 + $0xf1c] sm:$0xf]  ;;  %v7136_v55 = vor.u32 %v8168_v20, %v7133_v51  ;;  %4588 = vmatpush.bf16.msrb.mxu1 %v6880_v54  ;;  %v4342_v51 = vpop.f32.mrf.mxu3  ;;  %v4316_v54 = vpop.f32.mrf.mxu1 }
 0x3d7   : > { %v7389_v13 = vld [vmem:[%s8823_s17 + $0xf38] sm:$0xf0] }
 0x3d8   : > { %v8032_v57 = vld [vmem:[%s8823_s17 + $0x8dc] sm:$0xf]  ;;  %v7392_v60 = vor.u32 %v8232_v52, %v7389_v13  ;;  %4602 = vmatpush.bf16.msrb.mxu2 %v7136_v55  ;;  %v4315_v52 = vadd.f32 %v4314_v29, %v4301_v38 }
 0x3d9   : > { %v6589_v58 = vld [vmem:[%s8823_s17 + $0x8f8] sm:$0xf0] }
 0x3da   : > { %v8096_v59 = vld [vmem:[%s8823_s17 + $0xadc] sm:$0xf]  ;;  %v6592_v6 = vor.u32 %v8032_v57, %v6589_v58  ;;  %4616 = vmatpush.bf16.msrb.mxu3 %v7392_v60  ;;  %v4329_v55 = vadd.f32 %v4328_v61, %v4315_v52  ;;  %v4303_v57 = vadd.f32 %v4302_v53, %v1160_v21  ;;  %v1161_v21 = vperm.slane %v9849_v16, 6 }
 0x3db   : > { %v6845_v63 = vld [vmem:[%s8823_s17 + $0xaf8] sm:$0xf0] }
 0x3dc   : > { %v8160_v0 = vld [vmem:[%s8823_s17 + $0xcdc] sm:$0xf]  ;;  %v6848_v7 = vor.u32 %v8096_v59, %v6845_v63  ;;  %4575 = vmatpush.bf16.msrb.mxu0 %v6592_v6  ;;  %v4343_v58 = vadd.f32 %v4342_v51, %v4329_v55  ;;  %v4330_v59 = vpop.f32.mrf.mxu2  ;;  %v4317_v60 = vadd.f32 %v4316_v54, %v4303_v57  ;;  %v1162_v54 = vperm.slane %v9849_v16, 7 }
 0x3dd   : > { %v7101_v1 = vld [vmem:[%s8823_s17 + $0xcf8] sm:$0xf0] }
 0x3de   : > { %v8224_v2 = vld [vmem:[%s8823_s17 + $0xedc] sm:$0xf]  ;;  %v7104_v8 = vor.u32 %v8160_v0, %v7101_v1  ;;  %4589 = vmatpush.bf16.msrb.mxu1 %v6848_v7  ;;  %v4344_v63 = vpop.f32.mrf.mxu3  ;;  %v4356_v0 = vpop.f32.mrf.mxu0 }
 0x3df   : > { %v7357_v5 = vld [vmem:[%s8823_s17 + $0xef8] sm:$0xf0]  ;;  %v4357_v1 = vadd.f32 %v4356_v0, %v4343_v58 }
 0x3e0   : > { %v8024_v9 = vld [vmem:[%s8823_s17 + $0x89c] sm:$0xf]  ;;  %v7360_v62 = vor.u32 %v8224_v2, %v7357_v5  ;;  %4603 = vmatpush.bf16.msrb.mxu2 %v7104_v8  ;;  %v4370_v2 = vpop.f32.mrf.mxu1  ;;  %v4331_v5 = vadd.f32 %v4330_v59, %v4317_v60 }
 0x3e1   : > { %v6557_v10 = vld [vmem:[%s8823_s17 + $0x8b8] sm:$0xf0]  ;;  %v4371_v6 = vadd.f32 %v4370_v2, %v4357_v1 }
 0x3e2   : > { %v8088_v11 = vld [vmem:[%s8823_s17 + $0xa9c] sm:$0xf]  ;;  %v6560_v19 = vor.u32 %v8024_v9, %v6557_v10  ;;  %4617 = vmatpush.bf16.msrb.mxu3 %v7360_v62  ;;  %v4345_v7 = vadd.f32 %v4344_v63, %v4331_v5 }
 0x3e3   : > { %v6813_v12 = vld [vmem:[%s8823_s17 + $0xab8] sm:$0xf0] }
 0x3e4   : > { %v8152_v14 = vld [vmem:[%s8823_s17 + $0xc9c] sm:$0xf]  ;;  %v6816_v22 = vor.u32 %v8088_v11, %v6813_v12  ;;  %4576 = vmatpush.bf16.msrb.mxu0 %v6560_v19  ;;  %v4384_v8 = vpop.f32.mrf.mxu2 }
 0x3e5   : > { %v7069_v15 = vld [vmem:[%s8823_s17 + $0xcb8] sm:$0xf0]  ;;  %v4385_v9 = vadd.f32 %v4384_v8, %v4371_v6 }
 0x3e6   : > { %v8216_v17 = vld [vmem:[%s8823_s17 + $0xe9c] sm:$0xf]  ;;  %v7072_v23 = vor.u32 %v8152_v14, %v7069_v15  ;;  %4590 = vmatpush.bf16.msrb.mxu1 %v6816_v22  ;;  %v4398_v10 = vpop.f32.mrf.mxu3 }
 0x3e7   : > { %v7325_v18 = vld [vmem:[%s8823_s17 + $0xeb8] sm:$0xf0] }
 0x3e8   : > { %v8016_v3 = vld [vmem:[%s8823_s17 + $0x85c] sm:$0xf]  ;;  %v7328_v26 = vor.u32 %v8216_v17, %v7325_v18  ;;  %4604 = vmatpush.bf16.msrb.mxu2 %v7072_v23  ;;  %v4372_v62 = vpop.f32.mrf.mxu1 }
 0x3e9   : > { %v6525_v48 = vld [vmem:[%s8823_s17 + $0x878] sm:$0xf0] }
 0x3ea   : > { %v8080_v25 = vld [vmem:[%s8823_s17 + $0xa5c] sm:$0xf]  ;;  %v6528_v32 = vor.u32 %v8016_v3, %v6525_v48  ;;  %4618 = vmatpush.bf16.msrb.mxu3 %v7328_v26 }
 0x3eb   : > { %v6781_v27 = vld [vmem:[%s8823_s17 + $0xa78] sm:$0xf0] }
 0x3ec   : > { %v8144_v28 = vld [vmem:[%s8823_s17 + $0xc5c] sm:$0xf]  ;;  %v6784_v33 = vor.u32 %v8080_v25, %v6781_v27  ;;  %4577 = vmatpush.bf16.msrb.mxu0 %v6528_v32  ;;  %v4386_v12 = vpop.f32.mrf.mxu2 }
 0x3ed   : > { %v7037_v56 = vld [vmem:[%s8823_s17 + $0xc78] sm:$0xf0] }
 0x3ee   : > { %v8208_v30 = vld [vmem:[%s8823_s17 + $0xe5c] sm:$0xf]  ;;  %v7040_v34 = vor.u32 %v8144_v28, %v7037_v56  ;;  %4591 = vmatpush.bf16.msrb.mxu1 %v6784_v33  ;;  %v4400_v15 = vpop.f32.mrf.mxu3 }
 0x3ef   : > { %v7293_v31 = vld [vmem:[%s8823_s17 + $0xe78] sm:$0xf0] }
 0x3f0   : > { %v8008_v35 = vld [vmem:[%s8823_s17 + $0x81c] sm:$0xf]  ;;  %v7296_v39 = vor.u32 %v8208_v30, %v7293_v31  ;;  %4605 = vmatpush.bf16.msrb.mxu2 %v7040_v34  ;;  %v4426_v22 = vpop.f32.mrf.mxu1 }
 0x3f1   : > { %v6493_v36 = vld [vmem:[%s8823_s17 + $0x838] sm:$0xf0] }
 0x3f2   : > { %v8072_v37 = vld [vmem:[%s8823_s17 + $0xa1c] sm:$0xf]  ;;  %v6496_v45 = vor.u32 %v8008_v35, %v6493_v36  ;;  %4619 = vmatpush.bf16.msrb.mxu3 %v7296_v39 }
 0x3f3   : > { %v6749_v40 = vld [vmem:[%s8823_s17 + $0xa38] sm:$0xf0] }
 0x3f4   : > { %v8136_v4 = vld [vmem:[%s8823_s17 + $0xc1c] sm:$0xf]  ;;  %v6752_v49 = vor.u32 %v8072_v37, %v6749_v40  ;;  %4578 = vmatpush.bf16.msrb.mxu0 %v6496_v45  ;;  %v4440_v24 = vpop.f32.mrf.mxu2 }
 0x3f5   : > { %v7005_v41 = vld [vmem:[%s8823_s17 + $0xc38] sm:$0xf0] }
 0x3f6   : > { %v8200_v43 = vld [vmem:[%s8823_s17 + $0xe1c] sm:$0xf]  ;;  %v7008_v20 = vor.u32 %v8136_v4, %v7005_v41  ;;  %4592 = vmatpush.bf16.msrb.mxu1 %v6752_v49  ;;  %v4454_v3 = vpop.f32.mrf.mxu3 }
 0x3f7   : > { %v7261_v44 = vld [vmem:[%s8823_s17 + $0xe38] sm:$0xf0]  ;;  %4579 = vmatmul.bf16.vlgmr.msrb.gmra.mxu0 %v9022_v42  ;;  %v4358_v42 = vpop.f32.mrf.mxu0 }
 0x3f8   : > { %v7264_v13 = vor.u32 %v8200_v43, %v7261_v44  ;;  %4606 = vmatpush.bf16.msrb.mxu2 %v7008_v20  ;;  %v4359_v11 = vadd.f32 %v4358_v42, %v4345_v7  ;;  %v4428_v26 = vpop.f32.mrf.mxu1 }
 0x3f9   : > { %4593 = vmatmul.bf16.vlgmr.msrb.gmra.mxu1 %v9029_v47  ;;  %v4399_v47 = vadd.f32 %v4398_v10, %v4385_v9 }
 0x3fa   : > { %4620 = vmatpush.bf16.msrb.mxu3 %v7264_v13 }
 0x3fb   : > { %4607 = vmatmul.bf16.vlgmr.msrb.gmra.mxu2 %v9027_v46  ;;  %v4632_v46 = vmax.f32 %v4399_v47, 0.0 }
 0x3fc   : > { %v4442_v29 = vpop.f32.mrf.mxu2 }
 0x3fd   : > { %4621 = vmatmul.bf16.vlgmr.msrb.gmra.mxu3 %v9033_v50  ;;  %4648 = vst [vmem:[#allocation2 + $0x68] sm:$0xff] %v4632_v46  ;;  %v4373_v50 = vadd.f32 %v4372_v62, %v4359_v11 }
 0x3fe   : > { %v4456_v31 = vpop.f32.mrf.mxu3 }
 0x3ff   : > { %v4387_v14 = vadd.f32 %v4386_v12, %v4373_v50  ;;  %v4412_v19 = vpop.f32.mrf.mxu0 }
 0x400   : > { %v4413_v23 = vadd.f32 %v4412_v19, %v1161_v21 }
 0x401   : > { %v4401_v17 = vadd.f32 %v4400_v15, %v4387_v14 }
 0x402   : > { %v4427_v48 = vadd.f32 %v4426_v22, %v4413_v23 }
 0x403   : > { %v4640_v18 = vmax.f32 %v4401_v17, 0.0 }
 0x404   : > { %v4441_v27 = vadd.f32 %v4440_v24, %v4427_v48 }
 0x405   : > { %4656 = vst [vmem:[#allocation2 + $0x70] sm:$0xff] %v4640_v18 }
 0x406   : > { %v4455_v56 = vadd.f32 %v4454_v3, %v4441_v27 }
 0x407   : > { %v4414_v25 = vpop.f32.mrf.mxu0 }
 0x408   : > { %v4415_v28 = vadd.f32 %v4414_v25, %v1161_v21 }
 0x40a   : > { %v4429_v30 = vadd.f32 %v4428_v26, %v4415_v28 }
 0x40c   : > { %v4443_v35 = vadd.f32 %v4442_v29, %v4429_v30 }
 0x40e   : > { %v4457_v37 = vadd.f32 %v4456_v31, %v4443_v35 }
 0x415   : > { %v4468_v32 = vpop.f32.mrf.mxu0 }
 0x416   : > { %v4469_v33 = vadd.f32 %v4468_v32, %v4455_v56 }
 0x417   : > { %v4482_v34 = vpop.f32.mrf.mxu1 }
 0x418   : > { %v4483_v36 = vadd.f32 %v4482_v34, %v4469_v33 }
 0x41d   : > { %v4470_v40 = vpop.f32.mrf.mxu0 }
 0x41e   : > { %v4471_v41 = vadd.f32 %v4470_v40, %v4457_v37 }
 0x41f   : > { %v4496_v38 = vpop.f32.mrf.mxu2  ;;  %v4484_v44 = vpop.f32.mrf.mxu1 }
 0x420   : > { %v4497_v39 = vadd.f32 %v4496_v38, %v4483_v36  ;;  %v4485_v61 = vadd.f32 %v4484_v44, %v4471_v41 }
 0x421   : > { %v4510_v4 = vpop.f32.mrf.mxu3 }
 0x422   : > { %v4511_v43 = vadd.f32 %v4510_v4, %v4497_v39 }
 0x424   : > { %v4633_v45 = vmax.f32 %v4511_v43, 0.0 }
 0x426   : > { %4649 = vst [vmem:[#allocation2 + $0x8] sm:$0xff] %v4633_v45 }
 0x427   : > { %v4498_v49 = vpop.f32.mrf.mxu2 }
 0x428   : > { %v4499_v20 = vadd.f32 %v4498_v49, %v4485_v61 }
 0x429   : > { %v4512_v51 = vpop.f32.mrf.mxu3 }
 0x42a   : > { %v4513_v52 = vadd.f32 %v4512_v51, %v4499_v20 }
 0x42c   : > { %v4641_v13 = vmax.f32 %v4513_v52, 0.0 }
 0x42e   : > { %4657 = vst [vmem:[#allocation2 + $0x78] sm:$0xff] %v4641_v13 }
 0x435   : > { %v4524_v53 = vpop.f32.mrf.mxu0 }
 0x436   : > { %v4525_v57 = vadd.f32 %v4524_v53, %v1162_v54 }
 0x437   : > { %v4538_v55 = vpop.f32.mrf.mxu1 }
 0x438   : > { %v4539_v60 = vadd.f32 %v4538_v55, %v4525_v57 }
 0x43d   : > { %v4526_v63 = vpop.f32.mrf.mxu0 }
 0x43e   : > { %v4527_v2 = vadd.f32 %v4526_v63, %v1162_v54 }
 0x43f   : > { %v4552_v58 = vpop.f32.mrf.mxu2  ;;  %v4540_v0 = vpop.f32.mrf.mxu1 }
 0x440   : > { %v4553_v1 = vadd.f32 %v4552_v58, %v4539_v60  ;;  %v4541_v7 = vadd.f32 %v4540_v0, %v4527_v2 }
 0x441   : > { %v4566_v59 = vpop.f32.mrf.mxu3 }
 0x442   : > { %v4567_v6 = vadd.f32 %v4566_v59, %v4553_v1 }
 0x447   : > { %v4554_v5 = vpop.f32.mrf.mxu2 }
 0x448   : > { %v4555_v11 = vadd.f32 %v4554_v5, %v4541_v7 }
 0x449   : > { %v4568_v8 = vpop.f32.mrf.mxu3 }
 0x44a   : > { %v4569_v16 = vadd.f32 %v4568_v8, %v4555_v11 }
 0x474   : > { %v4580_v9 = vpop.f32.mrf.mxu0 }
 0x475   : > { %v4581_v42 = vadd.f32 %v4580_v9, %v4567_v6 }
 0x476   : > { %v4594_v10 = vpop.f32.mrf.mxu1 }
 0x477   : > { %v4595_v47 = vadd.f32 %v4594_v10, %v4581_v42 }
 0x47c   : > { %v4582_v12 = vpop.f32.mrf.mxu0 }
 0x47d   : > { %v4583_v15 = vadd.f32 %v4582_v12, %v4569_v16 }
 0x47e   : > { %v4608_v62 = vpop.f32.mrf.mxu2  ;;  %v4596_v18 = vpop.f32.mrf.mxu1 }
 0x47f   : > { %v4609_v46 = vadd.f32 %v4608_v62, %v4595_v47  ;;  %v4597_v19 = vadd.f32 %v4596_v18, %v4583_v15 }
 0x480   : > { %v4622_v50 = vpop.f32.mrf.mxu3 }
 0x481   : > { %v4623_v14 = vadd.f32 %v4622_v50, %v4609_v46 }
 0x483   : > { %v4634_v17 = vmax.f32 %v4623_v14, 0.0 }
 0x485   : > { %4650 = vst [vmem:[#allocation2 + $0x48] sm:$0xff] %v4634_v17 }
 0x486   : > { %v4610_v21 = vpop.f32.mrf.mxu2 }
 0x487   : > { %v4611_v22 = vadd.f32 %v4610_v21, %v4597_v19 }
 0x488   : > { %v4624_v23 = vpop.f32.mrf.mxu3 }
 0x489   : > { %v4625_v24 = vadd.f32 %v4624_v23, %v4611_v22  ;;  %4662 = sbr.rel (%p7489_p1) target bundleno = 1377 (0x561), region = 80 }
 0x48b   : > { %v4642_v3 = vmax.f32 %v4625_v24, 0.0 }
 0x48d   : > { %4658 = vst [vmem:[#allocation2 + $0x28] sm:$0xff] %v4642_v3 }
 0x48e   : > { %v8268_v48 = vld [vmem:[#allocation9 + $0x38] sm:$0xff]  ;;  %v8267_v28 = vld [vmem:[#allocation9 + $0x30] sm:$0xff]  ;;  %v8266_v31 = vld [vmem:[#allocation9 + $0x28] sm:$0xff] }
 0x48f   : > { %v8276_v25 = vld [vmem:[#allocation9 + $0x78] sm:$0xff]  ;;  %5203 = vmatpush.bf16.msra.mxu0 %v8268_v48  ;;  %v8275_v56 = vld [vmem:[#allocation9 + $0x70] sm:$0xff]  ;;  %v8274_v32 = vld [vmem:[#allocation9 + $0x68] sm:$0xff] }
 0x490   : > { %v8284_v26 = vld [vmem:[#allocation9 + $0xb8] sm:$0xff]  ;;  %5217 = vmatpush.bf16.msra.mxu1 %v8276_v25  ;;  %v8283_v29 = vld [vmem:[#allocation9 + $0xb0] sm:$0xff]  ;;  %v8282_v33 = vld [vmem:[#allocation9 + $0xa8] sm:$0xff] }
 0x491   : > { %v8292_v27 = vld [vmem:[#allocation9 + $0xf8] sm:$0xff]  ;;  %5231 = vmatpush.bf16.msra.mxu2 %v8284_v26  ;;  %v8291_v30 = vld [vmem:[#allocation9 + $0xf0] sm:$0xff]  ;;  %v8290_v34 = vld [vmem:[#allocation9 + $0xe8] sm:$0xff] }
 0x492   : > { %5245 = vmatpush.bf16.msra.mxu3 %v8292_v27  ;;  %v8265_v35 = vld [vmem:[#allocation9 + $0x20] sm:$0xff]  ;;  %v8264_v39 = vld [vmem:[#allocation9 + $0x18] sm:$0xff]  ;;  %v8263_v43 = vld [vmem:[#allocation9 + $0x10] sm:$0xff] }
 0x493   : > { %5204 = vmatpush.bf16.msra.mxu0 %v8267_v28  ;;  %v8273_v36 = vld [vmem:[#allocation9 + $0x60] sm:$0xff]  ;;  %v8272_v40 = vld [vmem:[#allocation9 + $0x58] sm:$0xff]  ;;  %v8271_v44 = vld [vmem:[#allocation9 + $0x50] sm:$0xff] }
 0x494   : > { %5218 = vmatpush.bf16.msra.mxu1 %v8275_v56  ;;  %v8281_v37 = vld [vmem:[#allocation9 + $0xa0] sm:$0xff]  ;;  %v8280_v4 = vld [vmem:[#allocation9 + $0x98] sm:$0xff]  ;;  %v8279_v45 = vld [vmem:[#allocation9 + $0x90] sm:$0xff] }
 0x495   : > { %5232 = vmatpush.bf16.msra.mxu2 %v8283_v29  ;;  %v8289_v38 = vld [vmem:[#allocation9 + $0xe0] sm:$0xff]  ;;  %v8288_v41 = vld [vmem:[#allocation9 + $0xd8] sm:$0xff]  ;;  %v8287_v61 = vld [vmem:[#allocation9 + $0xd0] sm:$0xff] }
 0x496   : > { %5246 = vmatpush.bf16.msra.mxu3 %v8291_v30  ;;  %v8262_v49 = vld [vmem:[#allocation9 + $0x8] sm:$0xff]  ;;  %v8261_v13 = vld [vmem:[#allocation9] sm:$0xff]  ;;  %v8300_v57 = vld [vmem:[#allocation9 + $0x138] sm:$0xff] }
 0x497   : > { %5205 = vmatpush.bf16.msra.mxu0 %v8266_v31  ;;  %v8270_v20 = vld [vmem:[#allocation9 + $0x48] sm:$0xff]  ;;  %v8269_v53 = vld [vmem:[#allocation9 + $0x40] sm:$0xff]  ;;  %v8308_v58 = vld [vmem:[#allocation9 + $0x178] sm:$0xff] }
 0x498   : > { %5219 = vmatpush.bf16.msra.mxu1 %v8274_v32  ;;  %v8278_v51 = vld [vmem:[#allocation9 + $0x88] sm:$0xff]  ;;  %v8277_v54 = vld [vmem:[#allocation9 + $0x80] sm:$0xff]  ;;  %v4673_v60 = vld [vmem:[#allocation2 + $0x10] sm:$0xff] }
 0x499   : > { %5233 = vmatpush.bf16.msra.mxu2 %v8282_v33  ;;  %v8286_v52 = vld [vmem:[#allocation9 + $0xc8] sm:$0xff]  ;;  %v8285_v55 = vld [vmem:[#allocation9 + $0xc0] sm:$0xff]  ;;  %v4663_v63 = vld [vmem:[#allocation2 + $0x30] sm:$0xff] }
 0x49a   : > { %5247 = vmatpush.bf16.msra.mxu3 %v8290_v34  ;;  %v4665_v59 = vld [vmem:[#allocation2 + $0x58] sm:$0xff]  ;;  %v4671_v0 = vld [vmem:[#allocation2 + $0x40] sm:$0xff]  ;;  %v8316_v7 = vld [vmem:[#allocation9 + $0x1b8] sm:$0xff] }
 0x49b   : > { %5206 = vmatpush.bf16.msra.mxu0 %v8265_v35  ;;  %v4666_v1 = vld [vmem:[#allocation2 + $0x18] sm:$0xff]  ;;  %v4664_v5 = vld [vmem:[#allocation2] sm:$0xff]  ;;  %v8324_v8 = vld [vmem:[#allocation9 + $0x1f8] sm:$0xff]  ;;  %v4681_v9 = vpack.c.bf16 %v4673_v60, %v4665_v59  ;;  %v4679_v42 = vpack.c.bf16 %v4671_v0, %v4663_v63 }
 0x49c   : > { %5220 = vmatpush.bf16.msra.mxu1 %v8273_v36  ;;  %v4674_v2 = vld [vmem:[#allocation2 + $0x38] sm:$0xff]  ;;  %v4672_v6 = vld [vmem:[#allocation2 + $0x20] sm:$0xff]  ;;  %v8299_v47 = vld [vmem:[#allocation9 + $0x130] sm:$0xff] }
 0x49d   : > { %5234 = vmatpush.bf16.msra.mxu2 %v8281_v37  ;;  %v4682_v10 = vpack.c.bf16 %v4674_v2, %v4666_v1  ;;  %v4680_v11 = vpack.c.bf16 %v4672_v6, %v4664_v5  ;;  %v8307_v62 = vld [vmem:[#allocation9 + $0x170] sm:$0xff]  ;;  %v8298_v50 = vld [vmem:[#allocation9 + $0x128] sm:$0xff]  ;;  %v8297_v17 = vld [vmem:[#allocation9 + $0x120] sm:$0xff] }
 0x49e   : > { %5248 = vmatpush.bf16.msra.mxu3 %v8289_v38  ;;  %v8315_v16 = vld [vmem:[#allocation9 + $0x1b0] sm:$0xff]  ;;  %v8306_v12 = vld [vmem:[#allocation9 + $0x168] sm:$0xff]  ;;  %v8305_v18 = vld [vmem:[#allocation9 + $0x160] sm:$0xff] }
 0x49f   : > { %5207 = vmatpush.bf16.msra.mxu0 %v8264_v39  ;;  %v8323_v46 = vld [vmem:[#allocation9 + $0x1f0] sm:$0xff]  ;;  %v8314_v14 = vld [vmem:[#allocation9 + $0x1a8] sm:$0xff]  ;;  %v8313_v19 = vld [vmem:[#allocation9 + $0x1a0] sm:$0xff] }
 0x4a0   : > { %5221 = vmatpush.bf16.msra.mxu1 %v8272_v40  ;;  %v8322_v15 = vld [vmem:[#allocation9 + $0x1e8] sm:$0xff]  ;;  %v8321_v21 = vld [vmem:[#allocation9 + $0x1e0] sm:$0xff]  ;;  %v8296_v22 = vld [vmem:[#allocation9 + $0x118] sm:$0xff] }
 0x4a1   : > { %5235 = vmatpush.bf16.msra.mxu2 %v8280_v4  ;;  %v8304_v23 = vld [vmem:[#allocation9 + $0x158] sm:$0xff]  ;;  %v8295_v48 = vld [vmem:[#allocation9 + $0x110] sm:$0xff]  ;;  %v8294_v28 = vld [vmem:[#allocation9 + $0x108] sm:$0xff] }
 0x4a2   : > { %5249 = vmatpush.bf16.msra.mxu3 %v8288_v41  ;;  %v8312_v24 = vld [vmem:[#allocation9 + $0x198] sm:$0xff]  ;;  %v8303_v25 = vld [vmem:[#allocation9 + $0x150] sm:$0xff]  ;;  %v8302_v56 = vld [vmem:[#allocation9 + $0x148] sm:$0xff] }
 0x4a3   : > { %5208 = vmatpush.bf16.msra.mxu0 %v8263_v43  ;;  %v8320_v3 = vld [vmem:[#allocation9 + $0x1d8] sm:$0xff]  ;;  %v8311_v26 = vld [vmem:[#allocation9 + $0x190] sm:$0xff]  ;;  %v8310_v29 = vld [vmem:[#allocation9 + $0x188] sm:$0xff] }
 0x4a4   : > { %5222 = vmatpush.bf16.msra.mxu1 %v8271_v44  ;;  %v8319_v27 = vld [vmem:[#allocation9 + $0x1d0] sm:$0xff]  ;;  %v8318_v30 = vld [vmem:[#allocation9 + $0x1c8] sm:$0xff]  ;;  %v8293_v31 = vld [vmem:[#allocation9 + $0x100] sm:$0xff] }
 0x4a5   : > { %5236 = vmatpush.bf16.msra.mxu2 %v8279_v45  ;;  %v8301_v32 = vld [vmem:[#allocation9 + $0x140] sm:$0xff]  ;;  %v4667_v35 = vld [vmem:[#allocation2 + $0x50] sm:$0xff]  ;;  %v4675_v36 = vld [vmem:[#allocation2 + $0x60] sm:$0xff] }
 0x4a6   : > { %5250 = vmatpush.bf16.msra.mxu3 %v8287_v61  ;;  %v8309_v33 = vld [vmem:[#allocation9 + $0x180] sm:$0xff]  ;;  %v4668_v37 = vld [vmem:[#allocation2 + $0x68] sm:$0xff]  ;;  %v4676_v38 = vld [vmem:[#allocation2 + $0x70] sm:$0xff]  ;;  %v4683_v43 = vpack.c.bf16 %v4675_v36, %v4667_v35 }
 0x4a7   : > { %5209 = vmatpush.bf16.msra.mxu0 %v8262_v49  ;;  %v8317_v34 = vld [vmem:[#allocation9 + $0x1c0] sm:$0xff]  ;;  %v4669_v39 = vld [vmem:[#allocation2 + $0x8] sm:$0xff]  ;;  %v4684_v44 = vpack.c.bf16 %v4676_v38, %v4668_v37 }
 0x4a8   : > { %5223 = vmatpush.bf16.msra.mxu1 %v8270_v20  ;;  %v4677_v40 = vld [vmem:[#allocation2 + $0x78] sm:$0xff]  ;;  %v4670_v4 = vld [vmem:[#allocation2 + $0x48] sm:$0xff] }
 0x4a9   : > { %5237 = vmatpush.bf16.msra.mxu2 %v8278_v51  ;;  %v4678_v41 = vld [vmem:[#allocation2 + $0x28] sm:$0xff]  ;;  %v4685_v45 = vpack.c.bf16 %v4677_v40, %v4669_v39  ;;  %v8423_v20 = vld [vmem:[#allocation11] ss:$0 sm:$0xff] }
 0x4aa   : > { %5251 = vmatpush.bf16.msra.mxu3 %v8286_v52  ;;  %v4686_v61 = vpack.c.bf16 %v4678_v41, %v4670_v4 }
 0x4ab   : > { %5210 = vmatpush.bf16.msra.mxu0 %v8261_v13 }
 0x4ac   : > { %5224 = vmatpush.bf16.msra.mxu1 %v8269_v53 }
 0x4ad   : > { %5238 = vmatpush.bf16.msra.mxu2 %v8277_v54 }
 0x4ae   : > { %5252 = vmatpush.bf16.msra.mxu3 %v8285_v55  ;;  %5211 = vmatmul.bf16.vlgmr.msra.gmra.mxu0 %v4679_v42 }
 0x4af   : > { %5259 = vmatpush.bf16.msrb.mxu0 %v8300_v57  ;;  %5225 = vmatmul.bf16.vlgmr.msra.gmra.mxu1 %v4680_v11 }
 0x4b0   : > { %5273 = vmatpush.bf16.msrb.mxu1 %v8308_v58  ;;  %5239 = vmatmul.bf16.vlgmr.msra.gmra.mxu2 %v4681_v9 }
 0x4b1   : > { %5287 = vmatpush.bf16.msrb.mxu2 %v8316_v7  ;;  %5253 = vmatmul.bf16.vlgmr.msra.gmra.mxu3 %v4682_v10 }
 0x4b2   : > { %5301 = vmatpush.bf16.msrb.mxu3 %v8324_v8 }
 0x4b3   : > { %5260 = vmatpush.bf16.msrb.mxu0 %v8299_v47 }
 0x4b4   : > { %5274 = vmatpush.bf16.msrb.mxu1 %v8307_v62 }
 0x4b5   : > { %5288 = vmatpush.bf16.msrb.mxu2 %v8315_v16 }
 0x4b6   : > { %5302 = vmatpush.bf16.msrb.mxu3 %v8323_v46 }
 0x4b7   : > { %5261 = vmatpush.bf16.msrb.mxu0 %v8298_v50 }
 0x4b8   : > { %5275 = vmatpush.bf16.msrb.mxu1 %v8306_v12 }
 0x4b9   : > { %5289 = vmatpush.bf16.msrb.mxu2 %v8314_v14 }
 0x4ba   : > { %5303 = vmatpush.bf16.msrb.mxu3 %v8322_v15 }
 0x4bb   : > { %5262 = vmatpush.bf16.msrb.mxu0 %v8297_v17 }
 0x4bc   : > { %5276 = vmatpush.bf16.msrb.mxu1 %v8305_v18 }
 0x4bd   : > { %5290 = vmatpush.bf16.msrb.mxu2 %v8313_v19 }
 0x4be   : > { %5304 = vmatpush.bf16.msrb.mxu3 %v8321_v21 }
 0x4bf   : > { %5263 = vmatpush.bf16.msrb.mxu0 %v8296_v22 }
 0x4c0   : > { %5277 = vmatpush.bf16.msrb.mxu1 %v8304_v23 }
 0x4c1   : > { %5291 = vmatpush.bf16.msrb.mxu2 %v8312_v24 }
 0x4c2   : > { %5305 = vmatpush.bf16.msrb.mxu3 %v8320_v3 }
 0x4c3   : > { %5264 = vmatpush.bf16.msrb.mxu0 %v8295_v48 }
 0x4c4   : > { %5278 = vmatpush.bf16.msrb.mxu1 %v8303_v25 }
 0x4c5   : > { %5292 = vmatpush.bf16.msrb.mxu2 %v8311_v26 }
 0x4c6   : > { %5306 = vmatpush.bf16.msrb.mxu3 %v8319_v27 }
 0x4c7   : > { %5265 = vmatpush.bf16.msrb.mxu0 %v8294_v28 }
 0x4c8   : > { %5279 = vmatpush.bf16.msrb.mxu1 %v8302_v56 }
 0x4c9   : > { %5293 = vmatpush.bf16.msrb.mxu2 %v8310_v29 }
 0x4ca   : > { %5307 = vmatpush.bf16.msrb.mxu3 %v8318_v30 }
 0x4cb   : > { %5266 = vmatpush.bf16.msrb.mxu0 %v8293_v31 }
 0x4cc   : > { %5280 = vmatpush.bf16.msrb.mxu1 %v8301_v32 }
 0x4cd   : > { %5294 = vmatpush.bf16.msrb.mxu2 %v8309_v33 }
 0x4ce   : > { %5308 = vmatpush.bf16.msrb.mxu3 %v8317_v34  ;;  %5267 = vmatmul.bf16.vlgmr.msrb.gmra.mxu0 %v4683_v43 }
 0x4cf   : > { %5281 = vmatmul.bf16.vlgmr.msrb.gmra.mxu1 %v4684_v44 }
 0x4d0   : > { %5295 = vmatmul.bf16.vlgmr.msrb.gmra.mxu2 %v4685_v45 }
 0x4d1   : > { %5309 = vmatmul.bf16.vlgmr.msrb.gmra.mxu3 %v4686_v61 }
 0x52b   : > { %v5212_v49 = vpop.f32.mrf.mxu0 }
 0x52c   : > { %v5226_v51 = vpop.f32.mrf.mxu1  ;;  %v5213_v52 = vadd.f32 %v8423_v20, %v5212_v49 }
 0x52e   : > { %v5227_v54 = vadd.f32 %v5226_v51, %v5213_v52 }
 0x533   : > { %v5240_v13 = vpop.f32.mrf.mxu2  ;;  %v5214_v55 = vpop.f32.mrf.mxu0 }
 0x534   : > { %v5254_v53 = vpop.f32.mrf.mxu3  ;;  %v5228_v57 = vpop.f32.mrf.mxu1  ;;  %v5241_v58 = vadd.f32 %v5240_v13, %v5227_v54  ;;  %v5215_v59 = vadd.f32 %v8423_v20, %v5214_v55 }
 0x536   : > { %v5255_v0 = vadd.f32 %v5254_v53, %v5241_v58  ;;  %v5229_v1 = vadd.f32 %v5228_v57, %v5215_v59 }
 0x53b   : > { %v5242_v60 = vpop.f32.mrf.mxu2 }
 0x53c   : > { %v5256_v63 = vpop.f32.mrf.mxu3  ;;  %v5243_v7 = vadd.f32 %v5242_v60, %v5229_v1 }
 0x53e   : > { %v5257_v10 = vadd.f32 %v5256_v63, %v5243_v7 }
 0x54b   : > { %v5268_v2 = vpop.f32.mrf.mxu0 }
 0x54c   : > { %v5269_v5 = vadd.f32 %v5268_v2, %v5255_v0  ;;  %v5282_v6 = vpop.f32.mrf.mxu1 }
 0x54e   : > { %v5283_v8 = vadd.f32 %v5282_v6, %v5269_v5 }
 0x553   : > { %v5296_v9 = vpop.f32.mrf.mxu2  ;;  %v5270_v47 = vpop.f32.mrf.mxu0 }
 0x554   : > { %v5310_v42 = vpop.f32.mrf.mxu3  ;;  %v5297_v11 = vadd.f32 %v5296_v9, %v5283_v8  ;;  %v5271_v16 = vadd.f32 %v5270_v47, %v5257_v10  ;;  %v5284_v46 = vpop.f32.mrf.mxu1 }
 0x556   : > { %v5311_v62 = vadd.f32 %v5310_v42, %v5297_v11  ;;  %v5285_v50 = vadd.f32 %v5284_v46, %v5271_v16 }
 0x558   : > { %5315 = vst [vmem:[%s10042_s7] sm:$0xff] %v5311_v62 }
 0x55b   : > { %v5298_v12 = vpop.f32.mrf.mxu2 }
 0x55c   : > { %v5299_v14 = vadd.f32 %v5298_v12, %v5285_v50  ;;  %v5312_v15 = vpop.f32.mrf.mxu3 }
 0x55e   : > { %v5313_v17 = vadd.f32 %v5312_v15, %v5299_v14 }
 0x560   : > { %5316 = vst [vmem:[%s10042_s7 + $0x8] sm:$0xff] %v5313_v17 }
 0x561 PF: > { %p17_p4 = scmp.ge.s32.totalorder %s8777_s22, 12   ;;  %s10047_s24 = smov %s8646_s25 }
 0x562   : > { %s10048_s25 = smov %s8650_s26  ;;  %s10049_s26 = smov %s8787_s30 }
 0x563   : > { %s10050_s27 = smov %s8777_s22  ;;  %19 = sbr.rel (!%p17_p4) target bundleno = 4 (0x4), region = 112 }
 0x568   :  { %5328 = vsyncpa [#allocation4], 1 }
 0x569   :  { %5330 = vsyncpa [#allocation4 + $0x1], 1 }
 0x56a   :  { %5331 = vsyncpa [#allocation6], 1 }
 0x56b   :  { %5332 = vsyncpa [#allocation10], 1 }

</bundles_post_ra>
